<compile_context>
chip_gen: v7x
topology: tpu7x:2x2x1
jax: 0.10.0
libtpu: 0.0.40
codegen_flags: <defaults>
</compile_context>

<pallas_src>
import functools

import jax
import jax.numpy as jnp
from jax.experimental import pallas as pl
from jax.experimental.pallas import tpu as pltpu


# -----------------------------------------------------------------------------
# Tiled GEMM + bias kernel (final vocab projection)
# -----------------------------------------------------------------------------
def _linear_kernel(x_ref, w_ref, b_ref, o_ref):
    o_ref[...] = (jnp.dot(x_ref[...], w_ref[...],
                          preferred_element_type=jnp.float32)
                  + b_ref[...]).astype(o_ref.dtype)


def linear(x2d, w_t, b, *, tm=1024, tn=512):
    """(N, K) @ (K, V) + (1, V) -> (N, V) f32.

    tm defaults large so N/tm is small and the (K, V) weight is streamed from HBM
    ~once (it was the dominant HBM cost at real vocab sizes).  The x tile is constant
    over the inner (V) grid axis so it is not re-DMA'd between column tiles.
    """
    N, K = x2d.shape
    V = w_t.shape[1]
    tm = min(tm, N)
    tn = min(tn, V)
    grid = (pl.cdiv(N, tm), pl.cdiv(V, tn))
    return pl.pallas_call(
        _linear_kernel,
        out_shape=jax.ShapeDtypeStruct((N, V), jnp.float32),
        grid_spec=pltpu.PrefetchScalarGridSpec(
            num_scalar_prefetch=0,
            grid=grid,
            in_specs=[
                pl.BlockSpec((tm, K), lambda i, j: (i, 0)),
                pl.BlockSpec((K, tn), lambda i, j: (0, j)),
                pl.BlockSpec((1, tn), lambda i, j: (0, j)),
            ],
            out_specs=pl.BlockSpec((tm, tn), lambda i, j: (i, j)),
        ),
        compiler_params=pltpu.CompilerParams(
            dimension_semantics=("parallel", "parallel"),
            vmem_limit_bytes=64 * 1024 * 1024),
    )(x2d, w_t, b)


# -----------------------------------------------------------------------------
# Fused multi-layer LSTM stack, time-chunked grid, persistent h/c VMEM scratch
# -----------------------------------------------------------------------------
def _lstm_stack_kernel(*refs, num_layers, hidden_dim, batch, t_chunk, t_total,
                       has_init_state, need_output):
    L, H, B, Tt, T = num_layers, hidden_dim, batch, t_chunk, t_total
    it = iter(refs)
    x_ref = next(it)                                   # (Tt*B, E) embeddings (time-major rows)
    w_ih0_ref = next(it)                               # (E, 4H)   bf16, VMEM-resident
    b0_ref = next(it)                                  # (1, 4H)   f32 (b_ih + b_hh, layer 0)
    w_hh_ref = next(it)                                # (L, H, 4H) bf16, VMEM-resident
    w_ih_ref = next(it) if L > 1 else None             # (L-1, H, 4H)
    b_ref = next(it) if L > 1 else None                # (L-1, 1, 4H) f32
    h0_ref = next(it) if has_init_state else None      # (L, B, H) f32
    c0_ref = next(it) if has_init_state else None      # (L, B, H) f32
    out_ref = next(it) if need_output else None        # (B, Tt, H) batch-first chunk
    hT_ref = next(it)                                  # (L, B, H) f32
    cT_ref = next(it)                                  # (L, B, H) f32
    h_sc = next(it)                                    # VMEM scratch (L, B, H) f32
    c_sc = next(it)                                    # VMEM scratch (L, B, H) f32

    c_idx = pl.program_id(0)
    n_chunks = pl.num_programs(0)

    @pl.when(c_idx == 0)
    def _init():
        if has_init_state:
            h_sc[...] = h0_ref[...].astype(jnp.float32)
            c_sc[...] = c0_ref[...].astype(jnp.float32)
        else:
            h_sc[...] = jnp.zeros_like(h_sc)
            c_sc[...] = jnp.zeros_like(c_sc)

    cdt = w_hh_ref.dtype                               # matmul compute dtype (bf16)

    # Layer-0 input projection for the whole time chunk: ONE MXU GEMM (bias folded in).
    # Replaces the old separately-hoisted GEMM + (T,B,4H) HBM round trip.
    gx = (jnp.dot(x_ref[...], w_ih0_ref[...], preferred_element_type=jnp.float32)
          + b0_ref[...].astype(jnp.float32))           # (Tt*B, 4H) f32

    def step(tt):
        # Hoist the recurrent matmuls of ALL layers: they only depend on t-1 state,
        # so the MXU pushes pipeline back-to-back ahead of the gate nonlinearities.
        rec = [jnp.dot(h_sc[l].astype(cdt), w_hh_ref[l],
                       preferred_element_type=jnp.float32) for l in range(L)]
        layer_in = None
        for l in range(L):
            if l == 0:
                gates = gx[tt * B:(tt + 1) * B] + rec[0]       # bias already in gx
            else:
                gates = (jnp.dot(layer_in.astype(cdt), w_ih_ref[l - 1],
                                 preferred_element_type=jnp.float32)
                         + rec[l] + b_ref[l - 1].astype(jnp.float32))
            # PyTorch nn.LSTM gate order [i, f, g, o]; gate math stays f32.
            i_g = jax.nn.sigmoid(gates[:, 0 * H:1 * H])
            f_g = jax.nn.sigmoid(gates[:, 1 * H:2 * H])
            g_g = jnp.tanh(gates[:, 2 * H:3 * H])
            o_g = jax.nn.sigmoid(gates[:, 3 * H:4 * H])
            c_new = f_g * c_sc[l] + i_g * g_g
            h_new = o_g * jnp.tanh(c_new)
            h_sc[l] = h_new
            c_sc[l] = c_new
            layer_in = h_new                           # input to the next layer
        if need_output:
            out_ref[:, tt, :] = layer_in.astype(out_ref.dtype)   # batch-first write

    # Statically unrolled loop over the Tt timesteps of this chunk (== fori_loop with
    # unroll=True).  Only steps that can fall past T in the ragged last chunk get a
    # pl.when guard, so full chunks run guard-free.
    rem = T % Tt
    for tt in range(Tt):
        if rem != 0 and tt >= rem:
            @pl.when(c_idx * Tt + tt < T)
            def _guarded(tt=tt):
                step(tt)
        else:
            step(tt)

    @pl.when(c_idx == n_chunks - 1)
    def _final():
        hT_ref[...] = h_sc[...].astype(hT_ref.dtype)
        cT_ref[...] = c_sc[...].astype(cT_ref.dtype)


def run_lstm_stack(x_tm2d, lstm_params, *, init_state, need_output, hidden_dim,
                   num_layers, batch, seq_len, time_chunk=16):
    """Multi-layer LSTM (nn.LSTM eval semantics).

    x_tm2d:      (T*B, E) time-major flattened embeddings (row t*B+b = step t, batch b)
    lstm_params: dict with pre-transposed / pre-stacked weights (see init_lstm_params)
    init_state:  None (zeros, done in-kernel) or (h0, c0) each (L, B, H) f32
    returns:     out (B, T, H) batch-first (or None if need_output=False),
                 hT (L, B, H) f32, cT (L, B, H) f32
    """
    H, L, B, T = hidden_dim, num_layers, batch, seq_len
    E = x_tm2d.shape[-1]
    assert x_tm2d.shape[0] == T * B

    # Time-chunk size: full sequence if it fits, else a multiple of 8 (tiling rules
    # for the (Tt*B, E) input block and the (B, Tt, H) output block).
    Tt = T if T <= time_chunk else max(8, (time_chunk // 8) * 8)
    n_chunks = pl.cdiv(T, Tt)

    cdt = lstm_params["w_hh"].dtype

    inputs = [x_tm2d.astype(cdt), lstm_params["w_ih0"], lstm_params["b0"],
              lstm_params["w_hh"]]
    in_specs = [
        pl.BlockSpec((Tt * B, E), lambda c: (c, 0)),            # streamed per chunk
        pl.BlockSpec((E, 4 * H), lambda c: (0, 0)),             # VMEM-resident weights
        pl.BlockSpec((1, 4 * H), lambda c: (0, 0)),
        pl.BlockSpec((L, H, 4 * H), lambda c: (0, 0, 0)),
    ]
    if L > 1:
        inputs += [lstm_params["w_ih_rest"], lstm_params["b_rest"]]
        in_specs += [
            pl.BlockSpec((L - 1, H, 4 * H), lambda c: (0, 0, 0)),
            pl.BlockSpec((L - 1, 1, 4 * H), lambda c: (0, 0, 0)),
        ]
    has_init = init_state is not None
    if has_init:
        h0, c0 = init_state
        inputs += [h0, c0]
        in_specs += [pl.BlockSpec((L, B, H), lambda c: (0, 0, 0)),
                     pl.BlockSpec((L, B, H), lambda c: (0, 0, 0))]

    out_shapes, out_specs = [], []
    if need_output:
        # Batch-first output written directly by the kernel (no relayout before FC).
        out_shapes.append(jax.ShapeDtypeStruct((B, T, H), cdt))
        out_specs.append(pl.BlockSpec((B, Tt, H), lambda c: (0, c, 0)))
    out_shapes += [jax.ShapeDtypeStruct((L, B, H), jnp.float32)] * 2
    out_specs += [pl.BlockSpec((L, B, H), lambda c: (0, 0, 0)),
                  pl.BlockSpec((L, B, H), lambda c: (0, 0, 0))]

    kernel = functools.partial(
        _lstm_stack_kernel, num_layers=L, hidden_dim=H, batch=B, t_chunk=Tt,
        t_total=T, has_init_state=has_init, need_output=need_output)

    outs = pl.pallas_call(
        kernel,
        out_shape=tuple(out_shapes),
        grid_spec=pltpu.PrefetchScalarGridSpec(
            num_scalar_prefetch=0,
            grid=(n_chunks,),
            in_specs=in_specs,
            out_specs=out_specs,
            scratch_shapes=[pltpu.VMEM((L, B, H), jnp.float32),
                            pltpu.VMEM((L, B, H), jnp.float32)],
        ),
        compiler_params=pltpu.CompilerParams(
            dimension_semantics=("arbitrary",),        # sequential recurrence
            vmem_limit_bytes=64 * 1024 * 1024),
    )(*inputs)

    if need_output:
        out, hT, cT = outs
    else:
        out = None
        hT, cT = outs
    return out, hT, cT


# -----------------------------------------------------------------------------
# Parameter init (deterministic, synthetic) — mirrors nn.Module shapes
# -----------------------------------------------------------------------------
def init_lstm_params(key, input_dim, hidden_dim, num_layers, compute_dtype):
    H = hidden_dim
    bound = hidden_dim ** -0.5
    w_ih, w_hh, bias = [], [], []
    for layer in range(num_layers):
        d_in = input_dim if layer == 0 else H
        key, k1, k2, k3, k4 = jax.random.split(key, 5)
        w_ih.append(jax.random.uniform(k1, (4 * H, d_in), jnp.float32, -bound, bound).T)
        w_hh.append(jax.random.uniform(k2, (4 * H, H), jnp.float32, -bound, bound).T)
        b_ih = jax.random.uniform(k3, (4 * H,), jnp.float32, -bound, bound)
        b_hh = jax.random.uniform(k4, (4 * H,), jnp.float32, -bound, bound)
        bias.append((b_ih + b_hh)[None, :])            # fold b_ih + b_hh, shape (1, 4H)
    params = {
        "w_ih0": w_ih[0].astype(compute_dtype),                 # (E, 4H)
        "b0": bias[0],                                          # (1, 4H) f32
        "w_hh": jnp.stack(w_hh, 0).astype(compute_dtype),       # (L, H, 4H)
    }
    if num_layers > 1:
        params["w_ih_rest"] = jnp.stack(w_ih[1:], 0).astype(compute_dtype)  # (L-1, H, 4H)
        params["b_rest"] = jnp.stack(bias[1:], 0)                           # (L-1, 1, 4H)
    return params, key


def init_params(key, vocab_size, embedding_dim, hidden_dim, num_layers, pad_idx=0,
                compute_dtype=jnp.bfloat16):
    key, k_emb, k_fcw, k_fcb = jax.random.split(key, 4)
    emb = jax.random.normal(k_emb, (vocab_size, embedding_dim), jnp.float32)
    emb = emb.at[pad_idx].set(0.0)  # nn.Embedding(padding_idx=vocab['<PAD>'])
    enc, key = init_lstm_params(key, embedding_dim, hidden_dim, num_layers, compute_dtype)
    dec, key = init_lstm_params(key, embedding_dim, hidden_dim, num_layers, compute_dtype)
    kf = hidden_dim ** -0.5
    fc_w = jax.random.uniform(k_fcw, (vocab_size, hidden_dim), jnp.float32, -kf, kf)
    fc_b = jax.random.uniform(k_fcb, (vocab_size,), jnp.float32, -kf, kf)
    return {
        "embedding": emb,
        "encoder": enc,
        "decoder": dec,
        "fc_w_t": fc_w.T.astype(compute_dtype),   # (H, V) bf16
        "fc_b": fc_b[None, :],                    # (1, V) f32
    }


# -----------------------------------------------------------------------------
# Forward pass (matches LSTMTextSummarizer.forward, eval mode)
# -----------------------------------------------------------------------------
def forward(params, input_tensor, target_tensor=None, *, hidden_dim, num_layers,
            time_chunk=16):
    emb = params["embedding"]
    cdt = params["fc_w_t"].dtype
    B, S = input_tensor.shape
    E = emb.shape[1]

    # Gather embeddings directly into time-major rows (transpose the tiny int array).
    # TODO(synk): the gather could be fused into the LSTM kernel via scalar-prefetch +
    #             pl.Element row gather; kept as an XLA take (modest win, E is small).
    enc_in = jnp.take(emb, input_tensor.T, axis=0).reshape(S * B, E).astype(cdt)
    # TODO(synk): inter-layer dropout (training-mode only in PyTorch) is not applied.
    _, hidden, cell = run_lstm_stack(enc_in, params["encoder"], init_state=None,
                                     need_output=False, hidden_dim=hidden_dim,
                                     num_layers=num_layers, batch=B, seq_len=S,
                                     time_chunk=time_chunk)
    if target_tensor is not None:
        Td = target_tensor.shape[1] - 1
        dec_in = (jnp.take(emb, target_tensor[:, :-1].T, axis=0)
                  .reshape(Td * B, E).astype(cdt))
        dec_out, _, _ = run_lstm_stack(dec_in, params["decoder"],
                                       init_state=(hidden, cell), need_output=True,
                                       hidden_dim=hidden_dim, num_layers=num_layers,
                                       batch=B, seq_len=Td, time_chunk=time_chunk)
        # dec_out is already batch-first (B, Td, H): contiguous reshape, no relayout.
        logits = linear(dec_out.reshape(B * Td, hidden_dim),
                        params["fc_w_t"], params["fc_b"])
        return logits.reshape(B, Td, -1)
    return hidden, cell


# -----------------------------------------------------------------------------
if __name__ == "__main__":
    VOCAB_SIZE = 64
    EMBEDDING_DIM = 16
    HIDDEN_DIM = 32
    NUM_LAYERS = 2
    B, SRC_LEN, TGT_LEN = 2, 20, 12     # exercises multi-chunk + ragged last chunk
    TIME_CHUNK = 8

    key = jax.random.PRNGKey(0)
    key, k_in, k_tgt = jax.random.split(key, 3)
    params = init_params(key, VOCAB_SIZE, EMBEDDING_DIM, HIDDEN_DIM, NUM_LAYERS)

    input_tensor = jax.random.randint(k_in, (B, SRC_LEN), 0, VOCAB_SIZE, jnp.int32)
    target_tensor = jax.random.randint(k_tgt, (B, TGT_LEN), 0, VOCAB_SIZE, jnp.int32)

    logits = forward(params, input_tensor, target_tensor,
                     hidden_dim=HIDDEN_DIM, num_layers=NUM_LAYERS,
                     time_chunk=TIME_CHUNK)
    logits = jax.block_until_ready(logits)
    assert logits.shape == (B, TGT_LEN - 1, VOCAB_SIZE), logits.shape
    assert logits.dtype == jnp.float32
    assert bool(jnp.all(jnp.isfinite(logits)))

    # inference branch (no target): returns (hidden, cell)
    hidden, cell = forward(params, input_tensor, None,
                           hidden_dim=HIDDEN_DIM, num_layers=NUM_LAYERS,
                           time_chunk=TIME_CHUNK)
    jax.block_until_ready((hidden, cell))
    assert hidden.shape == (NUM_LAYERS, B, HIDDEN_DIM)
    assert cell.shape == (NUM_LAYERS, B, HIDDEN_DIM)

    print("KERNEL_OK")
</pallas_src>

<mosaic_0001>
module attributes {stable_mosaic.version = 11 : i64} {
  func.func @_lstm_stack_kernel(%arg0: i32, %arg1: memref<16x16xbf16, #tpu.memory_space<vmem>>, %arg2: memref<16x128xbf16, #tpu.memory_space<vmem>>, %arg3: memref<1x128xf32, #tpu.memory_space<vmem>>, %arg4: memref<2x32x128xbf16, #tpu.memory_space<vmem>>, %arg5: memref<1x32x128xbf16, #tpu.memory_space<vmem>>, %arg6: memref<1x1x128xf32, #tpu.memory_space<vmem>>, %arg7: memref<2x2x32xf32, #tpu.memory_space<vmem>>, %arg8: memref<2x2x32xf32, #tpu.memory_space<vmem>>, %arg9: memref<2x2x32xf32, #tpu.memory_space<vmem>>, %arg10: memref<2x2x32xf32, #tpu.memory_space<vmem>>) attributes {dimension_semantics = [#tpu.dimension_semantics<arbitrary>], iteration_bounds = array<i64: 3>, scalar_prefetch = 0 : i64, scratch_operands = 2 : i64, tpu.core_type = #tpu.core_type<tc>, window_params = [{transform_indices = @transform_0, window_bounds = array<i64: 16, 16>}, {pipeline_mode = #tpu.pipeline_mode<synchronous>, transform_indices = @transform_1, window_bounds = array<i64: 16, 128>}, {pipeline_mode = #tpu.pipeline_mode<synchronous>, transform_indices = @transform_2, window_bounds = array<i64: 1, 128>}, {pipeline_mode = #tpu.pipeline_mode<synchronous>, transform_indices = @transform_3, window_bounds = array<i64: 2, 32, 128>}, {pipeline_mode = #tpu.pipeline_mode<synchronous>, transform_indices = @transform_4, window_bounds = array<i64: 1, 32, 128>}, {pipeline_mode = #tpu.pipeline_mode<synchronous>, transform_indices = @transform_5, window_bounds = array<i64: 1, 1, 128>}, {pipeline_mode = #tpu.pipeline_mode<synchronous>, transform_indices = @transform_6, window_bounds = array<i64: 2, 2, 32>}, {pipeline_mode = #tpu.pipeline_mode<synchronous>, transform_indices = @transform_7, window_bounds = array<i64: 2, 2, 32>}]} {
    %c0_i32 = arith.constant 0 : i32
    %0 = arith.cmpi eq, %arg0, %c0_i32 : i32
    %1 = arith.extui %0 : i1 to i32
    %c0_i32_0 = arith.constant 0 : i32
    %2 = arith.cmpi ne, %1, %c0_i32_0 : i32
    scf.if %2 {
      %cst_196 = arith.constant 0.000000e+00 : f32
      %388 = vector.broadcast %cst_196 : f32 to vector<2x2x32xf32>
      %c0_197 = arith.constant 0 : index
      %c0_198 = arith.constant 0 : index
      %c0_199 = arith.constant 0 : index
      %389 = vector.load %arg9[%c0_197, %c0_198, %c0_199] : memref<2x2x32xf32, #tpu.memory_space<vmem>>, vector<2x2x32xf32>
      tpu.vector_store %arg9[%c0_197, %c0_198, %c0_199], %388 {strides = array<i32>} : memref<2x2x32xf32, #tpu.memory_space<vmem>>, vector<2x2x32xf32>,
      %cst_200 = arith.constant 0.000000e+00 : f32
      %390 = vector.broadcast %cst_200 : f32 to vector<2x2x32xf32>
      %c0_201 = arith.constant 0 : index
      %c0_202 = arith.constant 0 : index
      %c0_203 = arith.constant 0 : index
      %391 = vector.load %arg10[%c0_201, %c0_202, %c0_203] : memref<2x2x32xf32, #tpu.memory_space<vmem>>, vector<2x2x32xf32>
      tpu.vector_store %arg10[%c0_201, %c0_202, %c0_203], %390 {strides = array<i32>} : memref<2x2x32xf32, #tpu.memory_space<vmem>>, vector<2x2x32xf32>,
    } else {
    }
    %c0 = arith.constant 0 : index
    %c0_1 = arith.constant 0 : index
    %3 = vector.load %arg1[%c0, %c0_1] : memref<16x16xbf16, #tpu.memory_space<vmem>>, vector<16x16xbf16>
    %c0_2 = arith.constant 0 : index
    %c0_3 = arith.constant 0 : index
    %4 = vector.load %arg2[%c0_2, %c0_3] : memref<16x128xbf16, #tpu.memory_space<vmem>>, vector<16x128xbf16>
    %cst = arith.constant dense<0.000000e+00> : vector<16x128xf32>
    %5 = tpu.matmul %3, %4, %cst {dimension_numbers = #tpu.dot_dimension_numbers<[1], [0], [0], [1], [0, 0, 1, 1], [], []>} : vector<16x16xbf16>, vector<16x128xbf16>, vector<16x128xf32> -> vector<16x128xf32>
    %c0_4 = arith.constant 0 : index
    %c0_5 = arith.constant 0 : index
    %6 = vector.load %arg3[%c0_4, %c0_5] : memref<1x128xf32, #tpu.memory_space<vmem>>, vector<1x128xf32>
    %7 = vector.broadcast %6 : vector<1x128xf32> to vector<16x128xf32>
    %8 = arith.addf %5, %7 : vector<16x128xf32>
    %c0_6 = arith.constant 0 : index
    %c0_7 = arith.constant 0 : index
    %c0_8 = arith.constant 0 : index
    %9 = vector.load %arg9[%c0_6, %c0_7, %c0_8] : memref<2x2x32xf32, #tpu.memory_space<vmem>>, vector<1x2x32xf32>
    %10 = vector.shape_cast %9 : vector<1x2x32xf32> to vector<2x32xf32>
    %11 = arith.truncf %10 : vector<2x32xf32> to vector<2x32xbf16>
    %c0_9 = arith.constant 0 : index
    %c0_10 = arith.constant 0 : index
    %c0_11 = arith.constant 0 : index
    %12 = vector.load %arg4[%c0_9, %c0_10, %c0_11] : memref<2x32x128xbf16, #tpu.memory_space<vmem>>, vector<1x32x128xbf16>
    %13 = vector.shape_cast %12 : vector<1x32x128xbf16> to vector<32x128xbf16>
    %cst_12 = arith.constant dense<0.000000e+00> : vector<2x128xf32>
    %14 = tpu.matmul %11, %13, %cst_12 {dimension_numbers = #tpu.dot_dimension_numbers<[1], [0], [0], [1], [0, 0, 1, 1], [], []>} : vector<2x32xbf16>, vector<32x128xbf16>, vector<2x128xf32> -> vector<2x128xf32>
    %c1 = arith.constant 1 : index
    %c0_13 = arith.constant 0 : index
    %c0_14 = arith.constant 0 : index
    %15 = vector.load %arg9[%c1, %c0_13, %c0_14] : memref<2x2x32xf32, #tpu.memory_space<vmem>>, vector<1x2x32xf32>
    %16 = vector.shape_cast %15 : vector<1x2x32xf32> to vector<2x32xf32>
    %17 = arith.truncf %16 : vector<2x32xf32> to vector<2x32xbf16>
    %c1_15 = arith.constant 1 : index
    %c0_16 = arith.constant 0 : index
    %c0_17 = arith.constant 0 : index
    %18 = vector.load %arg4[%c1_15, %c0_16, %c0_17] : memref<2x32x128xbf16, #tpu.memory_space<vmem>>, vector<1x32x128xbf16>
    %19 = vector.shape_cast %18 : vector<1x32x128xbf16> to vector<32x128xbf16>
    %cst_18 = arith.constant dense<0.000000e+00> : vector<2x128xf32>
    %20 = tpu.matmul %17, %19, %cst_18 {dimension_numbers = #tpu.dot_dimension_numbers<[1], [0], [0], [1], [0, 0, 1, 1], [], []>} : vector<2x32xbf16>, vector<32x128xbf16>, vector<2x128xf32> -> vector<2x128xf32>
    %21 = vector.extract_strided_slice %8 {offsets = [0, 0], sizes = [2, 128], strides = [1, 1]} : vector<16x128xf32> to vector<2x128xf32>
    %22 = arith.addf %21, %14 : vector<2x128xf32>
    %23 = vector.extract_strided_slice %22 {offsets = [0, 0], sizes = [2, 32], strides = [1, 1]} : vector<2x128xf32> to vector<2x32xf32>
    %24 = arith.negf %23 : vector<2x32xf32>
    %25 = math.exp %24 : vector<2x32xf32>
    %cst_19 = arith.constant 1.000000e+00 : f32
    %26 = vector.broadcast %cst_19 : f32 to vector<2x32xf32>
    %27 = arith.addf %26, %25 : vector<2x32xf32>
    %28 = arith.divf %26, %27 : vector<2x32xf32>
    %29 = vector.extract_strided_slice %22 {offsets = [0, 32], sizes = [2, 32], strides = [1, 1]} : vector<2x128xf32> to vector<2x32xf32>
    %30 = arith.negf %29 : vector<2x32xf32>
    %31 = math.exp %30 : vector<2x32xf32>
    %cst_20 = arith.constant 1.000000e+00 : f32
    %32 = vector.broadcast %cst_20 : f32 to vector<2x32xf32>
    %33 = arith.addf %32, %31 : vector<2x32xf32>
    %34 = arith.divf %32, %33 : vector<2x32xf32>
    %35 = vector.extract_strided_slice %22 {offsets = [0, 64], sizes = [2, 32], strides = [1, 1]} : vector<2x128xf32> to vector<2x32xf32>
    %36 = math.tanh %35 : vector<2x32xf32>
    %37 = vector.extract_strided_slice %22 {offsets = [0, 96], sizes = [2, 32], strides = [1, 1]} : vector<2x128xf32> to vector<2x32xf32>
    %38 = arith.negf %37 : vector<2x32xf32>
    %39 = math.exp %38 : vector<2x32xf32>
    %cst_21 = arith.constant 1.000000e+00 : f32
    %40 = vector.broadcast %cst_21 : f32 to vector<2x32xf32>
    %41 = arith.addf %40, %39 : vector<2x32xf32>
    %42 = arith.divf %40, %41 : vector<2x32xf32>
    %c0_22 = arith.constant 0 : index
    %c0_23 = arith.constant 0 : index
    %c0_24 = arith.constant 0 : index
    %43 = vector.load %arg10[%c0_22, %c0_23, %c0_24] : memref<2x2x32xf32, #tpu.memory_space<vmem>>, vector<1x2x32xf32>
    %44 = vector.shape_cast %43 : vector<1x2x32xf32> to vector<2x32xf32>
    %45 = arith.mulf %34, %44 : vector<2x32xf32>
    %46 = arith.mulf %28, %36 : vector<2x32xf32>
    %47 = arith.addf %45, %46 : vector<2x32xf32>
    %48 = math.tanh %47 : vector<2x32xf32>
    %49 = arith.mulf %42, %48 : vector<2x32xf32>
    %c0_25 = arith.constant 0 : index
    %c0_26 = arith.constant 0 : index
    %c0_27 = arith.constant 0 : index
    %50 = vector.load %arg9[%c0_25, %c0_26, %c0_27] : memref<2x2x32xf32, #tpu.memory_space<vmem>>, vector<1x2x32xf32>
    %51 = vector.shape_cast %50 : vector<1x2x32xf32> to vector<2x32xf32>
    %52 = vector.shape_cast %49 : vector<2x32xf32> to vector<1x2x32xf32>
    tpu.vector_store %arg9[%c0_25, %c0_26, %c0_27], %52 {strides = array<i32>} : memref<2x2x32xf32, #tpu.memory_space<vmem>>, vector<1x2x32xf32>,
    %c0_28 = arith.constant 0 : index
    %c0_29 = arith.constant 0 : index
    %c0_30 = arith.constant 0 : index
    %53 = vector.load %arg10[%c0_28, %c0_29, %c0_30] : memref<2x2x32xf32, #tpu.memory_space<vmem>>, vector<1x2x32xf32>
    %54 = vector.shape_cast %53 : vector<1x2x32xf32> to vector<2x32xf32>
    %55 = vector.shape_cast %47 : vector<2x32xf32> to vector<1x2x32xf32>
    tpu.vector_store %arg10[%c0_28, %c0_29, %c0_30], %55 {strides = array<i32>} : memref<2x2x32xf32, #tpu.memory_space<vmem>>, vector<1x2x32xf32>,
    %56 = arith.truncf %49 : vector<2x32xf32> to vector<2x32xbf16>
    %c0_31 = arith.constant 0 : index
    %c0_32 = arith.constant 0 : index
    %c0_33 = arith.constant 0 : index
    %57 = vector.load %arg5[%c0_31, %c0_32, %c0_33] : memref<1x32x128xbf16, #tpu.memory_space<vmem>>, vector<1x32x128xbf16>
    %58 = vector.shape_cast %57 : vector<1x32x128xbf16> to vector<32x128xbf16>
    %cst_34 = arith.constant dense<0.000000e+00> : vector<2x128xf32>
    %59 = tpu.matmul %56, %58, %cst_34 {dimension_numbers = #tpu.dot_dimension_numbers<[1], [0], [0], [1], [0, 0, 1, 1], [], []>} : vector<2x32xbf16>, vector<32x128xbf16>, vector<2x128xf32> -> vector<2x128xf32>
    %60 = arith.addf %59, %20 : vector<2x128xf32>
    %c0_35 = arith.constant 0 : index
    %c0_36 = arith.constant 0 : index
    %c0_37 = arith.constant 0 : index
    %61 = vector.load %arg6[%c0_35, %c0_36, %c0_37] : memref<1x1x128xf32, #tpu.memory_space<vmem>>, vector<1x1x128xf32>
    %62 = vector.shape_cast %61 : vector<1x1x128xf32> to vector<1x128xf32>
    %63 = vector.broadcast %62 : vector<1x128xf32> to vector<2x128xf32>
    %64 = arith.addf %60, %63 : vector<2x128xf32>
    %65 = vector.extract_strided_slice %64 {offsets = [0, 0], sizes = [2, 32], strides = [1, 1]} : vector<2x128xf32> to vector<2x32xf32>
    %66 = arith.negf %65 : vector<2x32xf32>
    %67 = math.exp %66 : vector<2x32xf32>
    %cst_38 = arith.constant 1.000000e+00 : f32
    %68 = vector.broadcast %cst_38 : f32 to vector<2x32xf32>
    %69 = arith.addf %68, %67 : vector<2x32xf32>
    %70 = arith.divf %68, %69 : vector<2x32xf32>
    %71 = vector.extract_strided_slice %64 {offsets = [0, 32], sizes = [2, 32], strides = [1, 1]} : vector<2x128xf32> to vector<2x32xf32>
    %72 = arith.negf %71 : vector<2x32xf32>
    %73 = math.exp %72 : vector<2x32xf32>
    %cst_39 = arith.constant 1.000000e+00 : f32
    %74 = vector.broadcast %cst_39 : f32 to vector<2x32xf32>
    %75 = arith.addf %74, %73 : vector<2x32xf32>
    %76 = arith.divf %74, %75 : vector<2x32xf32>
    %77 = vector.extract_strided_slice %64 {offsets = [0, 64], sizes = [2, 32], strides = [1, 1]} : vector<2x128xf32> to vector<2x32xf32>
    %78 = math.tanh %77 : vector<2x32xf32>
    %79 = vector.extract_strided_slice %64 {offsets = [0, 96], sizes = [2, 32], strides = [1, 1]} : vector<2x128xf32> to vector<2x32xf32>
    %80 = arith.negf %79 : vector<2x32xf32>
    %81 = math.exp %80 : vector<2x32xf32>
    %cst_40 = arith.constant 1.000000e+00 : f32
    %82 = vector.broadcast %cst_40 : f32 to vector<2x32xf32>
    %83 = arith.addf %82, %81 : vector<2x32xf32>
    %84 = arith.divf %82, %83 : vector<2x32xf32>
    %c1_41 = arith.constant 1 : index
    %c0_42 = arith.constant 0 : index
    %c0_43 = arith.constant 0 : index
    %85 = vector.load %arg10[%c1_41, %c0_42, %c0_43] : memref<2x2x32xf32, #tpu.memory_space<vmem>>, vector<1x2x32xf32>
    %86 = vector.shape_cast %85 : vector<1x2x32xf32> to vector<2x32xf32>
    %87 = arith.mulf %76, %86 : vector<2x32xf32>
    %88 = arith.mulf %70, %78 : vector<2x32xf32>
    %89 = arith.addf %87, %88 : vector<2x32xf32>
    %90 = math.tanh %89 : vector<2x32xf32>
    %91 = arith.mulf %84, %90 : vector<2x32xf32>
    %c1_44 = arith.constant 1 : index
    %c0_45 = arith.constant 0 : index
    %c0_46 = arith.constant 0 : index
    %92 = vector.load %arg9[%c1_44, %c0_45, %c0_46] : memref<2x2x32xf32, #tpu.memory_space<vmem>>, vector<1x2x32xf32>
    %93 = vector.shape_cast %92 : vector<1x2x32xf32> to vector<2x32xf32>
    %94 = vector.shape_cast %91 : vector<2x32xf32> to vector<1x2x32xf32>
    tpu.vector_store %arg9[%c1_44, %c0_45, %c0_46], %94 {strides = array<i32>} : memref<2x2x32xf32, #tpu.memory_space<vmem>>, vector<1x2x32xf32>,
    %c1_47 = arith.constant 1 : index
    %c0_48 = arith.constant 0 : index
    %c0_49 = arith.constant 0 : index
    %95 = vector.load %arg10[%c1_47, %c0_48, %c0_49] : memref<2x2x32xf32, #tpu.memory_space<vmem>>, vector<1x2x32xf32>
    %96 = vector.shape_cast %95 : vector<1x2x32xf32> to vector<2x32xf32>
    %97 = vector.shape_cast %89 : vector<2x32xf32> to vector<1x2x32xf32>
    tpu.vector_store %arg10[%c1_47, %c0_48, %c0_49], %97 {strides = array<i32>} : memref<2x2x32xf32, #tpu.memory_space<vmem>>, vector<1x2x32xf32>,
    %c0_50 = arith.constant 0 : index
    %c0_51 = arith.constant 0 : index
    %c0_52 = arith.constant 0 : index
    %98 = vector.load %arg9[%c0_50, %c0_51, %c0_52] : memref<2x2x32xf32, #tpu.memory_space<vmem>>, vector<1x2x32xf32>
    %99 = vector.shape_cast %98 : vector<1x2x32xf32> to vector<2x32xf32>
    %100 = arith.truncf %99 : vector<2x32xf32> to vector<2x32xbf16>
    %c0_53 = arith.constant 0 : index
    %c0_54 = arith.constant 0 : index
    %c0_55 = arith.constant 0 : index
    %101 = vector.load %arg4[%c0_53, %c0_54, %c0_55] : memref<2x32x128xbf16, #tpu.memory_space<vmem>>, vector<1x32x128xbf16>
    %102 = vector.shape_cast %101 : vector<1x32x128xbf16> to vector<32x128xbf16>
    %cst_56 = arith.constant dense<0.000000e+00> : vector<2x128xf32>
    %103 = tpu.matmul %100, %102, %cst_56 {dimension_numbers = #tpu.dot_dimension_numbers<[1], [0], [0], [1], [0, 0, 1, 1], [], []>} : vector<2x32xbf16>, vector<32x128xbf16>, vector<2x128xf32> -> vector<2x128xf32>
    %c1_57 = arith.constant 1 : index
    %c0_58 = arith.constant 0 : index
    %c0_59 = arith.constant 0 : index
    %104 = vector.load %arg9[%c1_57, %c0_58, %c0_59] : memref<2x2x32xf32, #tpu.memory_space<vmem>>, vector<1x2x32xf32>
    %105 = vector.shape_cast %104 : vector<1x2x32xf32> to vector<2x32xf32>
    %106 = arith.truncf %105 : vector<2x32xf32> to vector<2x32xbf16>
    %c1_60 = arith.constant 1 : index
    %c0_61 = arith.constant 0 : index
    %c0_62 = arith.constant 0 : index
    %107 = vector.load %arg4[%c1_60, %c0_61, %c0_62] : memref<2x32x128xbf16, #tpu.memory_space<vmem>>, vector<1x32x128xbf16>
    %108 = vector.shape_cast %107 : vector<1x32x128xbf16> to vector<32x128xbf16>
    %cst_63 = arith.constant dense<0.000000e+00> : vector<2x128xf32>
    %109 = tpu.matmul %106, %108, %cst_63 {dimension_numbers = #tpu.dot_dimension_numbers<[1], [0], [0], [1], [0, 0, 1, 1], [], []>} : vector<2x32xbf16>, vector<32x128xbf16>, vector<2x128xf32> -> vector<2x128xf32>
    %110 = vector.extract_strided_slice %8 {offsets = [2, 0], sizes = [2, 128], strides = [1, 1]} : vector<16x128xf32> to vector<2x128xf32>
    %111 = arith.addf %110, %103 : vector<2x128xf32>
    %112 = vector.extract_strided_slice %111 {offsets = [0, 0], sizes = [2, 32], strides = [1, 1]} : vector<2x128xf32> to vector<2x32xf32>
    %113 = arith.negf %112 : vector<2x32xf32>
    %114 = math.exp %113 : vector<2x32xf32>
    %cst_64 = arith.constant 1.000000e+00 : f32
    %115 = vector.broadcast %cst_64 : f32 to vector<2x32xf32>
    %116 = arith.addf %115, %114 : vector<2x32xf32>
    %117 = arith.divf %115, %116 : vector<2x32xf32>
    %118 = vector.extract_strided_slice %111 {offsets = [0, 32], sizes = [2, 32], strides = [1, 1]} : vector<2x128xf32> to vector<2x32xf32>
    %119 = arith.negf %118 : vector<2x32xf32>
    %120 = math.exp %119 : vector<2x32xf32>
    %cst_65 = arith.constant 1.000000e+00 : f32
    %121 = vector.broadcast %cst_65 : f32 to vector<2x32xf32>
    %122 = arith.addf %121, %120 : vector<2x32xf32>
    %123 = arith.divf %121, %122 : vector<2x32xf32>
    %124 = vector.extract_strided_slice %111 {offsets = [0, 64], sizes = [2, 32], strides = [1, 1]} : vector<2x128xf32> to vector<2x32xf32>
    %125 = math.tanh %124 : vector<2x32xf32>
    %126 = vector.extract_strided_slice %111 {offsets = [0, 96], sizes = [2, 32], strides = [1, 1]} : vector<2x128xf32> to vector<2x32xf32>
    %127 = arith.negf %126 : vector<2x32xf32>
    %128 = math.exp %127 : vector<2x32xf32>
    %cst_66 = arith.constant 1.000000e+00 : f32
    %129 = vector.broadcast %cst_66 : f32 to vector<2x32xf32>
    %130 = arith.addf %129, %128 : vector<2x32xf32>
    %131 = arith.divf %129, %130 : vector<2x32xf32>
    %c0_67 = arith.constant 0 : index
    %c0_68 = arith.constant 0 : index
    %c0_69 = arith.constant 0 : index
    %132 = vector.load %arg10[%c0_67, %c0_68, %c0_69] : memref<2x2x32xf32, #tpu.memory_space<vmem>>, vector<1x2x32xf32>
    %133 = vector.shape_cast %132 : vector<1x2x32xf32> to vector<2x32xf32>
    %134 = arith.mulf %123, %133 : vector<2x32xf32>
    %135 = arith.mulf %117, %125 : vector<2x32xf32>
    %136 = arith.addf %134, %135 : vector<2x32xf32>
    %137 = math.tanh %136 : vector<2x32xf32>
    %138 = arith.mulf %131, %137 : vector<2x32xf32>
    %c0_70 = arith.constant 0 : index
    %c0_71 = arith.constant 0 : index
    %c0_72 = arith.constant 0 : index
    %139 = vector.load %arg9[%c0_70, %c0_71, %c0_72] : memref<2x2x32xf32, #tpu.memory_space<vmem>>, vector<1x2x32xf32>
    %140 = vector.shape_cast %139 : vector<1x2x32xf32> to vector<2x32xf32>
    %141 = vector.shape_cast %138 : vector<2x32xf32> to vector<1x2x32xf32>
    tpu.vector_store %arg9[%c0_70, %c0_71, %c0_72], %141 {strides = array<i32>} : memref<2x2x32xf32, #tpu.memory_space<vmem>>, vector<1x2x32xf32>,
    %c0_73 = arith.constant 0 : index
    %c0_74 = arith.constant 0 : index
    %c0_75 = arith.constant 0 : index
    %142 = vector.load %arg10[%c0_73, %c0_74, %c0_75] : memref<2x2x32xf32, #tpu.memory_space<vmem>>, vector<1x2x32xf32>
    %143 = vector.shape_cast %142 : vector<1x2x32xf32> to vector<2x32xf32>
    %144 = vector.shape_cast %136 : vector<2x32xf32> to vector<1x2x32xf32>
    tpu.vector_store %arg10[%c0_73, %c0_74, %c0_75], %144 {strides = array<i32>} : memref<2x2x32xf32, #tpu.memory_space<vmem>>, vector<1x2x32xf32>,
    %145 = arith.truncf %138 : vector<2x32xf32> to vector<2x32xbf16>
    %c0_76 = arith.constant 0 : index
    %c0_77 = arith.constant 0 : index
    %c0_78 = arith.constant 0 : index
    %146 = vector.load %arg5[%c0_76, %c0_77, %c0_78] : memref<1x32x128xbf16, #tpu.memory_space<vmem>>, vector<1x32x128xbf16>
    %147 = vector.shape_cast %146 : vector<1x32x128xbf16> to vector<32x128xbf16>
    %cst_79 = arith.constant dense<0.000000e+00> : vector<2x128xf32>
    %148 = tpu.matmul %145, %147, %cst_79 {dimension_numbers = #tpu.dot_dimension_numbers<[1], [0], [0], [1], [0, 0, 1, 1], [], []>} : vector<2x32xbf16>, vector<32x128xbf16>, vector<2x128xf32> -> vector<2x128xf32>
    %149 = arith.addf %148, %109 : vector<2x128xf32>
    %c0_80 = arith.constant 0 : index
    %c0_81 = arith.constant 0 : index
    %c0_82 = arith.constant 0 : index
    %150 = vector.load %arg6[%c0_80, %c0_81, %c0_82] : memref<1x1x128xf32, #tpu.memory_space<vmem>>, vector<1x1x128xf32>
    %151 = vector.shape_cast %150 : vector<1x1x128xf32> to vector<1x128xf32>
    %152 = vector.broadcast %151 : vector<1x128xf32> to vector<2x128xf32>
    %153 = arith.addf %149, %152 : vector<2x128xf32>
    %154 = vector.extract_strided_slice %153 {offsets = [0, 0], sizes = [2, 32], strides = [1, 1]} : vector<2x128xf32> to vector<2x32xf32>
    %155 = arith.negf %154 : vector<2x32xf32>
    %156 = math.exp %155 : vector<2x32xf32>
    %cst_83 = arith.constant 1.000000e+00 : f32
    %157 = vector.broadcast %cst_83 : f32 to vector<2x32xf32>
    %158 = arith.addf %157, %156 : vector<2x32xf32>
    %159 = arith.divf %157, %158 : vector<2x32xf32>
    %160 = vector.extract_strided_slice %153 {offsets = [0, 32], sizes = [2, 32], strides = [1, 1]} : vector<2x128xf32> to vector<2x32xf32>
    %161 = arith.negf %160 : vector<2x32xf32>
    %162 = math.exp %161 : vector<2x32xf32>
    %cst_84 = arith.constant 1.000000e+00 : f32
    %163 = vector.broadcast %cst_84 : f32 to vector<2x32xf32>
    %164 = arith.addf %163, %162 : vector<2x32xf32>
    %165 = arith.divf %163, %164 : vector<2x32xf32>
    %166 = vector.extract_strided_slice %153 {offsets = [0, 64], sizes = [2, 32], strides = [1, 1]} : vector<2x128xf32> to vector<2x32xf32>
    %167 = math.tanh %166 : vector<2x32xf32>
    %168 = vector.extract_strided_slice %153 {offsets = [0, 96], sizes = [2, 32], strides = [1, 1]} : vector<2x128xf32> to vector<2x32xf32>
    %169 = arith.negf %168 : vector<2x32xf32>
    %170 = math.exp %169 : vector<2x32xf32>
    %cst_85 = arith.constant 1.000000e+00 : f32
    %171 = vector.broadcast %cst_85 : f32 to vector<2x32xf32>
    %172 = arith.addf %171, %170 : vector<2x32xf32>
    %173 = arith.divf %171, %172 : vector<2x32xf32>
    %c1_86 = arith.constant 1 : index
    %c0_87 = arith.constant 0 : index
    %c0_88 = arith.constant 0 : index
    %174 = vector.load %arg10[%c1_86, %c0_87, %c0_88] : memref<2x2x32xf32, #tpu.memory_space<vmem>>, vector<1x2x32xf32>
    %175 = vector.shape_cast %174 : vector<1x2x32xf32> to vector<2x32xf32>
    %176 = arith.mulf %165, %175 : vector<2x32xf32>
    %177 = arith.mulf %159, %167 : vector<2x32xf32>
    %178 = arith.addf %176, %177 : vector<2x32xf32>
    %179 = math.tanh %178 : vector<2x32xf32>
    %180 = arith.mulf %173, %179 : vector<2x32xf32>
    %c1_89 = arith.constant 1 : index
    %c0_90 = arith.constant 0 : index
    %c0_91 = arith.constant 0 : index
    %181 = vector.load %arg9[%c1_89, %c0_90, %c0_91] : memref<2x2x32xf32, #tpu.memory_space<vmem>>, vector<1x2x32xf32>
    %182 = vector.shape_cast %181 : vector<1x2x32xf32> to vector<2x32xf32>
    %183 = vector.shape_cast %180 : vector<2x32xf32> to vector<1x2x32xf32>
    tpu.vector_store %arg9[%c1_89, %c0_90, %c0_91], %183 {strides = array<i32>} : memref<2x2x32xf32, #tpu.memory_space<vmem>>, vector<1x2x32xf32>,
    %c1_92 = arith.constant 1 : index
    %c0_93 = arith.constant 0 : index
    %c0_94 = arith.constant 0 : index
    %184 = vector.load %arg10[%c1_92, %c0_93, %c0_94] : memref<2x2x32xf32, #tpu.memory_space<vmem>>, vector<1x2x32xf32>
    %185 = vector.shape_cast %184 : vector<1x2x32xf32> to vector<2x32xf32>
    %186 = vector.shape_cast %178 : vector<2x32xf32> to vector<1x2x32xf32>
    tpu.vector_store %arg10[%c1_92, %c0_93, %c0_94], %186 {strides = array<i32>} : memref<2x2x32xf32, #tpu.memory_space<vmem>>, vector<1x2x32xf32>,
    %c0_95 = arith.constant 0 : index
    %c0_96 = arith.constant 0 : index
    %c0_97 = arith.constant 0 : index
    %187 = vector.load %arg9[%c0_95, %c0_96, %c0_97] : memref<2x2x32xf32, #tpu.memory_space<vmem>>, vector<1x2x32xf32>
    %188 = vector.shape_cast %187 : vector<1x2x32xf32> to vector<2x32xf32>
    %189 = arith.truncf %188 : vector<2x32xf32> to vector<2x32xbf16>
    %c0_98 = arith.constant 0 : index
    %c0_99 = arith.constant 0 : index
    %c0_100 = arith.constant 0 : index
    %190 = vector.load %arg4[%c0_98, %c0_99, %c0_100] : memref<2x32x128xbf16, #tpu.memory_space<vmem>>, vector<1x32x128xbf16>
    %191 = vector.shape_cast %190 : vector<1x32x128xbf16> to vector<32x128xbf16>
    %cst_101 = arith.constant dense<0.000000e+00> : vector<2x128xf32>
    %192 = tpu.matmul %189, %191, %cst_101 {dimension_numbers = #tpu.dot_dimension_numbers<[1], [0], [0], [1], [0, 0, 1, 1], [], []>} : vector<2x32xbf16>, vector<32x128xbf16>, vector<2x128xf32> -> vector<2x128xf32>
    %c1_102 = arith.constant 1 : index
    %c0_103 = arith.constant 0 : index
    %c0_104 = arith.constant 0 : index
    %193 = vector.load %arg9[%c1_102, %c0_103, %c0_104] : memref<2x2x32xf32, #tpu.memory_space<vmem>>, vector<1x2x32xf32>
    %194 = vector.shape_cast %193 : vector<1x2x32xf32> to vector<2x32xf32>
    %195 = arith.truncf %194 : vector<2x32xf32> to vector<2x32xbf16>
    %c1_105 = arith.constant 1 : index
    %c0_106 = arith.constant 0 : index
    %c0_107 = arith.constant 0 : index
    %196 = vector.load %arg4[%c1_105, %c0_106, %c0_107] : memref<2x32x128xbf16, #tpu.memory_space<vmem>>, vector<1x32x128xbf16>
    %197 = vector.shape_cast %196 : vector<1x32x128xbf16> to vector<32x128xbf16>
    %cst_108 = arith.constant dense<0.000000e+00> : vector<2x128xf32>
    %198 = tpu.matmul %195, %197, %cst_108 {dimension_numbers = #tpu.dot_dimension_numbers<[1], [0], [0], [1], [0, 0, 1, 1], [], []>} : vector<2x32xbf16>, vector<32x128xbf16>, vector<2x128xf32> -> vector<2x128xf32>
    %199 = vector.extract_strided_slice %8 {offsets = [4, 0], sizes = [2, 128], strides = [1, 1]} : vector<16x128xf32> to vector<2x128xf32>
    %200 = arith.addf %199, %192 : vector<2x128xf32>
    %201 = vector.extract_strided_slice %200 {offsets = [0, 0], sizes = [2, 32], strides = [1, 1]} : vector<2x128xf32> to vector<2x32xf32>
    %202 = arith.negf %201 : vector<2x32xf32>
    %203 = math.exp %202 : vector<2x32xf32>
    %cst_109 = arith.constant 1.000000e+00 : f32
    %204 = vector.broadcast %cst_109 : f32 to vector<2x32xf32>
    %205 = arith.addf %204, %203 : vector<2x32xf32>
    %206 = arith.divf %204, %205 : vector<2x32xf32>
    %207 = vector.extract_strided_slice %200 {offsets = [0, 32], sizes = [2, 32], strides = [1, 1]} : vector<2x128xf32> to vector<2x32xf32>
    %208 = arith.negf %207 : vector<2x32xf32>
    %209 = math.exp %208 : vector<2x32xf32>
    %cst_110 = arith.constant 1.000000e+00 : f32
    %210 = vector.broadcast %cst_110 : f32 to vector<2x32xf32>
    %211 = arith.addf %210, %209 : vector<2x32xf32>
    %212 = arith.divf %210, %211 : vector<2x32xf32>
    %213 = vector.extract_strided_slice %200 {offsets = [0, 64], sizes = [2, 32], strides = [1, 1]} : vector<2x128xf32> to vector<2x32xf32>
    %214 = math.tanh %213 : vector<2x32xf32>
    %215 = vector.extract_strided_slice %200 {offsets = [0, 96], sizes = [2, 32], strides = [1, 1]} : vector<2x128xf32> to vector<2x32xf32>
    %216 = arith.negf %215 : vector<2x32xf32>
    %217 = math.exp %216 : vector<2x32xf32>
    %cst_111 = arith.constant 1.000000e+00 : f32
    %218 = vector.broadcast %cst_111 : f32 to vector<2x32xf32>
    %219 = arith.addf %218, %217 : vector<2x32xf32>
    %220 = arith.divf %218, %219 : vector<2x32xf32>
    %c0_112 = arith.constant 0 : index
    %c0_113 = arith.constant 0 : index
    %c0_114 = arith.constant 0 : index
    %221 = vector.load %arg10[%c0_112, %c0_113, %c0_114] : memref<2x2x32xf32, #tpu.memory_space<vmem>>, vector<1x2x32xf32>
    %222 = vector.shape_cast %221 : vector<1x2x32xf32> to vector<2x32xf32>
    %223 = arith.mulf %212, %222 : vector<2x32xf32>
    %224 = arith.mulf %206, %214 : vector<2x32xf32>
    %225 = arith.addf %223, %224 : vector<2x32xf32>
    %226 = math.tanh %225 : vector<2x32xf32>
    %227 = arith.mulf %220, %226 : vector<2x32xf32>
    %c0_115 = arith.constant 0 : index
    %c0_116 = arith.constant 0 : index
    %c0_117 = arith.constant 0 : index
    %228 = vector.load %arg9[%c0_115, %c0_116, %c0_117] : memref<2x2x32xf32, #tpu.memory_space<vmem>>, vector<1x2x32xf32>
    %229 = vector.shape_cast %228 : vector<1x2x32xf32> to vector<2x32xf32>
    %230 = vector.shape_cast %227 : vector<2x32xf32> to vector<1x2x32xf32>
    tpu.vector_store %arg9[%c0_115, %c0_116, %c0_117], %230 {strides = array<i32>} : memref<2x2x32xf32, #tpu.memory_space<vmem>>, vector<1x2x32xf32>,
    %c0_118 = arith.constant 0 : index
    %c0_119 = arith.constant 0 : index
    %c0_120 = arith.constant 0 : index
    %231 = vector.load %arg10[%c0_118, %c0_119, %c0_120] : memref<2x2x32xf32, #tpu.memory_space<vmem>>, vector<1x2x32xf32>
    %232 = vector.shape_cast %231 : vector<1x2x32xf32> to vector<2x32xf32>
    %233 = vector.shape_cast %225 : vector<2x32xf32> to vector<1x2x32xf32>
    tpu.vector_store %arg10[%c0_118, %c0_119, %c0_120], %233 {strides = array<i32>} : memref<2x2x32xf32, #tpu.memory_space<vmem>>, vector<1x2x32xf32>,
    %234 = arith.truncf %227 : vector<2x32xf32> to vector<2x32xbf16>
    %c0_121 = arith.constant 0 : index
    %c0_122 = arith.constant 0 : index
    %c0_123 = arith.constant 0 : index
    %235 = vector.load %arg5[%c0_121, %c0_122, %c0_123] : memref<1x32x128xbf16, #tpu.memory_space<vmem>>, vector<1x32x128xbf16>
    %236 = vector.shape_cast %235 : vector<1x32x128xbf16> to vector<32x128xbf16>
    %cst_124 = arith.constant dense<0.000000e+00> : vector<2x128xf32>
    %237 = tpu.matmul %234, %236, %cst_124 {dimension_numbers = #tpu.dot_dimension_numbers<[1], [0], [0], [1], [0, 0, 1, 1], [], []>} : vector<2x32xbf16>, vector<32x128xbf16>, vector<2x128xf32> -> vector<2x128xf32>
    %238 = arith.addf %237, %198 : vector<2x128xf32>
    %c0_125 = arith.constant 0 : index
    %c0_126 = arith.constant 0 : index
    %c0_127 = arith.constant 0 : index
    %239 = vector.load %arg6[%c0_125, %c0_126, %c0_127] : memref<1x1x128xf32, #tpu.memory_space<vmem>>, vector<1x1x128xf32>
    %240 = vector.shape_cast %239 : vector<1x1x128xf32> to vector<1x128xf32>
    %241 = vector.broadcast %240 : vector<1x128xf32> to vector<2x128xf32>
    %242 = arith.addf %238, %241 : vector<2x128xf32>
    %243 = vector.extract_strided_slice %242 {offsets = [0, 0], sizes = [2, 32], strides = [1, 1]} : vector<2x128xf32> to vector<2x32xf32>
    %244 = arith.negf %243 : vector<2x32xf32>
    %245 = math.exp %244 : vector<2x32xf32>
    %cst_128 = arith.constant 1.000000e+00 : f32
    %246 = vector.broadcast %cst_128 : f32 to vector<2x32xf32>
    %247 = arith.addf %246, %245 : vector<2x32xf32>
    %248 = arith.divf %246, %247 : vector<2x32xf32>
    %249 = vector.extract_strided_slice %242 {offsets = [0, 32], sizes = [2, 32], strides = [1, 1]} : vector<2x128xf32> to vector<2x32xf32>
    %250 = arith.negf %249 : vector<2x32xf32>
    %251 = math.exp %250 : vector<2x32xf32>
    %cst_129 = arith.constant 1.000000e+00 : f32
    %252 = vector.broadcast %cst_129 : f32 to vector<2x32xf32>
    %253 = arith.addf %252, %251 : vector<2x32xf32>
    %254 = arith.divf %252, %253 : vector<2x32xf32>
    %255 = vector.extract_strided_slice %242 {offsets = [0, 64], sizes = [2, 32], strides = [1, 1]} : vector<2x128xf32> to vector<2x32xf32>
    %256 = math.tanh %255 : vector<2x32xf32>
    %257 = vector.extract_strided_slice %242 {offsets = [0, 96], sizes = [2, 32], strides = [1, 1]} : vector<2x128xf32> to vector<2x32xf32>
    %258 = arith.negf %257 : vector<2x32xf32>
    %259 = math.exp %258 : vector<2x32xf32>
    %cst_130 = arith.constant 1.000000e+00 : f32
    %260 = vector.broadcast %cst_130 : f32 to vector<2x32xf32>
    %261 = arith.addf %260, %259 : vector<2x32xf32>
    %262 = arith.divf %260, %261 : vector<2x32xf32>
    %c1_131 = arith.constant 1 : index
    %c0_132 = arith.constant 0 : index
    %c0_133 = arith.constant 0 : index
    %263 = vector.load %arg10[%c1_131, %c0_132, %c0_133] : memref<2x2x32xf32, #tpu.memory_space<vmem>>, vector<1x2x32xf32>
    %264 = vector.shape_cast %263 : vector<1x2x32xf32> to vector<2x32xf32>
    %265 = arith.mulf %254, %264 : vector<2x32xf32>
    %266 = arith.mulf %248, %256 : vector<2x32xf32>
    %267 = arith.addf %265, %266 : vector<2x32xf32>
    %268 = math.tanh %267 : vector<2x32xf32>
    %269 = arith.mulf %262, %268 : vector<2x32xf32>
    %c1_134 = arith.constant 1 : index
    %c0_135 = arith.constant 0 : index
    %c0_136 = arith.constant 0 : index
    %270 = vector.load %arg9[%c1_134, %c0_135, %c0_136] : memref<2x2x32xf32, #tpu.memory_space<vmem>>, vector<1x2x32xf32>
    %271 = vector.shape_cast %270 : vector<1x2x32xf32> to vector<2x32xf32>
    %272 = vector.shape_cast %269 : vector<2x32xf32> to vector<1x2x32xf32>
    tpu.vector_store %arg9[%c1_134, %c0_135, %c0_136], %272 {strides = array<i32>} : memref<2x2x32xf32, #tpu.memory_space<vmem>>, vector<1x2x32xf32>,
    %c1_137 = arith.constant 1 : index
    %c0_138 = arith.constant 0 : index
    %c0_139 = arith.constant 0 : index
    %273 = vector.load %arg10[%c1_137, %c0_138, %c0_139] : memref<2x2x32xf32, #tpu.memory_space<vmem>>, vector<1x2x32xf32>
    %274 = vector.shape_cast %273 : vector<1x2x32xf32> to vector<2x32xf32>
    %275 = vector.shape_cast %267 : vector<2x32xf32> to vector<1x2x32xf32>
    tpu.vector_store %arg10[%c1_137, %c0_138, %c0_139], %275 {strides = array<i32>} : memref<2x2x32xf32, #tpu.memory_space<vmem>>, vector<1x2x32xf32>,
    %c0_140 = arith.constant 0 : index
    %c0_141 = arith.constant 0 : index
    %c0_142 = arith.constant 0 : index
    %276 = vector.load %arg9[%c0_140, %c0_141, %c0_142] : memref<2x2x32xf32, #tpu.memory_space<vmem>>, vector<1x2x32xf32>
    %277 = vector.shape_cast %276 : vector<1x2x32xf32> to vector<2x32xf32>
    %278 = arith.truncf %277 : vector<2x32xf32> to vector<2x32xbf16>
    %c0_143 = arith.constant 0 : index
    %c0_144 = arith.constant 0 : index
    %c0_145 = arith.constant 0 : index
    %279 = vector.load %arg4[%c0_143, %c0_144, %c0_145] : memref<2x32x128xbf16, #tpu.memory_space<vmem>>, vector<1x32x128xbf16>
    %280 = vector.shape_cast %279 : vector<1x32x128xbf16> to vector<32x128xbf16>
    %cst_146 = arith.constant dense<0.000000e+00> : vector<2x128xf32>
    %281 = tpu.matmul %278, %280, %cst_146 {dimension_numbers = #tpu.dot_dimension_numbers<[1], [0], [0], [1], [0, 0, 1, 1], [], []>} : vector<2x32xbf16>, vector<32x128xbf16>, vector<2x128xf32> -> vector<2x128xf32>
    %c1_147 = arith.constant 1 : index
    %c0_148 = arith.constant 0 : index
    %c0_149 = arith.constant 0 : index
    %282 = vector.load %arg9[%c1_147, %c0_148, %c0_149] : memref<2x2x32xf32, #tpu.memory_space<vmem>>, vector<1x2x32xf32>
    %283 = vector.shape_cast %282 : vector<1x2x32xf32> to vector<2x32xf32>
    %284 = arith.truncf %283 : vector<2x32xf32> to vector<2x32xbf16>
    %c1_150 = arith.constant 1 : index
    %c0_151 = arith.constant 0 : index
    %c0_152 = arith.constant 0 : index
    %285 = vector.load %arg4[%c1_150, %c0_151, %c0_152] : memref<2x32x128xbf16, #tpu.memory_space<vmem>>, vector<1x32x128xbf16>
    %286 = vector.shape_cast %285 : vector<1x32x128xbf16> to vector<32x128xbf16>
    %cst_153 = arith.constant dense<0.000000e+00> : vector<2x128xf32>
    %287 = tpu.matmul %284, %286, %cst_153 {dimension_numbers = #tpu.dot_dimension_numbers<[1], [0], [0], [1], [0, 0, 1, 1], [], []>} : vector<2x32xbf16>, vector<32x128xbf16>, vector<2x128xf32> -> vector<2x128xf32>
    %288 = vector.extract_strided_slice %8 {offsets = [6, 0], sizes = [2, 128], strides = [1, 1]} : vector<16x128xf32> to vector<2x128xf32>
    %289 = arith.addf %288, %281 : vector<2x128xf32>
    %290 = vector.extract_strided_slice %289 {offsets = [0, 0], sizes = [2, 32], strides = [1, 1]} : vector<2x128xf32> to vector<2x32xf32>
    %291 = arith.negf %290 : vector<2x32xf32>
    %292 = math.exp %291 : vector<2x32xf32>
    %cst_154 = arith.constant 1.000000e+00 : f32
    %293 = vector.broadcast %cst_154 : f32 to vector<2x32xf32>
    %294 = arith.addf %293, %292 : vector<2x32xf32>
    %295 = arith.divf %293, %294 : vector<2x32xf32>
    %296 = vector.extract_strided_slice %289 {offsets = [0, 32], sizes = [2, 32], strides = [1, 1]} : vector<2x128xf32> to vector<2x32xf32>
    %297 = arith.negf %296 : vector<2x32xf32>
    %298 = math.exp %297 : vector<2x32xf32>
    %cst_155 = arith.constant 1.000000e+00 : f32
    %299 = vector.broadcast %cst_155 : f32 to vector<2x32xf32>
    %300 = arith.addf %299, %298 : vector<2x32xf32>
    %301 = arith.divf %299, %300 : vector<2x32xf32>
    %302 = vector.extract_strided_slice %289 {offsets = [0, 64], sizes = [2, 32], strides = [1, 1]} : vector<2x128xf32> to vector<2x32xf32>
    %303 = math.tanh %302 : vector<2x32xf32>
    %304 = vector.extract_strided_slice %289 {offsets = [0, 96], sizes = [2, 32], strides = [1, 1]} : vector<2x128xf32> to vector<2x32xf32>
    %305 = arith.negf %304 : vector<2x32xf32>
    %306 = math.exp %305 : vector<2x32xf32>
    %cst_156 = arith.constant 1.000000e+00 : f32
    %307 = vector.broadcast %cst_156 : f32 to vector<2x32xf32>
    %308 = arith.addf %307, %306 : vector<2x32xf32>
    %309 = arith.divf %307, %308 : vector<2x32xf32>
    %c0_157 = arith.constant 0 : index
    %c0_158 = arith.constant 0 : index
    %c0_159 = arith.constant 0 : index
    %310 = vector.load %arg10[%c0_157, %c0_158, %c0_159] : memref<2x2x32xf32, #tpu.memory_space<vmem>>, vector<1x2x32xf32>
    %311 = vector.shape_cast %310 : vector<1x2x32xf32> to vector<2x32xf32>
    %312 = arith.mulf %301, %311 : vector<2x32xf32>
    %313 = arith.mulf %295, %303 : vector<2x32xf32>
    %314 = arith.addf %312, %313 : vector<2x32xf32>
    %315 = math.tanh %314 : vector<2x32xf32>
    %316 = arith.mulf %309, %315 : vector<2x32xf32>
    %c0_160 = arith.constant 0 : index
    %c0_161 = arith.constant 0 : index
    %c0_162 = arith.constant 0 : index
    %317 = vector.load %arg9[%c0_160, %c0_161, %c0_162] : memref<2x2x32xf32, #tpu.memory_space<vmem>>, vector<1x2x32xf32>
    %318 = vector.shape_cast %317 : vector<1x2x32xf32> to vector<2x32xf32>
    %319 = vector.shape_cast %316 : vector<2x32xf32> to vector<1x2x32xf32>
    tpu.vector_store %arg9[%c0_160, %c0_161, %c0_162], %319 {strides = array<i32>} : memref<2x2x32xf32, #tpu.memory_space<vmem>>, vector<1x2x32xf32>,
    %c0_163 = arith.constant 0 : index
    %c0_164 = arith.constant 0 : index
    %c0_165 = arith.constant 0 : index
    %320 = vector.load %arg10[%c0_163, %c0_164, %c0_165] : memref<2x2x32xf32, #tpu.memory_space<vmem>>, vector<1x2x32xf32>
    %321 = vector.shape_cast %320 : vector<1x2x32xf32> to vector<2x32xf32>
    %322 = vector.shape_cast %314 : vector<2x32xf32> to vector<1x2x32xf32>
    tpu.vector_store %arg10[%c0_163, %c0_164, %c0_165], %322 {strides = array<i32>} : memref<2x2x32xf32, #tpu.memory_space<vmem>>, vector<1x2x32xf32>,
    %323 = arith.truncf %316 : vector<2x32xf32> to vector<2x32xbf16>
    %c0_166 = arith.constant 0 : index
    %c0_167 = arith.constant 0 : index
    %c0_168 = arith.constant 0 : index
    %324 = vector.load %arg5[%c0_166, %c0_167, %c0_168] : memref<1x32x128xbf16, #tpu.memory_space<vmem>>, vector<1x32x128xbf16>
    %325 = vector.shape_cast %324 : vector<1x32x128xbf16> to vector<32x128xbf16>
    %cst_169 = arith.constant dense<0.000000e+00> : vector<2x128xf32>
    %326 = tpu.matmul %323, %325, %cst_169 {dimension_numbers = #tpu.dot_dimension_numbers<[1], [0], [0], [1], [0, 0, 1, 1], [], []>} : vector<2x32xbf16>, vector<32x128xbf16>, vector<2x128xf32> -> vector<2x128xf32>
    %327 = arith.addf %326, %287 : vector<2x128xf32>
    %c0_170 = arith.constant 0 : index
    %c0_171 = arith.constant 0 : index
    %c0_172 = arith.constant 0 : index
    %328 = vector.load %arg6[%c0_170, %c0_171, %c0_172] : memref<1x1x128xf32, #tpu.memory_space<vmem>>, vector<1x1x128xf32>
    %329 = vector.shape_cast %328 : vector<1x1x128xf32> to vector<1x128xf32>
    %330 = vector.broadcast %329 : vector<1x128xf32> to vector<2x128xf32>
    %331 = arith.addf %327, %330 : vector<2x128xf32>
    %332 = vector.extract_strided_slice %331 {offsets = [0, 0], sizes = [2, 32], strides = [1, 1]} : vector<2x128xf32> to vector<2x32xf32>
    %333 = arith.negf %332 : vector<2x32xf32>
    %334 = math.exp %333 : vector<2x32xf32>
    %cst_173 = arith.constant 1.000000e+00 : f32
    %335 = vector.broadcast %cst_173 : f32 to vector<2x32xf32>
    %336 = arith.addf %335, %334 : vector<2x32xf32>
    %337 = arith.divf %335, %336 : vector<2x32xf32>
    %338 = vector.extract_strided_slice %331 {offsets = [0, 32], sizes = [2, 32], strides = [1, 1]} : vector<2x128xf32> to vector<2x32xf32>
    %339 = arith.negf %338 : vector<2x32xf32>
    %340 = math.exp %339 : vector<2x32xf32>
    %cst_174 = arith.constant 1.000000e+00 : f32
    %341 = vector.broadcast %cst_174 : f32 to vector<2x32xf32>
    %342 = arith.addf %341, %340 : vector<2x32xf32>
    %343 = arith.divf %341, %342 : vector<2x32xf32>
    %344 = vector.extract_strided_slice %331 {offsets = [0, 64], sizes = [2, 32], strides = [1, 1]} : vector<2x128xf32> to vector<2x32xf32>
    %345 = math.tanh %344 : vector<2x32xf32>
    %346 = vector.extract_strided_slice %331 {offsets = [0, 96], sizes = [2, 32], strides = [1, 1]} : vector<2x128xf32> to vector<2x32xf32>
    %347 = arith.negf %346 : vector<2x32xf32>
    %348 = math.exp %347 : vector<2x32xf32>
    %cst_175 = arith.constant 1.000000e+00 : f32
    %349 = vector.broadcast %cst_175 : f32 to vector<2x32xf32>
    %350 = arith.addf %349, %348 : vector<2x32xf32>
    %351 = arith.divf %349, %350 : vector<2x32xf32>
    %c1_176 = arith.constant 1 : index
    %c0_177 = arith.constant 0 : index
    %c0_178 = arith.constant 0 : index
    %352 = vector.load %arg10[%c1_176, %c0_177, %c0_178] : memref<2x2x32xf32, #tpu.memory_space<vmem>>, vector<1x2x32xf32>
    %353 = vector.shape_cast %352 : vector<1x2x32xf32> to vector<2x32xf32>
    %354 = arith.mulf %343, %353 : vector<2x32xf32>
    %355 = arith.mulf %337, %345 : vector<2x32xf32>
    %356 = arith.addf %354, %355 : vector<2x32xf32>
    %357 = math.tanh %356 : vector<2x32xf32>
    %358 = arith.mulf %351, %357 : vector<2x32xf32>
    %c1_179 = arith.constant 1 : index
    %c0_180 = arith.constant 0 : index
    %c0_181 = arith.constant 0 : index
    %359 = vector.load %arg9[%c1_179, %c0_180, %c0_181] : memref<2x2x32xf32, #tpu.memory_space<vmem>>, vector<1x2x32xf32>
    %360 = vector.shape_cast %359 : vector<1x2x32xf32> to vector<2x32xf32>
    %361 = vector.shape_cast %358 : vector<2x32xf32> to vector<1x2x32xf32>
    tpu.vector_store %arg9[%c1_179, %c0_180, %c0_181], %361 {strides = array<i32>} : memref<2x2x32xf32, #tpu.memory_space<vmem>>, vector<1x2x32xf32>,
    %c1_182 = arith.constant 1 : index
    %c0_183 = arith.constant 0 : index
    %c0_184 = arith.constant 0 : index
    %362 = vector.load %arg10[%c1_182, %c0_183, %c0_184] : memref<2x2x32xf32, #tpu.memory_space<vmem>>, vector<1x2x32xf32>
    %363 = vector.shape_cast %362 : vector<1x2x32xf32> to vector<2x32xf32>
    %364 = vector.shape_cast %356 : vector<2x32xf32> to vector<1x2x32xf32>
    tpu.vector_store %arg10[%c1_182, %c0_183, %c0_184], %364 {strides = array<i32>} : memref<2x2x32xf32, #tpu.memory_space<vmem>>, vector<1x2x32xf32>,
    %c8_i32 = arith.constant 8 : i32
    %365 = arith.muli %arg0, %c8_i32 : i32
    %c4_i32 = arith.constant 4 : i32
    %366 = arith.addi %365, %c4_i32 : i32
    %c20_i32 = arith.constant 20 : i32
    %367 = arith.cmpi slt, %366, %c20_i32 : i32
    %368 = arith.extui %367 : i1 to i32
    %c0_i32_185 = arith.constant 0 : i32
    %369 = arith.cmpi ne, %368, %c0_i32_185 : i32
    scf.if %369 {
      %c0_196 = arith.constant 0 : index
      %c0_197 = arith.constant 0 : index
      %c0_198 = arith.constant 0 : index
      %388 = vector.load %arg9[%c0_196, %c0_197, %c0_198] : memref<2x2x32xf32, #tpu.memory_space<vmem>>, vector<1x2x32xf32>
      %389 = vector.shape_cast %388 : vector<1x2x32xf32> to vector<2x32xf32>
      %390 = arith.truncf %389 : vector<2x32xf32> to vector<2x32xbf16>
      %c0_199 = arith.constant 0 : index
      %c0_200 = arith.constant 0 : index
      %c0_201 = arith.constant 0 : index
      %391 = vector.load %arg4[%c0_199, %c0_200, %c0_201] : memref<2x32x128xbf16, #tpu.memory_space<vmem>>, vector<1x32x128xbf16>
      %392 = vector.shape_cast %391 : vector<1x32x128xbf16> to vector<32x128xbf16>
      %cst_202 = arith.constant dense<0.000000e+00> : vector<2x128xf32>
      %393 = tpu.matmul %390, %392, %cst_202 {dimension_numbers = #tpu.dot_dimension_numbers<[1], [0], [0], [1], [0, 0, 1, 1], [], []>} : vector<2x32xbf16>, vector<32x128xbf16>, vector<2x128xf32> -> vector<2x128xf32>
      %c1_203 = arith.constant 1 : index
      %c0_204 = arith.constant 0 : index
      %c0_205 = arith.constant 0 : index
      %394 = vector.load %arg9[%c1_203, %c0_204, %c0_205] : memref<2x2x32xf32, #tpu.memory_space<vmem>>, vector<1x2x32xf32>
      %395 = vector.shape_cast %394 : vector<1x2x32xf32> to vector<2x32xf32>
      %396 = arith.truncf %395 : vector<2x32xf32> to vector<2x32xbf16>
      %c1_206 = arith.constant 1 : index
      %c0_207 = arith.constant 0 : index
      %c0_208 = arith.constant 0 : index
      %397 = vector.load %arg4[%c1_206, %c0_207, %c0_208] : memref<2x32x128xbf16, #tpu.memory_space<vmem>>, vector<1x32x128xbf16>
      %398 = vector.shape_cast %397 : vector<1x32x128xbf16> to vector<32x128xbf16>
      %cst_209 = arith.constant dense<0.000000e+00> : vector<2x128xf32>
      %399 = tpu.matmul %396, %398, %cst_209 {dimension_numbers = #tpu.dot_dimension_numbers<[1], [0], [0], [1], [0, 0, 1, 1], [], []>} : vector<2x32xbf16>, vector<32x128xbf16>, vector<2x128xf32> -> vector<2x128xf32>
      %400 = vector.extract_strided_slice %8 {offsets = [8, 0], sizes = [2, 128], strides = [1, 1]} : vector<16x128xf32> to vector<2x128xf32>
      %401 = arith.addf %400, %393 : vector<2x128xf32>
      %402 = vector.extract_strided_slice %401 {offsets = [0, 0], sizes = [2, 32], strides = [1, 1]} : vector<2x128xf32> to vector<2x32xf32>
      %403 = arith.negf %402 : vector<2x32xf32>
      %404 = math.exp %403 : vector<2x32xf32>
      %cst_210 = arith.constant 1.000000e+00 : f32
      %405 = vector.broadcast %cst_210 : f32 to vector<2x32xf32>
      %406 = arith.addf %405, %404 : vector<2x32xf32>
      %407 = arith.divf %405, %406 : vector<2x32xf32>
      %408 = vector.extract_strided_slice %401 {offsets = [0, 32], sizes = [2, 32], strides = [1, 1]} : vector<2x128xf32> to vector<2x32xf32>
      %409 = arith.negf %408 : vector<2x32xf32>
      %410 = math.exp %409 : vector<2x32xf32>
      %cst_211 = arith.constant 1.000000e+00 : f32
      %411 = vector.broadcast %cst_211 : f32 to vector<2x32xf32>
      %412 = arith.addf %411, %410 : vector<2x32xf32>
      %413 = arith.divf %411, %412 : vector<2x32xf32>
      %414 = vector.extract_strided_slice %401 {offsets = [0, 64], sizes = [2, 32], strides = [1, 1]} : vector<2x128xf32> to vector<2x32xf32>
      %415 = math.tanh %414 : vector<2x32xf32>
      %416 = vector.extract_strided_slice %401 {offsets = [0, 96], sizes = [2, 32], strides = [1, 1]} : vector<2x128xf32> to vector<2x32xf32>
      %417 = arith.negf %416 : vector<2x32xf32>
      %418 = math.exp %417 : vector<2x32xf32>
      %cst_212 = arith.constant 1.000000e+00 : f32
      %419 = vector.broadcast %cst_212 : f32 to vector<2x32xf32>
      %420 = arith.addf %419, %418 : vector<2x32xf32>
      %421 = arith.divf %419, %420 : vector<2x32xf32>
      %c0_213 = arith.constant 0 : index
      %c0_214 = arith.constant 0 : index
      %c0_215 = arith.constant 0 : index
      %422 = vector.load %arg10[%c0_213, %c0_214, %c0_215] : memref<2x2x32xf32, #tpu.memory_space<vmem>>, vector<1x2x32xf32>
      %423 = vector.shape_cast %422 : vector<1x2x32xf32> to vector<2x32xf32>
      %424 = arith.mulf %413, %423 : vector<2x32xf32>
      %425 = arith.mulf %407, %415 : vector<2x32xf32>
      %426 = arith.addf %424, %425 : vector<2x32xf32>
      %427 = math.tanh %426 : vector<2x32xf32>
      %428 = arith.mulf %421, %427 : vector<2x32xf32>
      %c0_216 = arith.constant 0 : index
      %c0_217 = arith.constant 0 : index
      %c0_218 = arith.constant 0 : index
      %429 = vector.load %arg9[%c0_216, %c0_217, %c0_218] : memref<2x2x32xf32, #tpu.memory_space<vmem>>, vector<1x2x32xf32>
      %430 = vector.shape_cast %429 : vector<1x2x32xf32> to vector<2x32xf32>
      %431 = vector.shape_cast %428 : vector<2x32xf32> to vector<1x2x32xf32>
      tpu.vector_store %arg9[%c0_216, %c0_217, %c0_218], %431 {strides = array<i32>} : memref<2x2x32xf32, #tpu.memory_space<vmem>>, vector<1x2x32xf32>,
      %c0_219 = arith.constant 0 : index
      %c0_220 = arith.constant 0 : index
      %c0_221 = arith.constant 0 : index
      %432 = vector.load %arg10[%c0_219, %c0_220, %c0_221] : memref<2x2x32xf32, #tpu.memory_space<vmem>>, vector<1x2x32xf32>
      %433 = vector.shape_cast %432 : vector<1x2x32xf32> to vector<2x32xf32>
      %434 = vector.shape_cast %426 : vector<2x32xf32> to vector<1x2x32xf32>
      tpu.vector_store %arg10[%c0_219, %c0_220, %c0_221], %434 {strides = array<i32>} : memref<2x2x32xf32, #tpu.memory_space<vmem>>, vector<1x2x32xf32>,
      %435 = arith.truncf %428 : vector<2x32xf32> to vector<2x32xbf16>
      %c0_222 = arith.constant 0 : index
      %c0_223 = arith.constant 0 : index
      %c0_224 = arith.constant 0 : index
      %436 = vector.load %arg5[%c0_222, %c0_223, %c0_224] : memref<1x32x128xbf16, #tpu.memory_space<vmem>>, vector<1x32x128xbf16>
      %437 = vector.shape_cast %436 : vector<1x32x128xbf16> to vector<32x128xbf16>
      %cst_225 = arith.constant dense<0.000000e+00> : vector<2x128xf32>
      %438 = tpu.matmul %435, %437, %cst_225 {dimension_numbers = #tpu.dot_dimension_numbers<[1], [0], [0], [1], [0, 0, 1, 1], [], []>} : vector<2x32xbf16>, vector<32x128xbf16>, vector<2x128xf32> -> vector<2x128xf32>
      %439 = arith.addf %438, %399 : vector<2x128xf32>
      %c0_226 = arith.constant 0 : index
      %c0_227 = arith.constant 0 : index
      %c0_228 = arith.constant 0 : index
      %440 = vector.load %arg6[%c0_226, %c0_227, %c0_228] : memref<1x1x128xf32, #tpu.memory_space<vmem>>, vector<1x1x128xf32>
      %441 = vector.shape_cast %440 : vector<1x1x128xf32> to vector<1x128xf32>
      %442 = vector.broadcast %441 : vector<1x128xf32> to vector<2x128xf32>
      %443 = arith.addf %439, %442 : vector<2x128xf32>
      %444 = vector.extract_strided_slice %443 {offsets = [0, 0], sizes = [2, 32], strides = [1, 1]} : vector<2x128xf32> to vector<2x32xf32>
      %445 = arith.negf %444 : vector<2x32xf32>
      %446 = math.exp %445 : vector<2x32xf32>
      %cst_229 = arith.constant 1.000000e+00 : f32
      %447 = vector.broadcast %cst_229 : f32 to vector<2x32xf32>
      %448 = arith.addf %447, %446 : vector<2x32xf32>
      %449 = arith.divf %447, %448 : vector<2x32xf32>
      %450 = vector.extract_strided_slice %443 {offsets = [0, 32], sizes = [2, 32], strides = [1, 1]} : vector<2x128xf32> to vector<2x32xf32>
      %451 = arith.negf %450 : vector<2x32xf32>
      %452 = math.exp %451 : vector<2x32xf32>
      %cst_230 = arith.constant 1.000000e+00 : f32
      %453 = vector.broadcast %cst_230 : f32 to vector<2x32xf32>
      %454 = arith.addf %453, %452 : vector<2x32xf32>
      %455 = arith.divf %453, %454 : vector<2x32xf32>
      %456 = vector.extract_strided_slice %443 {offsets = [0, 64], sizes = [2, 32], strides = [1, 1]} : vector<2x128xf32> to vector<2x32xf32>
      %457 = math.tanh %456 : vector<2x32xf32>
      %458 = vector.extract_strided_slice %443 {offsets = [0, 96], sizes = [2, 32], strides = [1, 1]} : vector<2x128xf32> to vector<2x32xf32>
      %459 = arith.negf %458 : vector<2x32xf32>
      %460 = math.exp %459 : vector<2x32xf32>
      %cst_231 = arith.constant 1.000000e+00 : f32
      %461 = vector.broadcast %cst_231 : f32 to vector<2x32xf32>
      %462 = arith.addf %461, %460 : vector<2x32xf32>
      %463 = arith.divf %461, %462 : vector<2x32xf32>
      %c1_232 = arith.constant 1 : index
      %c0_233 = arith.constant 0 : index
      %c0_234 = arith.constant 0 : index
      %464 = vector.load %arg10[%c1_232, %c0_233, %c0_234] : memref<2x2x32xf32, #tpu.memory_space<vmem>>, vector<1x2x32xf32>
      %465 = vector.shape_cast %464 : vector<1x2x32xf32> to vector<2x32xf32>
      %466 = arith.mulf %455, %465 : vector<2x32xf32>
      %467 = arith.mulf %449, %457 : vector<2x32xf32>
      %468 = arith.addf %466, %467 : vector<2x32xf32>
      %469 = math.tanh %468 : vector<2x32xf32>
      %470 = arith.mulf %463, %469 : vector<2x32xf32>
      %c1_235 = arith.constant 1 : index
      %c0_236 = arith.constant 0 : index
      %c0_237 = arith.constant 0 : index
      %471 = vector.load %arg9[%c1_235, %c0_236, %c0_237] : memref<2x2x32xf32, #tpu.memory_space<vmem>>, vector<1x2x32xf32>
      %472 = vector.shape_cast %471 : vector<1x2x32xf32> to vector<2x32xf32>
      %473 = vector.shape_cast %470 : vector<2x32xf32> to vector<1x2x32xf32>
      tpu.vector_store %arg9[%c1_235, %c0_236, %c0_237], %473 {strides = array<i32>} : memref<2x2x32xf32, #tpu.memory_space<vmem>>, vector<1x2x32xf32>,
      %c1_238 = arith.constant 1 : index
      %c0_239 = arith.constant 0 : index
      %c0_240 = arith.constant 0 : index
      %474 = vector.load %arg10[%c1_238, %c0_239, %c0_240] : memref<2x2x32xf32, #tpu.memory_space<vmem>>, vector<1x2x32xf32>
      %475 = vector.shape_cast %474 : vector<1x2x32xf32> to vector<2x32xf32>
      %476 = vector.shape_cast %468 : vector<2x32xf32> to vector<1x2x32xf32>
      tpu.vector_store %arg10[%c1_238, %c0_239, %c0_240], %476 {strides = array<i32>} : memref<2x2x32xf32, #tpu.memory_space<vmem>>, vector<1x2x32xf32>,
    } else {
    }
    %c8_i32_186 = arith.constant 8 : i32
    %370 = arith.muli %arg0, %c8_i32_186 : i32
    %c5_i32 = arith.constant 5 : i32
    %371 = arith.addi %370, %c5_i32 : i32
    %c20_i32_187 = arith.constant 20 : i32
    %372 = arith.cmpi slt, %371, %c20_i32_187 : i32
    %373 = arith.extui %372 : i1 to i32
    %c0_i32_188 = arith.constant 0 : i32
    %374 = arith.cmpi ne, %373, %c0_i32_188 : i32
    scf.if %374 {
      %c0_196 = arith.constant 0 : index
      %c0_197 = arith.constant 0 : index
      %c0_198 = arith.constant 0 : index
      %388 = vector.load %arg9[%c0_196, %c0_197, %c0_198] : memref<2x2x32xf32, #tpu.memory_space<vmem>>, vector<1x2x32xf32>
      %389 = vector.shape_cast %388 : vector<1x2x32xf32> to vector<2x32xf32>
      %390 = arith.truncf %389 : vector<2x32xf32> to vector<2x32xbf16>
      %c0_199 = arith.constant 0 : index
      %c0_200 = arith.constant 0 : index
      %c0_201 = arith.constant 0 : index
      %391 = vector.load %arg4[%c0_199, %c0_200, %c0_201] : memref<2x32x128xbf16, #tpu.memory_space<vmem>>, vector<1x32x128xbf16>
      %392 = vector.shape_cast %391 : vector<1x32x128xbf16> to vector<32x128xbf16>
      %cst_202 = arith.constant dense<0.000000e+00> : vector<2x128xf32>
      %393 = tpu.matmul %390, %392, %cst_202 {dimension_numbers = #tpu.dot_dimension_numbers<[1], [0], [0], [1], [0, 0, 1, 1], [], []>} : vector<2x32xbf16>, vector<32x128xbf16>, vector<2x128xf32> -> vector<2x128xf32>
      %c1_203 = arith.constant 1 : index
      %c0_204 = arith.constant 0 : index
      %c0_205 = arith.constant 0 : index
      %394 = vector.load %arg9[%c1_203, %c0_204, %c0_205] : memref<2x2x32xf32, #tpu.memory_space<vmem>>, vector<1x2x32xf32>
      %395 = vector.shape_cast %394 : vector<1x2x32xf32> to vector<2x32xf32>
      %396 = arith.truncf %395 : vector<2x32xf32> to vector<2x32xbf16>
      %c1_206 = arith.constant 1 : index
      %c0_207 = arith.constant 0 : index
      %c0_208 = arith.constant 0 : index
      %397 = vector.load %arg4[%c1_206, %c0_207, %c0_208] : memref<2x32x128xbf16, #tpu.memory_space<vmem>>, vector<1x32x128xbf16>
      %398 = vector.shape_cast %397 : vector<1x32x128xbf16> to vector<32x128xbf16>
      %cst_209 = arith.constant dense<0.000000e+00> : vector<2x128xf32>
      %399 = tpu.matmul %396, %398, %cst_209 {dimension_numbers = #tpu.dot_dimension_numbers<[1], [0], [0], [1], [0, 0, 1, 1], [], []>} : vector<2x32xbf16>, vector<32x128xbf16>, vector<2x128xf32> -> vector<2x128xf32>
      %400 = vector.extract_strided_slice %8 {offsets = [10, 0], sizes = [2, 128], strides = [1, 1]} : vector<16x128xf32> to vector<2x128xf32>
      %401 = arith.addf %400, %393 : vector<2x128xf32>
      %402 = vector.extract_strided_slice %401 {offsets = [0, 0], sizes = [2, 32], strides = [1, 1]} : vector<2x128xf32> to vector<2x32xf32>
      %403 = arith.negf %402 : vector<2x32xf32>
      %404 = math.exp %403 : vector<2x32xf32>
      %cst_210 = arith.constant 1.000000e+00 : f32
      %405 = vector.broadcast %cst_210 : f32 to vector<2x32xf32>
      %406 = arith.addf %405, %404 : vector<2x32xf32>
      %407 = arith.divf %405, %406 : vector<2x32xf32>
      %408 = vector.extract_strided_slice %401 {offsets = [0, 32], sizes = [2, 32], strides = [1, 1]} : vector<2x128xf32> to vector<2x32xf32>
      %409 = arith.negf %408 : vector<2x32xf32>
      %410 = math.exp %409 : vector<2x32xf32>
      %cst_211 = arith.constant 1.000000e+00 : f32
      %411 = vector.broadcast %cst_211 : f32 to vector<2x32xf32>
      %412 = arith.addf %411, %410 : vector<2x32xf32>
      %413 = arith.divf %411, %412 : vector<2x32xf32>
      %414 = vector.extract_strided_slice %401 {offsets = [0, 64], sizes = [2, 32], strides = [1, 1]} : vector<2x128xf32> to vector<2x32xf32>
      %415 = math.tanh %414 : vector<2x32xf32>
      %416 = vector.extract_strided_slice %401 {offsets = [0, 96], sizes = [2, 32], strides = [1, 1]} : vector<2x128xf32> to vector<2x32xf32>
      %417 = arith.negf %416 : vector<2x32xf32>
      %418 = math.exp %417 : vector<2x32xf32>
      %cst_212 = arith.constant 1.000000e+00 : f32
      %419 = vector.broadcast %cst_212 : f32 to vector<2x32xf32>
      %420 = arith.addf %419, %418 : vector<2x32xf32>
      %421 = arith.divf %419, %420 : vector<2x32xf32>
      %c0_213 = arith.constant 0 : index
      %c0_214 = arith.constant 0 : index
      %c0_215 = arith.constant 0 : index
      %422 = vector.load %arg10[%c0_213, %c0_214, %c0_215] : memref<2x2x32xf32, #tpu.memory_space<vmem>>, vector<1x2x32xf32>
      %423 = vector.shape_cast %422 : vector<1x2x32xf32> to vector<2x32xf32>
      %424 = arith.mulf %413, %423 : vector<2x32xf32>
      %425 = arith.mulf %407, %415 : vector<2x32xf32>
      %426 = arith.addf %424, %425 : vector<2x32xf32>
      %427 = math.tanh %426 : vector<2x32xf32>
      %428 = arith.mulf %421, %427 : vector<2x32xf32>
      %c0_216 = arith.constant 0 : index
      %c0_217 = arith.constant 0 : index
      %c0_218 = arith.constant 0 : index
      %429 = vector.load %arg9[%c0_216, %c0_217, %c0_218] : memref<2x2x32xf32, #tpu.memory_space<vmem>>, vector<1x2x32xf32>
      %430 = vector.shape_cast %429 : vector<1x2x32xf32> to vector<2x32xf32>
      %431 = vector.shape_cast %428 : vector<2x32xf32> to vector<1x2x32xf32>
      tpu.vector_store %arg9[%c0_216, %c0_217, %c0_218], %431 {strides = array<i32>} : memref<2x2x32xf32, #tpu.memory_space<vmem>>, vector<1x2x32xf32>,
      %c0_219 = arith.constant 0 : index
      %c0_220 = arith.constant 0 : index
      %c0_221 = arith.constant 0 : index
      %432 = vector.load %arg10[%c0_219, %c0_220, %c0_221] : memref<2x2x32xf32, #tpu.memory_space<vmem>>, vector<1x2x32xf32>
      %433 = vector.shape_cast %432 : vector<1x2x32xf32> to vector<2x32xf32>
      %434 = vector.shape_cast %426 : vector<2x32xf32> to vector<1x2x32xf32>
      tpu.vector_store %arg10[%c0_219, %c0_220, %c0_221], %434 {strides = array<i32>} : memref<2x2x32xf32, #tpu.memory_space<vmem>>, vector<1x2x32xf32>,
      %435 = arith.truncf %428 : vector<2x32xf32> to vector<2x32xbf16>
      %c0_222 = arith.constant 0 : index
      %c0_223 = arith.constant 0 : index
      %c0_224 = arith.constant 0 : index
      %436 = vector.load %arg5[%c0_222, %c0_223, %c0_224] : memref<1x32x128xbf16, #tpu.memory_space<vmem>>, vector<1x32x128xbf16>
      %437 = vector.shape_cast %436 : vector<1x32x128xbf16> to vector<32x128xbf16>
      %cst_225 = arith.constant dense<0.000000e+00> : vector<2x128xf32>
      %438 = tpu.matmul %435, %437, %cst_225 {dimension_numbers = #tpu.dot_dimension_numbers<[1], [0], [0], [1], [0, 0, 1, 1], [], []>} : vector<2x32xbf16>, vector<32x128xbf16>, vector<2x128xf32> -> vector<2x128xf32>
      %439 = arith.addf %438, %399 : vector<2x128xf32>
      %c0_226 = arith.constant 0 : index
      %c0_227 = arith.constant 0 : index
      %c0_228 = arith.constant 0 : index
      %440 = vector.load %arg6[%c0_226, %c0_227, %c0_228] : memref<1x1x128xf32, #tpu.memory_space<vmem>>, vector<1x1x128xf32>
      %441 = vector.shape_cast %440 : vector<1x1x128xf32> to vector<1x128xf32>
      %442 = vector.broadcast %441 : vector<1x128xf32> to vector<2x128xf32>
      %443 = arith.addf %439, %442 : vector<2x128xf32>
      %444 = vector.extract_strided_slice %443 {offsets = [0, 0], sizes = [2, 32], strides = [1, 1]} : vector<2x128xf32> to vector<2x32xf32>
      %445 = arith.negf %444 : vector<2x32xf32>
      %446 = math.exp %445 : vector<2x32xf32>
      %cst_229 = arith.constant 1.000000e+00 : f32
      %447 = vector.broadcast %cst_229 : f32 to vector<2x32xf32>
      %448 = arith.addf %447, %446 : vector<2x32xf32>
      %449 = arith.divf %447, %448 : vector<2x32xf32>
      %450 = vector.extract_strided_slice %443 {offsets = [0, 32], sizes = [2, 32], strides = [1, 1]} : vector<2x128xf32> to vector<2x32xf32>
      %451 = arith.negf %450 : vector<2x32xf32>
      %452 = math.exp %451 : vector<2x32xf32>
      %cst_230 = arith.constant 1.000000e+00 : f32
      %453 = vector.broadcast %cst_230 : f32 to vector<2x32xf32>
      %454 = arith.addf %453, %452 : vector<2x32xf32>
      %455 = arith.divf %453, %454 : vector<2x32xf32>
      %456 = vector.extract_strided_slice %443 {offsets = [0, 64], sizes = [2, 32], strides = [1, 1]} : vector<2x128xf32> to vector<2x32xf32>
      %457 = math.tanh %456 : vector<2x32xf32>
      %458 = vector.extract_strided_slice %443 {offsets = [0, 96], sizes = [2, 32], strides = [1, 1]} : vector<2x128xf32> to vector<2x32xf32>
      %459 = arith.negf %458 : vector<2x32xf32>
      %460 = math.exp %459 : vector<2x32xf32>
      %cst_231 = arith.constant 1.000000e+00 : f32
      %461 = vector.broadcast %cst_231 : f32 to vector<2x32xf32>
      %462 = arith.addf %461, %460 : vector<2x32xf32>
      %463 = arith.divf %461, %462 : vector<2x32xf32>
      %c1_232 = arith.constant 1 : index
      %c0_233 = arith.constant 0 : index
      %c0_234 = arith.constant 0 : index
      %464 = vector.load %arg10[%c1_232, %c0_233, %c0_234] : memref<2x2x32xf32, #tpu.memory_space<vmem>>, vector<1x2x32xf32>
      %465 = vector.shape_cast %464 : vector<1x2x32xf32> to vector<2x32xf32>
      %466 = arith.mulf %455, %465 : vector<2x32xf32>
      %467 = arith.mulf %449, %457 : vector<2x32xf32>
      %468 = arith.addf %466, %467 : vector<2x32xf32>
      %469 = math.tanh %468 : vector<2x32xf32>
      %470 = arith.mulf %463, %469 : vector<2x32xf32>
      %c1_235 = arith.constant 1 : index
      %c0_236 = arith.constant 0 : index
      %c0_237 = arith.constant 0 : index
      %471 = vector.load %arg9[%c1_235, %c0_236, %c0_237] : memref<2x2x32xf32, #tpu.memory_space<vmem>>, vector<1x2x32xf32>
      %472 = vector.shape_cast %471 : vector<1x2x32xf32> to vector<2x32xf32>
      %473 = vector.shape_cast %470 : vector<2x32xf32> to vector<1x2x32xf32>
      tpu.vector_store %arg9[%c1_235, %c0_236, %c0_237], %473 {strides = array<i32>} : memref<2x2x32xf32, #tpu.memory_space<vmem>>, vector<1x2x32xf32>,
      %c1_238 = arith.constant 1 : index
      %c0_239 = arith.constant 0 : index
      %c0_240 = arith.constant 0 : index
      %474 = vector.load %arg10[%c1_238, %c0_239, %c0_240] : memref<2x2x32xf32, #tpu.memory_space<vmem>>, vector<1x2x32xf32>
      %475 = vector.shape_cast %474 : vector<1x2x32xf32> to vector<2x32xf32>
      %476 = vector.shape_cast %468 : vector<2x32xf32> to vector<1x2x32xf32>
      tpu.vector_store %arg10[%c1_238, %c0_239, %c0_240], %476 {strides = array<i32>} : memref<2x2x32xf32, #tpu.memory_space<vmem>>, vector<1x2x32xf32>,
    } else {
    }
    %c8_i32_189 = arith.constant 8 : i32
    %375 = arith.muli %arg0, %c8_i32_189 : i32
    %c6_i32 = arith.constant 6 : i32
    %376 = arith.addi %375, %c6_i32 : i32
    %c20_i32_190 = arith.constant 20 : i32
    %377 = arith.cmpi slt, %376, %c20_i32_190 : i32
    %378 = arith.extui %377 : i1 to i32
    %c0_i32_191 = arith.constant 0 : i32
    %379 = arith.cmpi ne, %378, %c0_i32_191 : i32
    scf.if %379 {
      %c0_196 = arith.constant 0 : index
      %c0_197 = arith.constant 0 : index
      %c0_198 = arith.constant 0 : index
      %388 = vector.load %arg9[%c0_196, %c0_197, %c0_198] : memref<2x2x32xf32, #tpu.memory_space<vmem>>, vector<1x2x32xf32>
      %389 = vector.shape_cast %388 : vector<1x2x32xf32> to vector<2x32xf32>
      %390 = arith.truncf %389 : vector<2x32xf32> to vector<2x32xbf16>
      %c0_199 = arith.constant 0 : index
      %c0_200 = arith.constant 0 : index
      %c0_201 = arith.constant 0 : index
      %391 = vector.load %arg4[%c0_199, %c0_200, %c0_201] : memref<2x32x128xbf16, #tpu.memory_space<vmem>>, vector<1x32x128xbf16>
      %392 = vector.shape_cast %391 : vector<1x32x128xbf16> to vector<32x128xbf16>
      %cst_202 = arith.constant dense<0.000000e+00> : vector<2x128xf32>
      %393 = tpu.matmul %390, %392, %cst_202 {dimension_numbers = #tpu.dot_dimension_numbers<[1], [0], [0], [1], [0, 0, 1, 1], [], []>} : vector<2x32xbf16>, vector<32x128xbf16>, vector<2x128xf32> -> vector<2x128xf32>
      %c1_203 = arith.constant 1 : index
      %c0_204 = arith.constant 0 : index
      %c0_205 = arith.constant 0 : index
      %394 = vector.load %arg9[%c1_203, %c0_204, %c0_205] : memref<2x2x32xf32, #tpu.memory_space<vmem>>, vector<1x2x32xf32>
      %395 = vector.shape_cast %394 : vector<1x2x32xf32> to vector<2x32xf32>
      %396 = arith.truncf %395 : vector<2x32xf32> to vector<2x32xbf16>
      %c1_206 = arith.constant 1 : index
      %c0_207 = arith.constant 0 : index
      %c0_208 = arith.constant 0 : index
      %397 = vector.load %arg4[%c1_206, %c0_207, %c0_208] : memref<2x32x128xbf16, #tpu.memory_space<vmem>>, vector<1x32x128xbf16>
      %398 = vector.shape_cast %397 : vector<1x32x128xbf16> to vector<32x128xbf16>
      %cst_209 = arith.constant dense<0.000000e+00> : vector<2x128xf32>
      %399 = tpu.matmul %396, %398, %cst_209 {dimension_numbers = #tpu.dot_dimension_numbers<[1], [0], [0], [1], [0, 0, 1, 1], [], []>} : vector<2x32xbf16>, vector<32x128xbf16>, vector<2x128xf32> -> vector<2x128xf32>
      %400 = vector.extract_strided_slice %8 {offsets = [12, 0], sizes = [2, 128], strides = [1, 1]} : vector<16x128xf32> to vector<2x128xf32>
      %401 = arith.addf %400, %393 : vector<2x128xf32>
      %402 = vector.extract_strided_slice %401 {offsets = [0, 0], sizes = [2, 32], strides = [1, 1]} : vector<2x128xf32> to vector<2x32xf32>
      %403 = arith.negf %402 : vector<2x32xf32>
      %404 = math.exp %403 : vector<2x32xf32>
      %cst_210 = arith.constant 1.000000e+00 : f32
      %405 = vector.broadcast %cst_210 : f32 to vector<2x32xf32>
      %406 = arith.addf %405, %404 : vector<2x32xf32>
      %407 = arith.divf %405, %406 : vector<2x32xf32>
      %408 = vector.extract_strided_slice %401 {offsets = [0, 32], sizes = [2, 32], strides = [1, 1]} : vector<2x128xf32> to vector<2x32xf32>
      %409 = arith.negf %408 : vector<2x32xf32>
      %410 = math.exp %409 : vector<2x32xf32>
      %cst_211 = arith.constant 1.000000e+00 : f32
      %411 = vector.broadcast %cst_211 : f32 to vector<2x32xf32>
      %412 = arith.addf %411, %410 : vector<2x32xf32>
      %413 = arith.divf %411, %412 : vector<2x32xf32>
      %414 = vector.extract_strided_slice %401 {offsets = [0, 64], sizes = [2, 32], strides = [1, 1]} : vector<2x128xf32> to vector<2x32xf32>
      %415 = math.tanh %414 : vector<2x32xf32>
      %416 = vector.extract_strided_slice %401 {offsets = [0, 96], sizes = [2, 32], strides = [1, 1]} : vector<2x128xf32> to vector<2x32xf32>
      %417 = arith.negf %416 : vector<2x32xf32>
      %418 = math.exp %417 : vector<2x32xf32>
      %cst_212 = arith.constant 1.000000e+00 : f32
      %419 = vector.broadcast %cst_212 : f32 to vector<2x32xf32>
      %420 = arith.addf %419, %418 : vector<2x32xf32>
      %421 = arith.divf %419, %420 : vector<2x32xf32>
      %c0_213 = arith.constant 0 : index
      %c0_214 = arith.constant 0 : index
      %c0_215 = arith.constant 0 : index
      %422 = vector.load %arg10[%c0_213, %c0_214, %c0_215] : memref<2x2x32xf32, #tpu.memory_space<vmem>>, vector<1x2x32xf32>
      %423 = vector.shape_cast %422 : vector<1x2x32xf32> to vector<2x32xf32>
      %424 = arith.mulf %413, %423 : vector<2x32xf32>
      %425 = arith.mulf %407, %415 : vector<2x32xf32>
      %426 = arith.addf %424, %425 : vector<2x32xf32>
      %427 = math.tanh %426 : vector<2x32xf32>
      %428 = arith.mulf %421, %427 : vector<2x32xf32>
      %c0_216 = arith.constant 0 : index
      %c0_217 = arith.constant 0 : index
      %c0_218 = arith.constant 0 : index
      %429 = vector.load %arg9[%c0_216, %c0_217, %c0_218] : memref<2x2x32xf32, #tpu.memory_space<vmem>>, vector<1x2x32xf32>
      %430 = vector.shape_cast %429 : vector<1x2x32xf32> to vector<2x32xf32>
      %431 = vector.shape_cast %428 : vector<2x32xf32> to vector<1x2x32xf32>
      tpu.vector_store %arg9[%c0_216, %c0_217, %c0_218], %431 {strides = array<i32>} : memref<2x2x32xf32, #tpu.memory_space<vmem>>, vector<1x2x32xf32>,
      %c0_219 = arith.constant 0 : index
      %c0_220 = arith.constant 0 : index
      %c0_221 = arith.constant 0 : index
      %432 = vector.load %arg10[%c0_219, %c0_220, %c0_221] : memref<2x2x32xf32, #tpu.memory_space<vmem>>, vector<1x2x32xf32>
      %433 = vector.shape_cast %432 : vector<1x2x32xf32> to vector<2x32xf32>
      %434 = vector.shape_cast %426 : vector<2x32xf32> to vector<1x2x32xf32>
      tpu.vector_store %arg10[%c0_219, %c0_220, %c0_221], %434 {strides = array<i32>} : memref<2x2x32xf32, #tpu.memory_space<vmem>>, vector<1x2x32xf32>,
      %435 = arith.truncf %428 : vector<2x32xf32> to vector<2x32xbf16>
      %c0_222 = arith.constant 0 : index
      %c0_223 = arith.constant 0 : index
      %c0_224 = arith.constant 0 : index
      %436 = vector.load %arg5[%c0_222, %c0_223, %c0_224] : memref<1x32x128xbf16, #tpu.memory_space<vmem>>, vector<1x32x128xbf16>
      %437 = vector.shape_cast %436 : vector<1x32x128xbf16> to vector<32x128xbf16>
      %cst_225 = arith.constant dense<0.000000e+00> : vector<2x128xf32>
      %438 = tpu.matmul %435, %437, %cst_225 {dimension_numbers = #tpu.dot_dimension_numbers<[1], [0], [0], [1], [0, 0, 1, 1], [], []>} : vector<2x32xbf16>, vector<32x128xbf16>, vector<2x128xf32> -> vector<2x128xf32>
      %439 = arith.addf %438, %399 : vector<2x128xf32>
      %c0_226 = arith.constant 0 : index
      %c0_227 = arith.constant 0 : index
      %c0_228 = arith.constant 0 : index
      %440 = vector.load %arg6[%c0_226, %c0_227, %c0_228] : memref<1x1x128xf32, #tpu.memory_space<vmem>>, vector<1x1x128xf32>
      %441 = vector.shape_cast %440 : vector<1x1x128xf32> to vector<1x128xf32>
      %442 = vector.broadcast %441 : vector<1x128xf32> to vector<2x128xf32>
      %443 = arith.addf %439, %442 : vector<2x128xf32>
      %444 = vector.extract_strided_slice %443 {offsets = [0, 0], sizes = [2, 32], strides = [1, 1]} : vector<2x128xf32> to vector<2x32xf32>
      %445 = arith.negf %444 : vector<2x32xf32>
      %446 = math.exp %445 : vector<2x32xf32>
      %cst_229 = arith.constant 1.000000e+00 : f32
      %447 = vector.broadcast %cst_229 : f32 to vector<2x32xf32>
      %448 = arith.addf %447, %446 : vector<2x32xf32>
      %449 = arith.divf %447, %448 : vector<2x32xf32>
      %450 = vector.extract_strided_slice %443 {offsets = [0, 32], sizes = [2, 32], strides = [1, 1]} : vector<2x128xf32> to vector<2x32xf32>
      %451 = arith.negf %450 : vector<2x32xf32>
      %452 = math.exp %451 : vector<2x32xf32>
      %cst_230 = arith.constant 1.000000e+00 : f32
      %453 = vector.broadcast %cst_230 : f32 to vector<2x32xf32>
      %454 = arith.addf %453, %452 : vector<2x32xf32>
      %455 = arith.divf %453, %454 : vector<2x32xf32>
      %456 = vector.extract_strided_slice %443 {offsets = [0, 64], sizes = [2, 32], strides = [1, 1]} : vector<2x128xf32> to vector<2x32xf32>
      %457 = math.tanh %456 : vector<2x32xf32>
      %458 = vector.extract_strided_slice %443 {offsets = [0, 96], sizes = [2, 32], strides = [1, 1]} : vector<2x128xf32> to vector<2x32xf32>
      %459 = arith.negf %458 : vector<2x32xf32>
      %460 = math.exp %459 : vector<2x32xf32>
      %cst_231 = arith.constant 1.000000e+00 : f32
      %461 = vector.broadcast %cst_231 : f32 to vector<2x32xf32>
      %462 = arith.addf %461, %460 : vector<2x32xf32>
      %463 = arith.divf %461, %462 : vector<2x32xf32>
      %c1_232 = arith.constant 1 : index
      %c0_233 = arith.constant 0 : index
      %c0_234 = arith.constant 0 : index
      %464 = vector.load %arg10[%c1_232, %c0_233, %c0_234] : memref<2x2x32xf32, #tpu.memory_space<vmem>>, vector<1x2x32xf32>
      %465 = vector.shape_cast %464 : vector<1x2x32xf32> to vector<2x32xf32>
      %466 = arith.mulf %455, %465 : vector<2x32xf32>
      %467 = arith.mulf %449, %457 : vector<2x32xf32>
      %468 = arith.addf %466, %467 : vector<2x32xf32>
      %469 = math.tanh %468 : vector<2x32xf32>
      %470 = arith.mulf %463, %469 : vector<2x32xf32>
      %c1_235 = arith.constant 1 : index
      %c0_236 = arith.constant 0 : index
      %c0_237 = arith.constant 0 : index
      %471 = vector.load %arg9[%c1_235, %c0_236, %c0_237] : memref<2x2x32xf32, #tpu.memory_space<vmem>>, vector<1x2x32xf32>
      %472 = vector.shape_cast %471 : vector<1x2x32xf32> to vector<2x32xf32>
      %473 = vector.shape_cast %470 : vector<2x32xf32> to vector<1x2x32xf32>
      tpu.vector_store %arg9[%c1_235, %c0_236, %c0_237], %473 {strides = array<i32>} : memref<2x2x32xf32, #tpu.memory_space<vmem>>, vector<1x2x32xf32>,
      %c1_238 = arith.constant 1 : index
      %c0_239 = arith.constant 0 : index
      %c0_240 = arith.constant 0 : index
      %474 = vector.load %arg10[%c1_238, %c0_239, %c0_240] : memref<2x2x32xf32, #tpu.memory_space<vmem>>, vector<1x2x32xf32>
      %475 = vector.shape_cast %474 : vector<1x2x32xf32> to vector<2x32xf32>
      %476 = vector.shape_cast %468 : vector<2x32xf32> to vector<1x2x32xf32>
      tpu.vector_store %arg10[%c1_238, %c0_239, %c0_240], %476 {strides = array<i32>} : memref<2x2x32xf32, #tpu.memory_space<vmem>>, vector<1x2x32xf32>,
    } else {
    }
    %c8_i32_192 = arith.constant 8 : i32
    %380 = arith.muli %arg0, %c8_i32_192 : i32
    %c7_i32 = arith.constant 7 : i32
    %381 = arith.addi %380, %c7_i32 : i32
    %c20_i32_193 = arith.constant 20 : i32
    %382 = arith.cmpi slt, %381, %c20_i32_193 : i32
    %383 = arith.extui %382 : i1 to i32
    %c0_i32_194 = arith.constant 0 : i32
    %384 = arith.cmpi ne, %383, %c0_i32_194 : i32
    scf.if %384 {
      %c0_196 = arith.constant 0 : index
      %c0_197 = arith.constant 0 : index
      %c0_198 = arith.constant 0 : index
      %388 = vector.load %arg9[%c0_196, %c0_197, %c0_198] : memref<2x2x32xf32, #tpu.memory_space<vmem>>, vector<1x2x32xf32>
      %389 = vector.shape_cast %388 : vector<1x2x32xf32> to vector<2x32xf32>
      %390 = arith.truncf %389 : vector<2x32xf32> to vector<2x32xbf16>
      %c0_199 = arith.constant 0 : index
      %c0_200 = arith.constant 0 : index
      %c0_201 = arith.constant 0 : index
      %391 = vector.load %arg4[%c0_199, %c0_200, %c0_201] : memref<2x32x128xbf16, #tpu.memory_space<vmem>>, vector<1x32x128xbf16>
      %392 = vector.shape_cast %391 : vector<1x32x128xbf16> to vector<32x128xbf16>
      %cst_202 = arith.constant dense<0.000000e+00> : vector<2x128xf32>
      %393 = tpu.matmul %390, %392, %cst_202 {dimension_numbers = #tpu.dot_dimension_numbers<[1], [0], [0], [1], [0, 0, 1, 1], [], []>} : vector<2x32xbf16>, vector<32x128xbf16>, vector<2x128xf32> -> vector<2x128xf32>
      %c1_203 = arith.constant 1 : index
      %c0_204 = arith.constant 0 : index
      %c0_205 = arith.constant 0 : index
      %394 = vector.load %arg9[%c1_203, %c0_204, %c0_205] : memref<2x2x32xf32, #tpu.memory_space<vmem>>, vector<1x2x32xf32>
      %395 = vector.shape_cast %394 : vector<1x2x32xf32> to vector<2x32xf32>
      %396 = arith.truncf %395 : vector<2x32xf32> to vector<2x32xbf16>
      %c1_206 = arith.constant 1 : index
      %c0_207 = arith.constant 0 : index
      %c0_208 = arith.constant 0 : index
      %397 = vector.load %arg4[%c1_206, %c0_207, %c0_208] : memref<2x32x128xbf16, #tpu.memory_space<vmem>>, vector<1x32x128xbf16>
      %398 = vector.shape_cast %397 : vector<1x32x128xbf16> to vector<32x128xbf16>
      %cst_209 = arith.constant dense<0.000000e+00> : vector<2x128xf32>
      %399 = tpu.matmul %396, %398, %cst_209 {dimension_numbers = #tpu.dot_dimension_numbers<[1], [0], [0], [1], [0, 0, 1, 1], [], []>} : vector<2x32xbf16>, vector<32x128xbf16>, vector<2x128xf32> -> vector<2x128xf32>
      %400 = vector.extract_strided_slice %8 {offsets = [14, 0], sizes = [2, 128], strides = [1, 1]} : vector<16x128xf32> to vector<2x128xf32>
      %401 = arith.addf %400, %393 : vector<2x128xf32>
      %402 = vector.extract_strided_slice %401 {offsets = [0, 0], sizes = [2, 32], strides = [1, 1]} : vector<2x128xf32> to vector<2x32xf32>
      %403 = arith.negf %402 : vector<2x32xf32>
      %404 = math.exp %403 : vector<2x32xf32>
      %cst_210 = arith.constant 1.000000e+00 : f32
      %405 = vector.broadcast %cst_210 : f32 to vector<2x32xf32>
      %406 = arith.addf %405, %404 : vector<2x32xf32>
      %407 = arith.divf %405, %406 : vector<2x32xf32>
      %408 = vector.extract_strided_slice %401 {offsets = [0, 32], sizes = [2, 32], strides = [1, 1]} : vector<2x128xf32> to vector<2x32xf32>
      %409 = arith.negf %408 : vector<2x32xf32>
      %410 = math.exp %409 : vector<2x32xf32>
      %cst_211 = arith.constant 1.000000e+00 : f32
      %411 = vector.broadcast %cst_211 : f32 to vector<2x32xf32>
      %412 = arith.addf %411, %410 : vector<2x32xf32>
      %413 = arith.divf %411, %412 : vector<2x32xf32>
      %414 = vector.extract_strided_slice %401 {offsets = [0, 64], sizes = [2, 32], strides = [1, 1]} : vector<2x128xf32> to vector<2x32xf32>
      %415 = math.tanh %414 : vector<2x32xf32>
      %416 = vector.extract_strided_slice %401 {offsets = [0, 96], sizes = [2, 32], strides = [1, 1]} : vector<2x128xf32> to vector<2x32xf32>
      %417 = arith.negf %416 : vector<2x32xf32>
      %418 = math.exp %417 : vector<2x32xf32>
      %cst_212 = arith.constant 1.000000e+00 : f32
      %419 = vector.broadcast %cst_212 : f32 to vector<2x32xf32>
      %420 = arith.addf %419, %418 : vector<2x32xf32>
      %421 = arith.divf %419, %420 : vector<2x32xf32>
      %c0_213 = arith.constant 0 : index
      %c0_214 = arith.constant 0 : index
      %c0_215 = arith.constant 0 : index
      %422 = vector.load %arg10[%c0_213, %c0_214, %c0_215] : memref<2x2x32xf32, #tpu.memory_space<vmem>>, vector<1x2x32xf32>
      %423 = vector.shape_cast %422 : vector<1x2x32xf32> to vector<2x32xf32>
      %424 = arith.mulf %413, %423 : vector<2x32xf32>
      %425 = arith.mulf %407, %415 : vector<2x32xf32>
      %426 = arith.addf %424, %425 : vector<2x32xf32>
      %427 = math.tanh %426 : vector<2x32xf32>
      %428 = arith.mulf %421, %427 : vector<2x32xf32>
      %c0_216 = arith.constant 0 : index
      %c0_217 = arith.constant 0 : index
      %c0_218 = arith.constant 0 : index
      %429 = vector.load %arg9[%c0_216, %c0_217, %c0_218] : memref<2x2x32xf32, #tpu.memory_space<vmem>>, vector<1x2x32xf32>
      %430 = vector.shape_cast %429 : vector<1x2x32xf32> to vector<2x32xf32>
      %431 = vector.shape_cast %428 : vector<2x32xf32> to vector<1x2x32xf32>
      tpu.vector_store %arg9[%c0_216, %c0_217, %c0_218], %431 {strides = array<i32>} : memref<2x2x32xf32, #tpu.memory_space<vmem>>, vector<1x2x32xf32>,
      %c0_219 = arith.constant 0 : index
      %c0_220 = arith.constant 0 : index
      %c0_221 = arith.constant 0 : index
      %432 = vector.load %arg10[%c0_219, %c0_220, %c0_221] : memref<2x2x32xf32, #tpu.memory_space<vmem>>, vector<1x2x32xf32>
      %433 = vector.shape_cast %432 : vector<1x2x32xf32> to vector<2x32xf32>
      %434 = vector.shape_cast %426 : vector<2x32xf32> to vector<1x2x32xf32>
      tpu.vector_store %arg10[%c0_219, %c0_220, %c0_221], %434 {strides = array<i32>} : memref<2x2x32xf32, #tpu.memory_space<vmem>>, vector<1x2x32xf32>,
      %435 = arith.truncf %428 : vector<2x32xf32> to vector<2x32xbf16>
      %c0_222 = arith.constant 0 : index
      %c0_223 = arith.constant 0 : index
      %c0_224 = arith.constant 0 : index
      %436 = vector.load %arg5[%c0_222, %c0_223, %c0_224] : memref<1x32x128xbf16, #tpu.memory_space<vmem>>, vector<1x32x128xbf16>
      %437 = vector.shape_cast %436 : vector<1x32x128xbf16> to vector<32x128xbf16>
      %cst_225 = arith.constant dense<0.000000e+00> : vector<2x128xf32>
      %438 = tpu.matmul %435, %437, %cst_225 {dimension_numbers = #tpu.dot_dimension_numbers<[1], [0], [0], [1], [0, 0, 1, 1], [], []>} : vector<2x32xbf16>, vector<32x128xbf16>, vector<2x128xf32> -> vector<2x128xf32>
      %439 = arith.addf %438, %399 : vector<2x128xf32>
      %c0_226 = arith.constant 0 : index
      %c0_227 = arith.constant 0 : index
      %c0_228 = arith.constant 0 : index
      %440 = vector.load %arg6[%c0_226, %c0_227, %c0_228] : memref<1x1x128xf32, #tpu.memory_space<vmem>>, vector<1x1x128xf32>
      %441 = vector.shape_cast %440 : vector<1x1x128xf32> to vector<1x128xf32>
      %442 = vector.broadcast %441 : vector<1x128xf32> to vector<2x128xf32>
      %443 = arith.addf %439, %442 : vector<2x128xf32>
      %444 = vector.extract_strided_slice %443 {offsets = [0, 0], sizes = [2, 32], strides = [1, 1]} : vector<2x128xf32> to vector<2x32xf32>
      %445 = arith.negf %444 : vector<2x32xf32>
      %446 = math.exp %445 : vector<2x32xf32>
      %cst_229 = arith.constant 1.000000e+00 : f32
      %447 = vector.broadcast %cst_229 : f32 to vector<2x32xf32>
      %448 = arith.addf %447, %446 : vector<2x32xf32>
      %449 = arith.divf %447, %448 : vector<2x32xf32>
      %450 = vector.extract_strided_slice %443 {offsets = [0, 32], sizes = [2, 32], strides = [1, 1]} : vector<2x128xf32> to vector<2x32xf32>
      %451 = arith.negf %450 : vector<2x32xf32>
      %452 = math.exp %451 : vector<2x32xf32>
      %cst_230 = arith.constant 1.000000e+00 : f32
      %453 = vector.broadcast %cst_230 : f32 to vector<2x32xf32>
      %454 = arith.addf %453, %452 : vector<2x32xf32>
      %455 = arith.divf %453, %454 : vector<2x32xf32>
      %456 = vector.extract_strided_slice %443 {offsets = [0, 64], sizes = [2, 32], strides = [1, 1]} : vector<2x128xf32> to vector<2x32xf32>
      %457 = math.tanh %456 : vector<2x32xf32>
      %458 = vector.extract_strided_slice %443 {offsets = [0, 96], sizes = [2, 32], strides = [1, 1]} : vector<2x128xf32> to vector<2x32xf32>
      %459 = arith.negf %458 : vector<2x32xf32>
      %460 = math.exp %459 : vector<2x32xf32>
      %cst_231 = arith.constant 1.000000e+00 : f32
      %461 = vector.broadcast %cst_231 : f32 to vector<2x32xf32>
      %462 = arith.addf %461, %460 : vector<2x32xf32>
      %463 = arith.divf %461, %462 : vector<2x32xf32>
      %c1_232 = arith.constant 1 : index
      %c0_233 = arith.constant 0 : index
      %c0_234 = arith.constant 0 : index
      %464 = vector.load %arg10[%c1_232, %c0_233, %c0_234] : memref<2x2x32xf32, #tpu.memory_space<vmem>>, vector<1x2x32xf32>
      %465 = vector.shape_cast %464 : vector<1x2x32xf32> to vector<2x32xf32>
      %466 = arith.mulf %455, %465 : vector<2x32xf32>
      %467 = arith.mulf %449, %457 : vector<2x32xf32>
      %468 = arith.addf %466, %467 : vector<2x32xf32>
      %469 = math.tanh %468 : vector<2x32xf32>
      %470 = arith.mulf %463, %469 : vector<2x32xf32>
      %c1_235 = arith.constant 1 : index
      %c0_236 = arith.constant 0 : index
      %c0_237 = arith.constant 0 : index
      %471 = vector.load %arg9[%c1_235, %c0_236, %c0_237] : memref<2x2x32xf32, #tpu.memory_space<vmem>>, vector<1x2x32xf32>
      %472 = vector.shape_cast %471 : vector<1x2x32xf32> to vector<2x32xf32>
      %473 = vector.shape_cast %470 : vector<2x32xf32> to vector<1x2x32xf32>
      tpu.vector_store %arg9[%c1_235, %c0_236, %c0_237], %473 {strides = array<i32>} : memref<2x2x32xf32, #tpu.memory_space<vmem>>, vector<1x2x32xf32>,
      %c1_238 = arith.constant 1 : index
      %c0_239 = arith.constant 0 : index
      %c0_240 = arith.constant 0 : index
      %474 = vector.load %arg10[%c1_238, %c0_239, %c0_240] : memref<2x2x32xf32, #tpu.memory_space<vmem>>, vector<1x2x32xf32>
      %475 = vector.shape_cast %474 : vector<1x2x32xf32> to vector<2x32xf32>
      %476 = vector.shape_cast %468 : vector<2x32xf32> to vector<1x2x32xf32>
      tpu.vector_store %arg10[%c1_238, %c0_239, %c0_240], %476 {strides = array<i32>} : memref<2x2x32xf32, #tpu.memory_space<vmem>>, vector<1x2x32xf32>,
    } else {
    }
    %c2_i32 = arith.constant 2 : i32
    %385 = arith.cmpi eq, %arg0, %c2_i32 : i32
    %386 = arith.extui %385 : i1 to i32
    %c0_i32_195 = arith.constant 0 : i32
    %387 = arith.cmpi ne, %386, %c0_i32_195 : i32
    scf.if %387 {
      %c0_196 = arith.constant 0 : index
      %c0_197 = arith.constant 0 : index
      %c0_198 = arith.constant 0 : index
      %388 = vector.load %arg9[%c0_196, %c0_197, %c0_198] : memref<2x2x32xf32, #tpu.memory_space<vmem>>, vector<2x2x32xf32>
      %c0_199 = arith.constant 0 : index
      %c0_200 = arith.constant 0 : index
      %c0_201 = arith.constant 0 : index
      %389 = vector.load %arg7[%c0_199, %c0_200, %c0_201] : memref<2x2x32xf32, #tpu.memory_space<vmem>>, vector<2x2x32xf32>
      tpu.vector_store %arg7[%c0_199, %c0_200, %c0_201], %388 {strides = array<i32>} : memref<2x2x32xf32, #tpu.memory_space<vmem>>, vector<2x2x32xf32>,
      %c0_202 = arith.constant 0 : index
      %c0_203 = arith.constant 0 : index
      %c0_204 = arith.constant 0 : index
      %390 = vector.load %arg10[%c0_202, %c0_203, %c0_204] : memref<2x2x32xf32, #tpu.memory_space<vmem>>, vector<2x2x32xf32>
      %c0_205 = arith.constant 0 : index
      %c0_206 = arith.constant 0 : index
      %c0_207 = arith.constant 0 : index
      %391 = vector.load %arg8[%c0_205, %c0_206, %c0_207] : memref<2x2x32xf32, #tpu.memory_space<vmem>>, vector<2x2x32xf32>
      tpu.vector_store %arg8[%c0_205, %c0_206, %c0_207], %390 {strides = array<i32>} : memref<2x2x32xf32, #tpu.memory_space<vmem>>, vector<2x2x32xf32>,
    } else {
    }
    return
  }
  func.func @transform_0(%arg0: i32) -> (i32, i32) {
    %c0_i32 = arith.constant 0 : i32
    %c0_i32_0 = arith.constant 0 : i32
    return %arg0, %c0_i32 : i32, i32
  }
  func.func @transform_1(%arg0: i32) -> (i32, i32) {
    %c0_i32 = arith.constant 0 : i32
    %c0_i32_0 = arith.constant 0 : i32
    %c0_i32_1 = arith.constant 0 : i32
    return %c0_i32, %c0_i32_0 : i32, i32
  }
  func.func @transform_2(%arg0: i32) -> (i32, i32) {
    %c0_i32 = arith.constant 0 : i32
    %c0_i32_0 = arith.constant 0 : i32
    %c0_i32_1 = arith.constant 0 : i32
    return %c0_i32, %c0_i32_0 : i32, i32
  }
  func.func @transform_3(%arg0: i32) -> (i32, i32, i32) {
    %c0_i32 = arith.constant 0 : i32
    %c0_i32_0 = arith.constant 0 : i32
    %c0_i32_1 = arith.constant 0 : i32
    %c0_i32_2 = arith.constant 0 : i32
    return %c0_i32, %c0_i32_0, %c0_i32_1 : i32, i32, i32
  }
  func.func @transform_4(%arg0: i32) -> (i32, i32, i32) {
    %c0_i32 = arith.constant 0 : i32
    %c0_i32_0 = arith.constant 0 : i32
    %c0_i32_1 = arith.constant 0 : i32
    %c0_i32_2 = arith.constant 0 : i32
    return %c0_i32, %c0_i32_0, %c0_i32_1 : i32, i32, i32
  }
  func.func @transform_5(%arg0: i32) -> (i32, i32, i32) {
    %c0_i32 = arith.constant 0 : i32
    %c0_i32_0 = arith.constant 0 : i32
    %c0_i32_1 = arith.constant 0 : i32
    %c0_i32_2 = arith.constant 0 : i32
    return %c0_i32, %c0_i32_0, %c0_i32_1 : i32, i32, i32
  }
  func.func @transform_6(%arg0: i32) -> (i32, i32, i32) {
    %c0_i32 = arith.constant 0 : i32
    %c0_i32_0 = arith.constant 0 : i32
    %c0_i32_1 = arith.constant 0 : i32
    %c0_i32_2 = arith.constant 0 : i32
    return %c0_i32, %c0_i32_0, %c0_i32_1 : i32, i32, i32
  }
  func.func @transform_7(%arg0: i32) -> (i32, i32, i32) {
    %c0_i32 = arith.constant 0 : i32
    %c0_i32_0 = arith.constant 0 : i32
    %c0_i32_1 = arith.constant 0 : i32
    %c0_i32_2 = arith.constant 0 : i32
    return %c0_i32, %c0_i32_0, %c0_i32_1 : i32, i32, i32
  }
}

</mosaic_0001>

<bundles_post_ra>
// kernel: tpu_custom_call.1
= control target key start
LH: loop header
LB: loop body
LE: loop exit
PB: predicated region body
PF: predicated region fallthrough
CT: control target
= control target key end

     0   :  { %13 = vsyncpa [#allocation5], 0  ;;  %s4436_s0 = inlined_call_operand.hbm [shape: bf16[40,16], index: 0, kind: input, shape index: {}]   ;;  %s4437_s1 = inlined_call_operand.hbm [shape: bf16[16,128], index: 1, kind: input, shape index: {}]   ;;  %s4438_s2 = inlined_call_operand.hbm [shape: f32[1,128], index: 2, kind: input, shape index: {}]   ;;  %s4439_s3 = inlined_call_operand.hbm [shape: bf16[2,32,128], index: 3, kind: input, shape index: {}]   ;;  %s4440_s4 = inlined_call_operand.hbm [shape: bf16[1,32,128], index: 4, kind: input, shape index: {}]   ;;  %s4441_s5 = inlined_call_operand.hbm [shape: f32[1,1,128], index: 5, kind: input, shape index: {}]   ;;  %s4442_s6 = inlined_call_operand.hbm [shape: f32[2,2,32], index: 6, kind: output, shape index: {0}]   ;;  %s4443_s7 = inlined_call_operand.hbm [shape: f32[2,2,32], index: 7, kind: output, shape index: {1}]  }
   0x1   :  { %15 = vsyncpa [#allocation5 + $0x1], 0 }
   0x2   :  { %16 = vsyncpa [#allocation8], 0 }
   0x3   :  { %17 = vsyncpa [#allocation11], 0 }
   0x4   :  { %18 = vsyncpa [#allocation14], 0 }
   0x5   :  { %19 = vsyncpa [#allocation6], 0 }
   0x6   :  { %20 = vsyncpa [#allocation17], 0  ;;  %s3889_s24 = smov 0   ;;  %s3891_s25 = smov 0  }
   0x7   :  { %s3893_s26 = smov 0   ;;  %s3895_s27 = smov 0  }
   0x8 LB: > { %s3908_s28 = sadd.s32 4294967295, %s3808_s27   ;;  %s3911_s29 = sadd.s32 1, %s3808_s27   ;;  %s3808_s27 = sphi %s3895_s27, %s4468_s27   ;;  %s3804_s26 = sphi %s3893_s26, %s4472_s26   ;;  %s3800_s25 = sphi %s3891_s25, %s4471_s25   ;;  %s3796_s24 = sphi %s3889_s24, %s4470_s24  }
   0x9   : > { %4450 = sst [smem:[#allocation24_spill]] %s3911_s29  ;;  %s30_s30 = ssub.s32 %s3808_s27, %s3911_s29 }
   0xa   : > { %s33_s8 = sadd.s32 1, %s3804_s26  ;;  %p31_p0 = scmp.eq.s32.totalorder %s30_s30, 0 }
   0xb   : > { %p40_p1 = scmp.ne.s32.totalorder %s3804_s26, %s3800_s25  ;;  %p41_p2 = scmp.eq.s32.totalorder %s3808_s27, 0 }
   0xc   : > { %p46_p3 = scmp.ne.s32.totalorder %s3800_s25, %s3796_s24  ;;  %p4444_p5 = scmp.eq.s32.totalorder %s3908_s28, 0 }
   0xd   : > { %s3921_s9 = scalar_select %p31_p0, %s3804_s26, %s33_s8  }
   0xe   : > { %p3923_p4 = por %p41_p2, %p40_p1  ;;  %p2820_p6 = scmp.ge.s32.totalorder %s3808_s27, 1 }
   0xf   : > { %4451 = sst [smem:[#allocation25_spill]] %s3921_s9  ;;  %p204_p7 = scmp.lt.s32.totalorder %s3808_s27, 4 }
  0x10   : > { %s4452_s10 = scalar_select %p3923_p4, 1, 0 }
  0x11   : > { %p3932_p8 = por %p4444_p5, %p46_p3  ;;  %p3937_p10 = pnand %p2820_p6, %p204_p7 }
  0x12   : > { %s3810_s13 = smov [#allocation7]   ;;  %s3811_s16 = smov [#allocation10]  }
  0x13   : > { %s4453_s11 = scalar_select %p3932_p8, 1, 0 }
  0x14   : > { %s4454_s12 = scalar_select %p3937_p10, 1, 0 }
  0x15   : > { %s216_s14 = sshll.u32 %s3810_s13, 4  ;;  %p3256_p11 = pneg %p3937_p10  ;;  %s3943_s14 = int_to_ptr.vmem [resolvable:$true] %s216_s14 }
  0x16   : > { %s240_s17 = sshll.u32 %s3811_s16, 4  ;;  %s3812_s18 = smov [#allocation9]   ;;  %s3951_s17 = int_to_ptr.vmem [resolvable:$true] %s240_s17 }
  0x17   : > { %p3947_p12 = pnand %p3256_p11, %p4444_p5  ;;  %s3953_s19 = sshll.u32 %s3812_s18, 4  ;;  %s231_s19 = int_to_ptr.vmem [resolvable:$true] %s3953_s19 }
  0x18   : > { %s3534_s22 = scalar_lea.hbm %s4437_s1, 128 }
  0x19   : > { %p3535_p13 = scmp.ne.s32.totalorder %s4437_s1, %s3534_s22  ;;  %p3963_p0 = pneg %p3947_p12 }
  0x1a   : > { %p3541_p3 = scmp.lt.u32.totalorder %s3534_s22, %s4437_s1 }
  0x1b   : > { %p3537_p1 = pnand %p3963_p0, %p3535_p13 }
  0x1d   : > { %p3538_p2 = pneg %p3537_p1 }
  0x1f   : > { %p3543_p6 = pnand %p3541_p3, %p3538_p2 }
  0x21   : > { %3546 = shalt.err (!%p3543_p6)
}
  0x22   : > { %s3547_s16 = scalar_lea.vmem %s3943_s14, 128  ;;  %p3555_p5 = scmp.lt.s32.totalorder %s3943_s14, %s3943_s14 }
  0x23   : > { %p3548_p7 = scmp.ne.s32.totalorder %s3943_s14, %s3547_s16  ;;  %p3556_p8 = scmp.lt.s32.totalorder %s3547_s16, %s3547_s16 }
  0x25   : > { %p3550_p11 = pnand %p3548_p7, %p3963_p0  ;;  %p3557_p13 = por %p3556_p8, %p3555_p5 }
  0x27   : > { %p3551_p9 = pneg %p3550_p11 }
  0x29   : > { %p3558_p1 = pnand %p3557_p13, %p3551_p9 }
  0x2b   : > { %3561 = shalt.err (!%p3558_p1)
}
  0x2c   : > { %s4449_s18 = smov 64   ;;  %s3814_s20 = smov 4  }
  0x2d   : > { %3259 = dma.hbm_to_vmem [thread:$0]  (!%p3947_p12), %s4437_s1, 128, %s3943_s14, [#allocation8], %s4449_s18, %s4449_s18, %s3814_s20  }
  0x2e   : > { %s3562_s8 = scalar_lea.hbm %s4439_s3, 512 }
  0x2f   : > { %p3563_p5 = scmp.ne.s32.totalorder %s4439_s3, %s3562_s8  ;;  %p3569_p2 = scmp.lt.u32.totalorder %s3562_s8, %s4439_s3 }
  0x31   : > { %p3565_p8 = pnand %p3563_p5, %p3963_p0 }
  0x33   : > { %p3566_p9 = pneg %p3565_p8 }
  0x35   : > { %p3571_p3 = pnand %p3569_p2, %p3566_p9 }
  0x37   : > { %3574 = shalt.err (!%p3571_p3)
}
  0x38   : > { %s3575_s14 = scalar_lea.vmem %s3951_s17, 512  ;;  %p3583_p13 = scmp.lt.s32.totalorder %s3951_s17, %s3951_s17 }
  0x39   : > { %p3576_p6 = scmp.ne.s32.totalorder %s3951_s17, %s3575_s14  ;;  %p3584_p1 = scmp.lt.s32.totalorder %s3575_s14, %s3575_s14 }
  0x3b   : > { %p3578_p7 = pnand %p3576_p6, %p3963_p0  ;;  %p3585_p5 = por %p3584_p1, %p3583_p13 }
  0x3d   : > { %p3579_p11 = pneg %p3578_p7 }
  0x3f   : > { %p3586_p8 = pnand %p3585_p5, %p3579_p11 }
  0x41   : > { %3589 = shalt.err (!%p3586_p8)
}
  0x42   : > { %3265 = dma.hbm_to_vmem [thread:$0]  (!%p3947_p12), %s4439_s3, 512, %s3951_s17, [#allocation11], %s4449_s18, %s4449_s18, %s3814_s20  }
  0x43   : > { %s3590_s23 = scalar_lea.hbm %s4438_s2, 16 }
  0x44   : > { %p3591_p9 = scmp.ne.s32.totalorder %s4438_s2, %s3590_s23  ;;  %p3597_p6 = scmp.lt.u32.totalorder %s3590_s23, %s4438_s2 }
  0x46   : > { %p3593_p2 = pnand %p3591_p9, %p3963_p0 }
  0x48   : > { %p3594_p3 = pneg %p3593_p2 }
  0x4a   : > { %p3599_p7 = pnand %p3597_p6, %p3594_p3 }
  0x4c   : > { %3602 = shalt.err (!%p3599_p7)
}
  0x4d   : > { %s3603_s14 = scalar_lea.vmem %s231_s19, 16  ;;  %s3610_s17 = scalar_lea.vmem %s231_s19, 32 }
  0x4e   : > { %p3604_p11 = scmp.ne.s32.totalorder %s231_s19, %s3603_s14  ;;  %p3611_p5 = scmp.lt.s32.totalorder %s231_s19, %s231_s19 }
  0x4f   : > { %p3612_p8 = scmp.lt.s32.totalorder %s3610_s17, %s3603_s14 }
  0x50   : > { %p3606_p13 = pnand %p3604_p11, %p3963_p0 }
  0x51   : > { %p3613_p10 = por %p3612_p8, %p3611_p5 }
  0x52   : > { %p3607_p1 = pneg %p3606_p13 }
  0x54   : > { %p3614_p4 = pnand %p3613_p10, %p3607_p1 }
  0x56   : > { %3617 = shalt.err (!%p3614_p4)
}
  0x57   : > { %3262 = dma.hbm_to_vmem [thread:$0]  (!%p3947_p12), %s4438_s2, 16, %s231_s19, [#allocation8]  }
  0x58   : > { %s3815_s21 = smov [#allocation12]   ;;  %s3816_s23 = smov [#allocation13]  }
  0x59   : > { %s253_s22 = sshll.u32 %s3815_s21, 4  ;;  %s267_s24 = sshll.u32 %s3816_s23, 4  ;;  %s254_s22 = int_to_ptr.vmem [resolvable:$true] %s253_s22  ;;  %s268_s24 = int_to_ptr.vmem [resolvable:$true] %s267_s24 }
  0x5a   : > { %s3618_s16 = scalar_lea.hbm %s4440_s4, 256 }
  0x5b   : > { %p3619_p4 = scmp.ne.s32.totalorder %s4440_s4, %s3618_s16  ;;  %p3625_p2 = scmp.lt.u32.totalorder %s3618_s16, %s4440_s4 }
  0x5d   : > { %p3621_p10 = pnand %p3619_p4, %p3963_p0 }
  0x5f   : > { %p3622_p9 = pneg %p3621_p10 }
  0x61   : > { %p3627_p3 = pnand %p3625_p2, %p3622_p9 }
  0x63   : > { %3630 = shalt.err (!%p3627_p3)
}
  0x64   : > { %s3631_s19 = scalar_lea.vmem %s254_s22, 256  ;;  %p3639_p13 = scmp.lt.s32.totalorder %s254_s22, %s254_s22 }
  0x65   : > { %p3632_p6 = scmp.ne.s32.totalorder %s254_s22, %s3631_s19  ;;  %p3640_p1 = scmp.lt.s32.totalorder %s3631_s19, %s3631_s19 }
  0x67   : > { %p3634_p7 = pnand %p3632_p6, %p3963_p0  ;;  %p3641_p5 = por %p3640_p1, %p3639_p13 }
  0x69   : > { %p3635_p11 = pneg %p3634_p7 }
  0x6b   : > { %p3642_p8 = pnand %p3641_p5, %p3635_p11 }
  0x6d   : > { %3645 = shalt.err (!%p3642_p8)
}
  0x6e   : > { %s4457_s9 = smov 64   ;;  %s3646_s13 = scalar_lea.hbm %s4441_s5, 16 }
  0x6f   : > { %3268 = dma.hbm_to_vmem [thread:$0]  (!%p3947_p12), %s4440_s4, 256, %s254_s22, [#allocation11], %s4457_s9, %s4457_s9, %s3814_s20  }
  0x70   : > { %p3647_p4 = scmp.ne.s32.totalorder %s4441_s5, %s3646_s13  ;;  %p3653_p2 = scmp.lt.u32.totalorder %s3646_s13, %s4441_s5 }
  0x72   : > { %p3649_p10 = pnand %p3647_p4, %p3963_p0 }
  0x74   : > { %p3650_p9 = pneg %p3649_p10 }
  0x76   : > { %p3655_p3 = pnand %p3653_p2, %p3650_p9 }
  0x78   : > { %3658 = shalt.err (!%p3655_p3)
}
  0x79   : > { %s3659_s19 = scalar_lea.vmem %s268_s24, 16  ;;  %s3666_s20 = scalar_lea.vmem %s268_s24, 32 }
  0x7a   : > { %p3660_p6 = scmp.ne.s32.totalorder %s268_s24, %s3659_s19  ;;  %p3667_p13 = scmp.lt.s32.totalorder %s268_s24, %s268_s24 }
  0x7b   : > { %p3668_p1 = scmp.lt.s32.totalorder %s3666_s20, %s3659_s19 }
  0x7c   : > { %p3662_p7 = pnand %p3660_p6, %p3963_p0 }
  0x7d   : > { %p3669_p5 = por %p3668_p1, %p3667_p13 }
  0x7e   : > { %p3663_p11 = pneg %p3662_p7 }
  0x80   : > { %p3670_p8 = pnand %p3669_p5, %p3663_p11 }
  0x82   : > { %3673 = shalt.err (!%p3670_p8)
}
  0x83   : > { %3271 = dma.hbm_to_vmem [thread:$0]  (!%p3947_p12), %s4441_s5, 16, %s268_s24, [#allocation14]  }
  0x84   : > { %p2826_p4 = scmp.ge.s32.totalorder %s3808_s27, 3 }
  0x85   : > { %p4458_p10 = scmp.ne.s32.totalorder (!%p2826_p4), %s4452_s10, 0 }
  0x86   : > { %274 = sbr.rel (%p2826_p4) target bundleno = 176 (0xb0), region = 36 }
  0x8d   : > { %277 = sbr.rel (!%p4458_p10) target bundleno = 176 (0xb0), region = 40  ;;  %s278_s30 = sand.u32 (%p4458_p10), 1, %s3804_s26  }
  0x8e   : > { %s2828_s18 = sshll.u32 (%p4458_p10), %s3808_s27, 1  ;;  %s2827_s21 = sshll.u32 (%p4458_p10), %s278_s30, 3 }
  0x8f   : > { %s284_s23 = ssub.s32 (%p4458_p10), 5, %s2828_s18  ;;  %s4079_s13 = scalar_lea.sflag (%p4458_p10), [#allocation5], %s278_s30 }
  0x90   : > { %p285_p0 = scmp.lt.s32.totalorder (%p4458_p10), %s284_s23, 2  ;;  %s282_s24 = scalar_lea.vmem (%p4458_p10), [#allocation4], %s2827_s21 }
  0x94   : > { %s4474_s23 = smov (!%p285_p0, %s284_s23), 2 }
  0x95   : > { %s4076_s8 = sshll.u32 %s4474_s23, 6 }
  0x96   : > { %s289_s15 = ssub.s32 128, %s4076_s8 }
  0x97   : > { %290 = vsyncadd %s4079_s13, %s289_s15  ;;  %p2830_p12 = scmp.ne.s32.totalorder %s4076_s8, 0  ;;  %s2954_s10 = sshll.u32 %s3808_s27, 7 }
  0x98   : > { %s4087_s17 = scalar_lea.hbm %s4436_s0, %s2954_s10  ;;  %s295_s29 = sshll.u32 %s282_s24, 4  ;;  %s4089_s29 = int_to_ptr.vmem [resolvable:$true] %s295_s29 }
  0x99   : > { %s3674_s19 = scalar_lea.hbm %s4087_s17, %s4076_s8  ;;  %s3678_s27 = scalar_lea.hbm %s4436_s0, 320 }
  0x9a   : > { %p3675_p9 = scmp.ne.s32.totalorder %s4087_s17, %s3674_s19  ;;  %p3679_p6 = scmp.lt.u32.totalorder %s4087_s17, %s4436_s0 }
  0x9b   : > { %p3680_p7 = scmp.lt.u32.totalorder %s3678_s27, %s3674_s19  ;;  %p3682_p13 = scmp.lt.u32.totalorder %s3674_s19, %s4087_s17 }
  0x9c   : > { %p3676_p2 = pnand %p3675_p9, %p2830_p12 }
  0x9d   : > { %p3681_p11 = por %p3680_p7, %p3679_p6 }
  0x9e   : > { %p3677_p3 = pneg %p3676_p2 }
  0x9f   : > { %p3683_p1 = por %p3682_p13, %p3681_p11 }
  0xa1   : > { %p3684_p5 = pnand %p3683_p1, %p3677_p3 }
  0xa3   : > { %3687 = shalt.err (!%p3684_p5)
}
  0xa4   : > { %s3688_s18 = scalar_lea.vmem %s4089_s29, %s4076_s8  ;;  %s3817_s21 = smov [#allocation4]  }
  0xa5   : > { %p3689_p8 = scmp.ne.s32.totalorder %s4089_s29, %s3688_s18  ;;  %s3692_s23 = sshll.u32 %s3817_s21, 4  ;;  %s3693_s23 = int_to_ptr.vmem [resolvable:$false] %s3692_s23 }
  0xa6   : > { %s3694_s15 = scalar_lea.vmem %s3693_s23, 256  ;;  %p3695_p0 = scmp.lt.s32.totalorder %s4089_s29, %s3693_s23 }
  0xa7   : > { %p3690_p4 = pnand %p3689_p8, %p2830_p12  ;;  %p3696_p9 = scmp.lt.s32.totalorder %s3694_s15, %s3688_s18 }
  0xa9   : > { %p3691_p10 = pneg %p3690_p4  ;;  %p3697_p2 = por %p3696_p9, %p3695_p0 }
  0xab   : > { %p3698_p6 = pnand %p3697_p2, %p3691_p10 }
  0xad   : > { %3701 = shalt.err (!%p3698_p6)
}
  0xae   : > { %s3818_s24 = smov 64   ;;  %s3819_s10 = smov 4  }
  0xaf   : > { %301 = dma.hbm_to_vmem [thread:$0]  (%p2830_p12), %s4087_s17, %s4076_s8, %s4089_s29, %s4079_s13, %s3818_s24, %s3818_s24, %s3819_s10  }
  0xb0 PF: > { %p4459_p3 = scmp.ne.s32.totalorder %s4454_s12, 0 }
  0xb1   : > { %s309_s16 = sand.u32 (!%p4459_p3), 1, %s3800_s25   ;;  %p4460_p7 = scmp.ne.s32.totalorder (!%p4459_p3), %s4453_s11, 0 }
  0xb2   : > { %307 = sbr.rel (%p4459_p3) target bundleno = 9278 (0x243e), region = 44  ;;  %s2835_s14 = sshll.u32 (!%p4459_p3), %s309_s16, 3 }
  0xb3   : > { %s310_s19 = scalar_lea.sflag (!%p4459_p3), [#allocation5], %s309_s16  ;;  %s313_s20 = scalar_lea.vmem (!%p4459_p3), [#allocation4], %s2835_s14 }
  0xb9   : > { %3771 = dma.done.wait (%p4460_p7), %s310_s19, 128  }
  0xba   : > { %3773 = vsyncadd (%p4460_p7), %s310_s19, 4294967168  ;;  %p4461_p11 = scmp.eq.s32.totalorder %s3908_s28, 0 }
  0xbc   : > { %3775 = dma.done.wait (%p4461_p11), [#allocation8], 144   ;;  %p4462_p12 = pmov %p4461_p11 }
  0xbd   : > { %p4463_p13 = pmov %p4461_p11 }
  0xbe   : > { %3777 = vsyncadd (%p4462_p12), [#allocation8], 4294967152 }
  0xbf   : > { %3779 = dma.done.wait (%p4463_p13), [#allocation11], 768   ;;  %p4464_p1 = pmov %p4461_p11 }
  0xc1   : > { %3781 = vsyncadd (%p4464_p1), [#allocation11], 4294966528  ;;  %p4465_p5 = pmov %p4464_p1 }
  0xc2   : > { %p4466_p8 = pmov %p4464_p1 }
  0xc3   : > { %3783 = dma.done.wait (%p4465_p5), [#allocation14], 16  }
  0xc4   : > { %3785 = vsyncadd (%p4466_p8), [#allocation14], 4294967280  ;;  %p4467_p4 = scmp.ne.s32.totalorder %s3908_s28, 0 }
  0xc5   : > { %vm369_vm0 = vcmask (!%p4467_p4), 254976   ;;  %v3820_v0 = vmov (!%p4467_p4), 0.0  }
  0xc6   : > { %368 = sbr.rel (%p4467_p4) target bundleno = 205 (0xcd), region = 72  ;;  %370 = vst.msk [vmem:[#allocation2] sm:$0x3] (!%p4467_p4), %vm369_vm0, %v3820_v0  ;;  %371 = vst.msk [vmem:[#allocation2 + $0x2] sm:$0x3] (!%p4467_p4), %vm369_vm0, %v3820_v0 }
  0xc7   : > { %372 = vst.msk [vmem:[#allocation3] sm:$0x3] (!%p4467_p4), %vm369_vm0, %v3820_v0  ;;  %373 = vst.msk [vmem:[#allocation3 + $0x2] sm:$0x3] (!%p4467_p4), %vm369_vm0, %v3820_v0 }
  0xcd PF: > { %v3356_v1 = vld [vmem:[#allocation7] sm:$0xff]   ;;  %v3821_v2 = vmov 0.0   ;;  %v3357_v3 = vld [vmem:[#allocation10] sm:$0xff]   ;;  %vm3822_vm1 = vmmov 0   ;;  %vm396_vm2 = vcmask 130048   ;;  %v3359_v5 = vld [vmem:[#allocation10 + $0x8] sm:$0xff]  }
  0xce   : > { %3029 = vmatprep.subr.bf16.mxu0 %v3821_v2  ;;  %3035 = vmatprep.subr.bf16.mxu1 %v3821_v2  ;;  %v3358_v4 = vld [vmem:[%s313_s20] sm:$0xff]   ;;  %v441_v6 = vld [vmem:[#allocation2] sm:$0x3]  ;;  %vm459_vm3 = vcmask 261120   ;;  %s3823_s11 = smov 64   ;;  %s3824_s12 = smov 32  }
  0xcf   : > { %3030 = vmatpush3.bf16.msra.mxu0 %v3356_v1  ;;  %3031 = vmatprep.mubr.msk.bf16.mxu0 %vm3822_vm1, %v3821_v2  ;;  %v442_v7 = vpack.c.bf16 %v441_v6, %v441_v6  ;;  %v2842_v8 = vld [vmem:[#allocation9] ss:$0 sm:$0xff]  ;;  %v574_v21 = vld [vmem:[#allocation3] sm:$0x3]  ;;  %v3360_v32 = vld [vmem:[#allocation10 + $0x10] sm:$0xff]   ;;  %s3825_s8 = smov 96  }
  0xd0   : > { %3036 = vmatpush3.bf16.msra.mxu1 %v3357_v3  ;;  %3039 = vmatprep.mubr.msk.bf16.mxu1 %vm3822_vm1, %v3821_v2  ;;  %v3361_v33 = vld [vmem:[#allocation12] sm:$0xff]   ;;  %v3362_v34 = vld [vmem:[#allocation10 + $0x18] sm:$0xff]   ;;  %v3363_v36 = vld [vmem:[#allocation12 + $0x8] sm:$0xff]   ;;  %vm600_vm4 = vcmask 254976   ;;  %vm878_vm5 = vcmask 257026   ;;  %vm1156_vm6 = vcmask 259076  }
  0xd1   : > { %3037 = vmatprep.subr.bf16.mxu1 %v3821_v2  ;;  %3043 = vmatprep.subr.bf16.mxu0 %v3821_v2  ;;  %v504_v35 = vld [vmem:[#allocation2 + $0x2] sm:$0x3]  ;;  %v3365_v40 = vld [vmem:[#allocation10 + $0x8] sm:$0xff]   ;;  %v4180_v54 = vld [vmem:[#allocation13] ss:$0 sm:$0xff]  ;;  %vm1434_vm7 = vcmask 261126  }
  0xd2   : > { %3032 = vmatmul.mubr.msk.bf16.vlgmr.msra.gmra.mrb[0].mxu0 %vm396_vm2, %v3358_v4  ;;  %v505_v37 = vpack.c.bf16 %v504_v35, %v504_v35  ;;  %v3364_v39 = vld [vmem:[#allocation10] sm:$0xff]   ;;  %v3369_v35 = vld [vmem:[#allocation12 + $0x8] sm:$0xff]   ;;  %s4283_s13 = sshll.u32 %s3908_s28, 3 }
  0xd3   : > { %3047 = vmatprep.mubr.msk.bf16.mxu0 %vm3822_vm1, %v3821_v2  ;;  %3044 = vmatpush3.bf16.msra.mxu0 %v3360_v32  ;;  %v686_v4 = vld [vmem:[#allocation3 + $0x2] sm:$0x3]  ;;  %v3366_v32 = vld [vmem:[#allocation10 + $0x10] sm:$0xff]   ;;  %s1553_s17 = sadd.s32 4, %s4283_s13 }
  0xd4   : > { %3038 = vmatpush3.bf16.msra.mxu1 %v3359_v5  ;;  %3045 = vmatprep.subr.bf16.mxu0 %v3821_v2  ;;  %p2895_p10 = scmp.ge.s32.totalorder %s1553_s17, 20 }
  0xd5   : > { %3051 = vmatprep.subr.bf16.mxu1 %v3821_v2  ;;  %vm3827_vm8 = vmmov (!%p2895_p10), 0   ;;  %s3828_s29 = smov (!%p2895_p10), 64   ;;  %s3829_s22 = smov (!%p2895_p10), 32  }
  0xd6   : > { %s3830_s27 = smov (!%p2895_p10), 96  }
  0xd7   : > { %3040 = vmatmul.mubr.msk.bf16.vlgmr.msra.gmra.mrb[0].mxu1 %vm459_vm3, %v442_v7  ;;  %3046 = vmatpush3.bf16.msra.mxu0 %v3362_v34  ;;  %v3368_v34 = vld [vmem:[#allocation10 + $0x18] sm:$0xff]  }
  0xd8   : > { %3055 = vmatprep.mubr.msk.bf16.mxu1 %vm3822_vm1, %v3821_v2  ;;  %3052 = vmatpush3.bf16.msra.mxu1 %v3361_v33  ;;  %v3367_v33 = vld [vmem:[#allocation12] sm:$0xff]  }
  0xd9   : > { %3053 = vmatprep.subr.bf16.mxu1 %v3821_v2  ;;  %3059 = vmatprep.subr.bf16.mxu0 %v3821_v2 }
  0xda   : > { %3048 = vmatmul.mubr.msk.bf16.vlgmr.msra.gmra.mrb[4].mxu0 %vm459_vm3, %v505_v37 }
  0xdb   : > { %3063 = vmatprep.mubr.msk.bf16.mxu0 %vm3822_vm1, %v3821_v2  ;;  %3060 = vmatpush3.bf16.msra.mxu0 %v3364_v39 }
  0xdc   : > { %3054 = vmatpush3.bf16.msra.mxu1 %v3363_v36  ;;  %3061 = vmatprep.subr.bf16.mxu0 %v3821_v2 }
  0xdd   : > { %3067 = vmatprep.subr.bf16.mxu1 %v3821_v2 }
  0xdf   : > { %3062 = vmatpush3.bf16.msra.mxu0 %v3365_v40 }
  0xe0   : > { %3075 = vmatprep.subr.bf16.mxu0 %v3821_v2 }
 0x1a5   : > { %v434_v9 = vpop.f32.mrb[0].mxu0 }
 0x1a6   : > { %v3033_v10 = vpop.f32.mrb[1].mxu0  ;;  %v4151_v11 = vadd.f32 %v2842_v8, %v434_v9 }
 0x1a7   : > { %v437_v12 = vpop.f32.mrb[2].mxu0 }
 0x1a8   : > { %v4153_v13 = vadd.f32 %v2842_v8, %v437_v12  ;;  %v3034_v14 = vpop.f32.mrb[3].mxu0 }
 0x1aa   : > { %v497_v15 = vpop.f32.mrb[0].mxu1 }
 0x1ab   : > { %v566_v16 = vadd.f32 %v497_v15, %v4151_v11  ;;  %v3041_v17 = vpop.f32.mrb[1].mxu1 }
 0x1ac   : > { %v500_v18 = vpop.f32.mrb[2].mxu1 }
 0x1ad   : > { %3382 = vtanh.f32 %v566_v16  ;;  %v3042_v19 = vpop.f32.mrb[3].mxu1  ;;  %v2852_v22 = vmul.f32 -1.442695, %v566_v16  ;;  %v560_v44 = vpop.f32.mrb[4].mxu0 }
 0x1ae   : > { %v3049_v45 = vpop.f32.mrb[5].mxu0 }
 0x1af   : > { %3384 = vpow2.f32 %v2852_v22  ;;  %v563_v46 = vpop.f32.mrb[6].mxu0  ;;  %v3370_v45 = vld [vmem:[#allocation10] sm:$0xff]  }
 0x1b0   : > { %v3050_v47 = vpop.f32.mrb[7].mxu0 }
 0x1b7   : > { %v3383_v20 = vpop.eup %3382 }
 0x1b8   : > { %581 = vrot.lane.b32.xlu0 %v3383_v20, %s3823_s11 }
 0x1b9   : > { %v3385_v23 = vpop.eup %3384 }
 0x1ba   : > { %v570_v24 = vadd.f32 1.0, %v3385_v23 }
 0x1bc   : > { %576 = vrot.lane.b32.xlu0 %v574_v21, %s3824_s12  ;;  %3386 = vrcp.f32 %v570_v24 }
 0x1c6   : > { %v3387_v25 = vpop.eup %3386 }
 0x22a   : > { %v582_v26 = vpop.permute.xlu0 %581 }
 0x22b   : > { %v584_v27 = vmul.f32 %v3387_v25, %v582_v26 }
 0x22d   : > { %586 = vrot.lane.b32.xlu1 %v584_v27, %s3824_s12 }
 0x22e   : > { %v577_v28 = vpop.permute.xlu0 %576 }
 0x22f   : > { %v579_v29 = vmul.f32 %v3387_v25, %v577_v28 }
 0x29f   : > { %v587_v30 = vpop.permute.xlu1 %586 }
 0x2a0   : > { %v589_v31 = vadd.f32 %v587_v30, %v579_v29 }
 0x2a2   : > { %3388 = vtanh.f32 %v589_v31 }
 0x2ac   : > { %v3389_v38 = vpop.eup %3388 }
 0x2ad   : > { %592 = vrot.lane.b32.xlu1 %v3389_v38, %s3823_s11 }
 0x31f   : > { %v593_v41 = vpop.permute.xlu1 %592 }
 0x320   : > { %v595_v42 = vmul.f32 %v3387_v25, %v593_v41 }
 0x322   : > { %v607_v43 = vpack.c.bf16 %v595_v42, %v595_v42  ;;  %597 = vrot.lane.b32.xlu0 %v595_v42, %s3824_s12 }
 0x324   : > { %613 = vrot.lane.b32.xlu1 %v607_v43, %s3824_s12 }
 0x326   : > { %603 = vrot.lane.b32.xlu0 %v589_v31, %s3825_s8 }
 0x394   : > { %v598_v48 = vpop.permute.xlu0 %597 }
 0x395   : > { %601 = vst.msk [vmem:[#allocation2] sm:$0x3] %vm600_vm4, %v598_v48 }
 0x396   : > { %v614_v49 = vpop.permute.xlu1 %613 }
 0x397   : > { %3056 = vmatmul.mubr.msk.bf16.vlgmr.msra.gmra.mrb[4].mxu1 %vm459_vm3, %v614_v49  ;;  %v3371_v49 = vld [vmem:[#allocation10 + $0x8] sm:$0xff]  }
 0x398   : > { %v604_v50 = vpop.permute.xlu0 %603  ;;  %3071 = vmatprep.mubr.msk.bf16.mxu1 %vm3822_vm1, %v3821_v2  ;;  %3068 = vmatpush3.bf16.msra.mxu1 %v3366_v32 }
 0x399   : > { %606 = vst.msk [vmem:[#allocation3] sm:$0x3] %vm600_vm4, %v604_v50  ;;  %3069 = vmatprep.subr.bf16.mxu1 %v3821_v2 }
 0x39c   : > { %v718_v51 = vld [vmem:[#allocation2] sm:$0x3]  ;;  %3070 = vmatpush3.bf16.msra.mxu1 %v3368_v34 }
 0x39d   : > { %v719_v52 = vpack.c.bf16 %v718_v51, %v718_v51  ;;  %3083 = vmatprep.subr.bf16.mxu1 %v3821_v2 }
 0x39f   : > { %3064 = vmatmul.mubr.msk.bf16.vlgmr.msra.gmra.mrb[8].mxu0 %vm459_vm3, %v719_v52 }
 0x3a0   : > { %3079 = vmatprep.mubr.msk.bf16.mxu0 %vm3822_vm1, %v3821_v2  ;;  %v851_v5 = vld [vmem:[#allocation3] sm:$0x3]  ;;  %3076 = vmatpush3.bf16.msra.mxu0 %v3367_v33 }
 0x3a1   : > { %v853_v6 = vrot.slane %v851_v5, 6  ;;  %3077 = vmatprep.subr.bf16.mxu0 %v3821_v2 }
 0x3a4   : > { %3078 = vmatpush3.bf16.msra.mxu0 %v3369_v35 }
 0x3a5   : > { %3091 = vmatprep.subr.bf16.mxu0 %v3821_v2 }
 0x46a   : > { %v664_v53 = vpop.f32.mrb[4].mxu1 }
 0x46b   : > { %v665_v55 = vadd.f32 %v664_v53, %v560_v44  ;;  %v3057_v56 = vpop.f32.mrb[5].mxu1 }
 0x46c   : > { %v667_v57 = vpop.f32.mrb[6].mxu1 }
 0x46d   : > { %v677_v58 = vadd.f32 %v4180_v54, %v665_v55  ;;  %v3058_v59 = vpop.f32.mrb[7].mxu1 }
 0x46f   : > { %3390 = vtanh.f32 %v677_v58  ;;  %v2857_v8 = vmul.f32 -1.442695, %v677_v58 }
 0x472   : > { %v773_v60 = vpop.f32.mrb[8].mxu0 }
 0x473   : > { %v841_v61 = vrot.slane %v773_v60, 6  ;;  %v3065_v62 = vpop.f32.mrb[9].mxu0 }
 0x474   : > { %v776_v63 = vpop.f32.mrb[10].mxu0 }
 0x475   : > { %v843_v0 = vadd.f32 %v841_v61, %v4151_v11  ;;  %v3066_v1 = vpop.f32.mrb[11].mxu0 }
 0x477   : > { %3392 = vtanh.f32 %v843_v0  ;;  %v2864_v9 = vmul.f32 -1.442695, %v843_v0 }
 0x478   : > { %3394 = vpow2.f32 %v2857_v8 }
 0x479   : > { %v3391_v3 = vpop.eup %3390  ;;  %3396 = vpow2.f32 %v2864_v9 }
 0x47a   : > { %693 = vrot.lane.b32.xlu1 %v3391_v3, %s3823_s11 }
 0x47e   : > { %688 = vrot.lane.b32.xlu1 %v686_v4, %s3824_s12 }
 0x481   : > { %v3393_v7 = vpop.eup %3392 }
 0x482   : > { %854 = vrot.lane.b32.xlu1 %v853_v6, %s3824_s12  ;;  %859 = vrot.lane.b32.xlu0 %v3393_v7, %s3823_s11  ;;  %v3395_v10 = vpop.eup %3394 }
 0x483   : > { %v681_v12 = vadd.f32 1.0, %v3395_v10  ;;  %v3397_v14 = vpop.eup %3396 }
 0x484   : > { %v847_v15 = vadd.f32 1.0, %v3397_v14 }
 0x485   : > { %3398 = vrcp.f32 %v681_v12 }
 0x486   : > { %3400 = vrcp.f32 %v847_v15 }
 0x48f   : > { %v3399_v16 = vpop.eup %3398 }
 0x490   : > { %v3401_v19 = vpop.eup %3400 }
 0x4ec   : > { %v694_v17 = vpop.permute.xlu1 %693 }
 0x4ed   : > { %v696_v18 = vmul.f32 %v3399_v16, %v694_v17 }
 0x4ef   : > { %698 = vrot.lane.b32.xlu0 %v696_v18, %s3824_s12 }
 0x4f0   : > { %v689_v22 = vpop.permute.xlu1 %688 }
 0x4f1   : > { %v691_v23 = vmul.f32 %v3399_v16, %v689_v22 }
 0x4f4   : > { %v860_v20 = vpop.permute.xlu0 %859  ;;  %v855_v26 = vpop.permute.xlu1 %854 }
 0x4f5   : > { %v862_v21 = vmul.f32 %v3401_v19, %v860_v20  ;;  %v857_v27 = vmul.f32 %v3401_v19, %v855_v26 }
 0x4f7   : > { %864 = vrot.lane.b32.xlu0 %v862_v21, %s3824_s12 }
 0x561   : > { %v699_v24 = vpop.permute.xlu0 %698 }
 0x562   : > { %v701_v25 = vadd.f32 %v699_v24, %v691_v23 }
 0x564   : > { %3402 = vtanh.f32 %v701_v25 }
 0x569   : > { %v865_v28 = vpop.permute.xlu0 %864 }
 0x56a   : > { %v867_v29 = vadd.f32 %v865_v28, %v857_v27 }
 0x56c   : > { %3404 = vtanh.f32 %v867_v29 }
 0x56e   : > { %v3403_v30 = vpop.eup %3402 }
 0x56f   : > { %704 = vrot.lane.b32.xlu1 %v3403_v30, %s3823_s11 }
 0x576   : > { %v3405_v31 = vpop.eup %3404 }
 0x577   : > { %870 = vrot.lane.b32.xlu0 %v3405_v31, %s3823_s11 }
 0x5e1   : > { %v705_v36 = vpop.permute.xlu1 %704 }
 0x5e2   : > { %v707_v37 = vmul.f32 %v3399_v16, %v705_v36  ;;  %v3372_v36 = vld [vmem:[#allocation10 + $0x10] sm:$0xff]  }
 0x5e4   : > { %709 = vrot.lane.b32.xlu1 %v707_v37, %s3824_s12  ;;  %v3373_v37 = vld [vmem:[#allocation12] sm:$0xff]  }
 0x5e9   : > { %v871_v38 = vpop.permute.xlu0 %870 }
 0x5ea   : > { %v873_v39 = vmul.f32 %v3401_v19, %v871_v38  ;;  %v3374_v38 = vld [vmem:[#allocation10 + $0x18] sm:$0xff]  }
 0x5ec   : > { %v885_v40 = vpack.c.bf16 %v873_v39, %v873_v39  ;;  %875 = vrot.lane.b32.xlu0 %v873_v39, %s3824_s12  ;;  %v3375_v39 = vld [vmem:[#allocation12 + $0x8] sm:$0xff]  }
 0x5ee   : > { %v891_v41 = vrot.slane %v885_v40, 1 }
 0x5f0   : > { %714 = vrot.lane.b32.xlu0 %v701_v25, %s3825_s8  ;;  %892 = vrot.lane.b32.xlu1 %v891_v41, %s3824_s12 }
 0x5f4   : > { %881 = vrot.lane.b32.xlu1 %v867_v29, %s3825_s8 }
 0x656   : > { %v710_v42 = vpop.permute.xlu1 %709 }
 0x657   : > { %712 = vst.msk [vmem:[#allocation2 + $0x2] sm:$0x3] %vm600_vm4, %v710_v42 }
 0x65e   : > { %v876_v43 = vpop.permute.xlu0 %875  ;;  %v779_v44 = vld [vmem:[#allocation2 + $0x2] sm:$0x3] }
 0x65f   : > { %879 = vst.msk [vmem:[#allocation2 - $0x2] sm:$0xc] %vm878_vm5, %v876_v43  ;;  %v780_v46 = vpack.c.bf16 %v779_v44, %v779_v44 }
 0x661   : > { %3072 = vmatmul.mubr.msk.bf16.vlgmr.msra.gmra.mrb[8].mxu1 %vm459_vm3, %v780_v46 }
 0x662   : > { %3084 = vmatpush3.bf16.msra.mxu1 %v3370_v45  ;;  %v715_v47 = vpop.permute.xlu0 %714  ;;  %v893_v48 = vpop.permute.xlu1 %892  ;;  %3087 = vmatprep.mubr.msk.bf16.mxu1 %vm3822_vm1, %v3821_v2 }
 0x663   : > { %717 = vst.msk [vmem:[#allocation3 + $0x2] sm:$0x3] %vm600_vm4, %v715_v47  ;;  %3080 = vmatmul.mubr.msk.bf16.vlgmr.msra.gmra.mrb[12].mxu0 %vm459_vm3, %v893_v48  ;;  %3085 = vmatprep.subr.bf16.mxu1 %v3821_v2 }
 0x664   : > { %3095 = vmatprep.mubr.msk.bf16.mxu0 %vm3822_vm1, %v3821_v2  ;;  %3092 = vmatpush3.bf16.msra.mxu0 %v3372_v36 }
 0x665   : > { %3093 = vmatprep.subr.bf16.mxu0 %v3821_v2 }
 0x666   : > { %3086 = vmatpush3.bf16.msra.mxu1 %v3371_v49  ;;  %v882_v50 = vpop.permute.xlu1 %881  ;;  %v996_v51 = vld [vmem:[#allocation2] sm:$0x3]  ;;  %v3376_v49 = vld [vmem:[#allocation10] sm:$0xff]  }
 0x667   : > { %884 = vst.msk [vmem:[#allocation3 - $0x2] sm:$0xc] %vm878_vm5, %v882_v50  ;;  %v997_v52 = vpack.c.bf16 %v996_v51, %v996_v51  ;;  %3099 = vmatprep.subr.bf16.mxu1 %v3821_v2 }
 0x668   : > { %3094 = vmatpush3.bf16.msra.mxu0 %v3374_v38 }
 0x669   : > { %3088 = vmatmul.mubr.msk.bf16.vlgmr.msra.gmra.mrb[12].mxu1 %vm459_vm3, %v997_v52  ;;  %3107 = vmatprep.subr.bf16.mxu0 %v3821_v2 }
 0x66a   : > { %3103 = vmatprep.mubr.msk.bf16.mxu1 %vm3822_vm1, %v3821_v2  ;;  %v964_v8 = vld [vmem:[#allocation3 + $0x2] sm:$0x3]  ;;  %3100 = vmatpush3.bf16.msra.mxu1 %v3373_v37 }
 0x66b   : > { %3101 = vmatprep.subr.bf16.mxu1 %v3821_v2 }
 0x66e   : > { %v1129_v9 = vld [vmem:[#allocation3] sm:$0x3]  ;;  %3102 = vmatpush3.bf16.msra.mxu1 %v3375_v39  ;;  %v3378_v39 = vld [vmem:[#allocation10 + $0x10] sm:$0xff]  }
 0x66f   : > { %v1131_v12 = vrot.slane %v1129_v9, 4  ;;  %3115 = vmatprep.subr.bf16.mxu1 %v3821_v2 }
 0x734   : > { %v834_v53 = vpop.f32.mrb[8].mxu1 }
 0x735   : > { %v3073_v55 = vpop.f32.mrb[9].mxu1 }
 0x736   : > { %v837_v56 = vpop.f32.mrb[10].mxu1  ;;  %v943_v57 = vpop.f32.mrb[12].mxu0 }
 0x737   : > { %v944_v58 = vadd.f32 %v943_v57, %v834_v53  ;;  %v3074_v59 = vpop.f32.mrb[11].mxu1  ;;  %v3081_v60 = vpop.f32.mrb[13].mxu0  ;;  %v3377_v53 = vld [vmem:[#allocation10 + $0x8] sm:$0xff]  }
 0x738   : > { %v946_v61 = vpop.f32.mrb[14].mxu0 }
 0x739   : > { %v956_v62 = vadd.f32 %v4180_v54, %v944_v58  ;;  %v3082_v63 = vpop.f32.mrb[15].mxu0 }
 0x73b   : > { %3406 = vtanh.f32 %v956_v62  ;;  %v2869_v14 = vmul.f32 -1.442695, %v956_v62 }
 0x73c   : > { %v1051_v0 = vpop.f32.mrb[12].mxu1 }
 0x73d   : > { %v1119_v1 = vrot.slane %v1051_v0, 4  ;;  %v3089_v3 = vpop.f32.mrb[13].mxu1 }
 0x73e   : > { %v1054_v4 = vpop.f32.mrb[14].mxu1 }
 0x73f   : > { %v1121_v5 = vadd.f32 %v1119_v1, %v4151_v11  ;;  %v3090_v6 = vpop.f32.mrb[15].mxu1 }
 0x741   : > { %3408 = vtanh.f32 %v1121_v5  ;;  %v2876_v15 = vmul.f32 -1.442695, %v1121_v5 }
 0x742   : > { %3410 = vpow2.f32 %v2869_v14 }
 0x743   : > { %3412 = vpow2.f32 %v2876_v15 }
 0x745   : > { %v3407_v7 = vpop.eup %3406 }
 0x746   : > { %971 = vrot.lane.b32.xlu0 %v3407_v7, %s3823_s11 }
 0x74a   : > { %966 = vrot.lane.b32.xlu0 %v964_v8, %s3824_s12 }
 0x74b   : > { %v3409_v10 = vpop.eup %3408 }
 0x74c   : > { %1137 = vrot.lane.b32.xlu1 %v3409_v10, %s3823_s11  ;;  %v3411_v16 = vpop.eup %3410 }
 0x74d   : > { %v960_v17 = vadd.f32 1.0, %v3411_v16  ;;  %v3413_v18 = vpop.eup %3412 }
 0x74e   : > { %1132 = vrot.lane.b32.xlu0 %v1131_v12, %s3824_s12  ;;  %v1125_v19 = vadd.f32 1.0, %v3413_v18 }
 0x74f   : > { %3414 = vrcp.f32 %v960_v17 }
 0x750   : > { %3416 = vrcp.f32 %v1125_v19 }
 0x759   : > { %v3415_v20 = vpop.eup %3414 }
 0x75a   : > { %v3417_v23 = vpop.eup %3416 }
 0x7b8   : > { %v972_v21 = vpop.permute.xlu0 %971 }
 0x7b9   : > { %v974_v22 = vmul.f32 %v3415_v20, %v972_v21 }
 0x7bb   : > { %976 = vrot.lane.b32.xlu1 %v974_v22, %s3824_s12 }
 0x7bc   : > { %v967_v26 = vpop.permute.xlu0 %966 }
 0x7bd   : > { %v969_v27 = vmul.f32 %v3415_v20, %v967_v26 }
 0x7be   : > { %v1138_v24 = vpop.permute.xlu1 %1137 }
 0x7bf   : > { %v1140_v25 = vmul.f32 %v3417_v23, %v1138_v24 }
 0x7c0   : > { %v1133_v30 = vpop.permute.xlu0 %1132 }
 0x7c1   : > { %1142 = vrot.lane.b32.xlu1 %v1140_v25, %s3824_s12  ;;  %v1135_v31 = vmul.f32 %v3417_v23, %v1133_v30 }
 0x82d   : > { %v977_v28 = vpop.permute.xlu1 %976 }
 0x82e   : > { %v979_v29 = vadd.f32 %v977_v28, %v969_v27 }
 0x830   : > { %3418 = vtanh.f32 %v979_v29 }
 0x833   : > { %v1143_v32 = vpop.permute.xlu1 %1142 }
 0x834   : > { %v1145_v33 = vadd.f32 %v1143_v32, %v1135_v31 }
 0x836   : > { %3420 = vtanh.f32 %v1145_v33 }
 0x83a   : > { %v3419_v34 = vpop.eup %3418 }
 0x83b   : > { %982 = vrot.lane.b32.xlu0 %v3419_v34, %s3823_s11 }
 0x840   : > { %v3421_v35 = vpop.eup %3420 }
 0x841   : > { %1148 = vrot.lane.b32.xlu1 %v3421_v35, %s3823_s11 }
 0x8ad   : > { %v983_v40 = vpop.permute.xlu0 %982 }
 0x8ae   : > { %v985_v41 = vmul.f32 %v3415_v20, %v983_v40  ;;  %v3379_v40 = vld [vmem:[#allocation12] sm:$0xff]  }
 0x8b0   : > { %987 = vrot.lane.b32.xlu0 %v985_v41, %s3824_s12  ;;  %v3380_v41 = vld [vmem:[#allocation10 + $0x18] sm:$0xff]  }
 0x8b3   : > { %v1149_v42 = vpop.permute.xlu1 %1148 }
 0x8b4   : > { %v1151_v43 = vmul.f32 %v3417_v23, %v1149_v42  ;;  %v3381_v42 = vld [vmem:[#allocation12 + $0x8] sm:$0xff]  }
 0x8b6   : > { %v1163_v44 = vpack.c.bf16 %v1151_v43, %v1151_v43  ;;  %1153 = vrot.lane.b32.xlu1 %v1151_v43, %s3824_s12 }
 0x8b8   : > { %v1169_v45 = vrot.slane %v1163_v44, 2 }
 0x8ba   : > { %992 = vrot.lane.b32.xlu1 %v979_v29, %s3825_s8  ;;  %1170 = vrot.lane.b32.xlu0 %v1169_v45, %s3824_s12 }
 0x8be   : > { %1159 = vrot.lane.b32.xlu0 %v1145_v33, %s3825_s8 }
 0x922   : > { %v988_v46 = vpop.permute.xlu0 %987 }
 0x923   : > { %990 = vst.msk [vmem:[#allocation2 + $0x2] sm:$0x3] %vm600_vm4, %v988_v46 }
 0x928   : > { %v1154_v47 = vpop.permute.xlu1 %1153 }
 0x929   : > { %1157 = vst.msk [vmem:[#allocation2 - $0x4] sm:$0x30] %vm1156_vm6, %v1154_v47 }
 0x92a   : > { %v1057_v48 = vld [vmem:[#allocation2 + $0x2] sm:$0x3] }
 0x92b   : > { %v1058_v50 = vpack.c.bf16 %v1057_v48, %v1057_v48 }
 0x92c   : > { %v993_v51 = vpop.permute.xlu1 %992  ;;  %v1171_v52 = vpop.permute.xlu0 %1170 }
 0x92d   : > { %995 = vst.msk [vmem:[#allocation3 + $0x2] sm:$0x3] %vm600_vm4, %v993_v51  ;;  %3096 = vmatmul.mubr.msk.bf16.vlgmr.msra.gmra.mrb[16].mxu0 %vm459_vm3, %v1058_v50  ;;  %3104 = vmatmul.mubr.msk.bf16.vlgmr.msra.gmra.mrb[16].mxu1 %vm459_vm3, %v1171_v52 }
 0x92e   : > { %3108 = vmatpush3.bf16.msra.mxu0 %v3376_v49  ;;  %3111 = vmatprep.mubr.msk.bf16.mxu0 %vm3822_vm1, %v3821_v2 }
 0x92f   : > { %3109 = vmatprep.subr.bf16.mxu0 %v3821_v2  ;;  %3119 = vmatprep.mubr.msk.bf16.mxu1 %vm3822_vm1, %v3821_v2 }
 0x930   : > { %v1160_v55 = vpop.permute.xlu0 %1159  ;;  %v1274_v56 = vld [vmem:[#allocation2] sm:$0x3]  ;;  %3116 = vmatpush3.bf16.msra.mxu1 %v3378_v39 }
 0x931   : > { %1162 = vst.msk [vmem:[#allocation3 - $0x4] sm:$0x30] %vm1156_vm6, %v1160_v55  ;;  %v1275_v57 = vpack.c.bf16 %v1274_v56, %v1274_v56  ;;  %3117 = vmatprep.subr.bf16.mxu1 %v3821_v2 }
 0x932   : > { %3110 = vmatpush3.bf16.msra.mxu0 %v3377_v53 }
 0x933   : > { %3123 = vmatprep.subr.bf16.mxu0 %v3821_v2 }
 0x934   : > { %v1242_v14 = vld [vmem:[#allocation3 + $0x2] sm:$0x3]  ;;  %3118 = vmatpush3.bf16.msra.mxu1 %v3380_v41 }
 0x935   : > { %3112 = vmatmul.mubr.msk.bf16.vlgmr.msra.gmra.mrb[20].mxu0 %vm459_vm3, %v1275_v57 }
 0x936   : > { %3127 = vmatprep.mubr.msk.bf16.mxu0 %vm3822_vm1, %v3821_v2  ;;  %3124 = vmatpush3.bf16.msra.mxu0 %v3379_v40 }
 0x937   : > { %3125 = vmatprep.subr.bf16.mxu0 %v3821_v2 }
 0x938   : > { %v1407_v15 = vld [vmem:[#allocation3] sm:$0x3] }
 0x939   : > { %v1409_v16 = vrot.slane %v1407_v15, 2 }
 0x93a   : > { %3126 = vmatpush3.bf16.msra.mxu0 %v3381_v42  ;;  %v3448_v42 = vld [vmem:[#allocation10 + $0x10] sm:$0xff] (!%p2895_p10)  }
 0xa00   : > { %v1112_v58 = vpop.f32.mrb[16].mxu0  ;;  %v1221_v59 = vpop.f32.mrb[16].mxu1 }
 0xa01   : > { %v1222_v60 = vadd.f32 %v1221_v59, %v1112_v58  ;;  %v3097_v61 = vpop.f32.mrb[17].mxu0  ;;  %v3105_v62 = vpop.f32.mrb[17].mxu1 }
 0xa02   : > { %v1115_v63 = vpop.f32.mrb[18].mxu0  ;;  %v1224_v0 = vpop.f32.mrb[18].mxu1 }
 0xa03   : > { %v1234_v1 = vadd.f32 %v4180_v54, %v1222_v60  ;;  %v3098_v3 = vpop.f32.mrb[19].mxu0  ;;  %v3106_v4 = vpop.f32.mrb[19].mxu1 }
 0xa05   : > { %3422 = vtanh.f32 %v1234_v1  ;;  %v2881_v18 = vmul.f32 -1.442695, %v1234_v1 }
 0xa08   : > { %v1329_v5 = vpop.f32.mrb[20].mxu0 }
 0xa09   : > { %v1397_v6 = vrot.slane %v1329_v5, 2  ;;  %v3113_v7 = vpop.f32.mrb[21].mxu0 }
 0xa0a   : > { %v1332_v8 = vpop.f32.mrb[22].mxu0 }
 0xa0b   : > { %v1399_v9 = vadd.f32 %v1397_v6, %v4151_v11  ;;  %v3114_v10 = vpop.f32.mrb[23].mxu0 }
 0xa0d   : > { %3424 = vtanh.f32 %v1399_v9  ;;  %v2888_v19 = vmul.f32 -1.442695, %v1399_v9 }
 0xa0e   : > { %3426 = vpow2.f32 %v2881_v18 }
 0xa0f   : > { %v3423_v12 = vpop.eup %3422  ;;  %3428 = vpow2.f32 %v2888_v19 }
 0xa10   : > { %1249 = vrot.lane.b32.xlu1 %v3423_v12, %s3823_s11 }
 0xa14   : > { %1244 = vrot.lane.b32.xlu1 %v1242_v14, %s3824_s12 }
 0xa17   : > { %v3425_v17 = vpop.eup %3424 }
 0xa18   : > { %1410 = vrot.lane.b32.xlu1 %v1409_v16, %s3824_s12  ;;  %1415 = vrot.lane.b32.xlu0 %v3425_v17, %s3823_s11  ;;  %v3427_v11 = vpop.eup %3426 }
 0xa19   : > { %v1238_v20 = vadd.f32 1.0, %v3427_v11  ;;  %v3429_v21 = vpop.eup %3428 }
 0xa1a   : > { %v1403_v22 = vadd.f32 1.0, %v3429_v21  ;;  %v3826_v21 = vmov (!%p2895_p10), 0.0  }
 0xa1b   : > { %3430 = vrcp.f32 %v1238_v20  ;;  %v3446_v20 = vld [vmem:[#allocation10] sm:$0xff] (!%p2895_p10)   ;;  %3131 = vmatprep.subr.bf16.mxu0 (!%p2895_p10), %v3826_v21  ;;  %3139 = vmatprep.subr.bf16.mxu1 (!%p2895_p10), %v3826_v21 }
 0xa1c   : > { %3432 = vrcp.f32 %v1403_v22  ;;  %v3447_v22 = vld [vmem:[#allocation10 + $0x8] sm:$0xff] (!%p2895_p10)  }
 0xa25   : > { %v3431_v23 = vpop.eup %3430 }
 0xa26   : > { %v3433_v26 = vpop.eup %3432 }
 0xa82   : > { %v1250_v24 = vpop.permute.xlu1 %1249 }
 0xa83   : > { %v1252_v25 = vmul.f32 %v3431_v23, %v1250_v24 }
 0xa85   : > { %1254 = vrot.lane.b32.xlu0 %v1252_v25, %s3824_s12 }
 0xa86   : > { %v1245_v29 = vpop.permute.xlu1 %1244 }
 0xa87   : > { %v1247_v30 = vmul.f32 %v3431_v23, %v1245_v29 }
 0xa8a   : > { %v1416_v27 = vpop.permute.xlu0 %1415  ;;  %v1411_v33 = vpop.permute.xlu1 %1410 }
 0xa8b   : > { %v1418_v28 = vmul.f32 %v3433_v26, %v1416_v27  ;;  %v1413_v34 = vmul.f32 %v3433_v26, %v1411_v33 }
 0xa8d   : > { %1420 = vrot.lane.b32.xlu0 %v1418_v28, %s3824_s12 }
 0xaf7   : > { %v1255_v31 = vpop.permute.xlu0 %1254 }
 0xaf8   : > { %v1257_v32 = vadd.f32 %v1255_v31, %v1247_v30 }
 0xafa   : > { %3434 = vtanh.f32 %v1257_v32 }
 0xaff   : > { %v1421_v35 = vpop.permute.xlu0 %1420 }
 0xb00   : > { %v4258_v36 = vadd.f32 %v1421_v35, %v1413_v34 }
 0xb02   : > { %3436 = vtanh.f32 %v4258_v36 }
 0xb04   : > { %v3435_v37 = vpop.eup %3434 }
 0xb05   : > { %1260 = vrot.lane.b32.xlu1 %v3435_v37, %s3823_s11 }
 0xb0c   : > { %v3437_v38 = vpop.eup %3436 }
 0xb0d   : > { %1426 = vrot.lane.b32.xlu0 %v3437_v38, %s3823_s11 }
 0xb77   : > { %v1261_v43 = vpop.permute.xlu1 %1260 }
 0xb78   : > { %v1263_v44 = vmul.f32 %v3431_v23, %v1261_v43  ;;  %v3449_v43 = vld [vmem:[#allocation12] sm:$0xff] (!%p2895_p10)  }
 0xb7a   : > { %1265 = vrot.lane.b32.xlu1 %v1263_v44, %s3824_s12  ;;  %v3450_v44 = vld [vmem:[#allocation10 + $0x18] sm:$0xff] (!%p2895_p10)  }
 0xb7e   : > { %1270 = vrot.lane.b32.xlu1 %v1257_v32, %s3825_s8 }
 0xb7f   : > { %v1427_v45 = vpop.permute.xlu0 %1426 }
 0xb80   : > { %v1429_v46 = vmul.f32 %v3433_v26, %v1427_v45  ;;  %v3451_v45 = vld [vmem:[#allocation12 + $0x8] sm:$0xff] (!%p2895_p10)  }
 0xb82   : > { %v1441_v47 = vpack.c.bf16 %v1429_v46, %v1429_v46 }
 0xb84   : > { %v1447_v48 = vrot.slane %v1441_v47, 3 }
 0xb86   : > { %1448 = vrot.lane.b32.xlu0 %v1447_v48, %s3824_s12 }
 0xbec   : > { %v1266_v49 = vpop.permute.xlu1 %1265 }
 0xbed   : > { %1268 = vst.msk [vmem:[#allocation2 + $0x2] sm:$0x3] %vm600_vm4, %v1266_v49 }
 0xbf0   : > { %v1271_v50 = vpop.permute.xlu1 %1270 }
 0xbf1   : > { %1273 = vst.msk [vmem:[#allocation3 + $0x2] sm:$0x3] %vm600_vm4, %v1271_v50 }
 0xbf4   : > { %v1335_v2 = vld [vmem:[#allocation2 + $0x2] sm:$0x3] }
 0xbf5   : > { %v1336_v51 = vpack.c.bf16 %v1335_v2, %v1335_v2 }
 0xbf7   : > { %3120 = vmatmul.mubr.msk.bf16.vlgmr.msra.gmra.mrb[20].mxu1 %vm459_vm3, %v1336_v51 }
 0xbf8   : > { %v1449_v52 = vpop.permute.xlu0 %1448  ;;  %v1520_v53 = vld [vmem:[#allocation3 + $0x2] sm:$0x3]  ;;  %3143 = vmatprep.mubr.msk.bf16.mxu1 (!%p2895_p10), %vm3827_vm8, %v3826_v21  ;;  %3140 = vmatpush3.bf16.msra.mxu1 (!%p2895_p10), %v3448_v42 }
 0xbf9   : > { %1522 = vrot.lane.b32.xlu1 %v1520_v53, %s3824_s12  ;;  %3128 = vmatmul.mubr.msk.bf16.vlgmr.msra.gmra.mrb[24].mxu0 %vm459_vm3, %v1449_v52 }
 0xbfa   : > { %3132 = vmatpush3.bf16.msra.mxu0 (!%p2895_p10), %v3446_v20  ;;  %3135 = vmatprep.mubr.msk.bf16.mxu0 (!%p2895_p10), %vm3827_vm8, %v3826_v21 }
 0xbfb   : > { %3133 = vmatprep.subr.bf16.mxu0 (!%p2895_p10), %v3826_v21  ;;  %3141 = vmatprep.subr.bf16.mxu1 (!%p2895_p10), %v3826_v21 }
 0xbfc   : > { %3142 = vmatpush3.bf16.msra.mxu1 (!%p2895_p10), %v3450_v44 }
 0xbfe   : > { %3134 = vmatpush3.bf16.msra.mxu0 (!%p2895_p10), %v3447_v22 }
 0xbff   : > { %3147 = vmatprep.subr.bf16.mxu0 (!%p2895_p10), %v3826_v21 }
 0xc6b   : > { %v1523_v9 = vpop.permute.xlu1 %1522 }
 0xcca   : > { %v1390_v55 = vpop.f32.mrb[20].mxu1 }
 0xccb   : > { %v3121_v56 = vpop.f32.mrb[21].mxu1 }
 0xccc   : > { %v1393_v57 = vpop.f32.mrb[22].mxu1  ;;  %v1499_v58 = vpop.f32.mrb[24].mxu0 }
 0xccd   : > { %v1500_v59 = vadd.f32 %v1499_v58, %v1390_v55  ;;  %v3122_v60 = vpop.f32.mrb[23].mxu1  ;;  %v3129_v61 = vpop.f32.mrb[25].mxu0 }
 0xcce   : > { %v1502_v62 = vpop.f32.mrb[26].mxu0 }
 0xccf   : > { %v1512_v63 = vadd.f32 %v4180_v54, %v1500_v59  ;;  %v3130_v0 = vpop.f32.mrb[27].mxu0  ;;  %v2906_v59 = vld [vmem:[#allocation13] ss:$0 sm:$0xff] (!%p2895_p10) }
 0xcd1   : > { %3438 = vtanh.f32 %v1512_v63  ;;  %v2893_v3 = vmul.f32 -1.442695, %v1512_v63 }
 0xcd3   : > { %3440 = vpow2.f32 %v2893_v3 }
 0xcdb   : > { %v3439_v1 = vpop.eup %3438 }
 0xcdc   : > { %1527 = vrot.lane.b32.xlu0 %v3439_v1, %s3823_s11 }
 0xcdd   : > { %v3441_v4 = vpop.eup %3440 }
 0xcde   : > { %v1516_v5 = vadd.f32 1.0, %v3441_v4 }
 0xce0   : > { %3442 = vrcp.f32 %v1516_v5 }
 0xcea   : > { %v3443_v6 = vpop.eup %3442 }
 0xceb   : > { %v1525_v54 = vmul.f32 %v3443_v6, %v1523_v9 }
 0xd4e   : > { %v1528_v7 = vpop.permute.xlu0 %1527 }
 0xd4f   : > { %v1530_v8 = vmul.f32 %v3443_v6, %v1528_v7 }
 0xd51   : > { %1532 = vrot.lane.b32.xlu0 %v1530_v8, %s3824_s12 }
 0xd55   : > { %1431 = vrot.lane.b32.xlu0 %v1429_v46, %s3824_s12 }
 0xdc3   : > { %v1533_v10 = vpop.permute.xlu0 %1532 }
 0xdc4   : > { %v1535_v12 = vadd.f32 %v1533_v10, %v1525_v54 }
 0xdc6   : > { %3444 = vtanh.f32 %v1535_v12 }
 0xdc7   : > { %v1432_v14 = vpop.permute.xlu0 %1431 }
 0xdc8   : > { %1435 = vst.msk [vmem:[#allocation2 - $0x6] sm:$0xc0] %vm1434_vm7, %v1432_v14 }
 0xdcf   : > { %v1558_v23 = vld [vmem:[#allocation2] sm:$0x3] (!%p2895_p10) }
 0xdd0   : > { %v3445_v15 = vpop.eup %3444  ;;  %v1559_v24 = vpack.c.bf16 (!%p2895_p10), %v1558_v23, %v1558_v23 }
 0xdd1   : > { %1538 = vrot.lane.b32.xlu1 %v3445_v15, %s3823_s11 }
 0xdd2   : > { %3136 = vmatmul.mubr.msk.bf16.vlgmr.msra.gmra.mrb[0].mxu0 (!%p2895_p10), %vm459_vm3, %v1559_v24 }
 0xdd3   : > { %3151 = vmatprep.mubr.msk.bf16.mxu0 (!%p2895_p10), %vm3827_vm8, %v3826_v21  ;;  %3148 = vmatpush3.bf16.msra.mxu0 (!%p2895_p10), %v3449_v43 }
 0xdd4   : > { %3149 = vmatprep.subr.bf16.mxu0 (!%p2895_p10), %v3826_v21 }
 0xdd5   : > { %1437 = vrot.lane.b32.xlu1 %v4258_v36, %s3825_s8 }
 0xdd7   : > { %3150 = vmatpush3.bf16.msra.mxu0 (!%p2895_p10), %v3451_v45 }
 0xdd9   : > { %1548 = vrot.lane.b32.xlu1 %v1535_v12, %s3825_s8 }
 0xe43   : > { %v1539_v16 = vpop.permute.xlu1 %1538 }
 0xe44   : > { %v1541_v17 = vmul.f32 %v3443_v6, %v1539_v16 }
 0xe46   : > { %1543 = vrot.lane.b32.xlu0 %v1541_v17, %s3824_s12 }
 0xe47   : > { %v1438_v18 = vpop.permute.xlu1 %1437 }
 0xe48   : > { %1440 = vst.msk [vmem:[#allocation3 - $0x6] sm:$0xc0] %vm1434_vm7, %v1438_v18 }
 0xe4b   : > { %v1549_v19 = vpop.permute.xlu1 %1548 }
 0xe4c   : > { %1551 = vst.msk [vmem:[#allocation3 + $0x2] sm:$0x3] %vm600_vm4, %v1549_v19 }
 0xe4f   : > { %v1688_v31 = vld [vmem:[#allocation3] sm:$0x3] (!%p2895_p10) }
 0xe53   : > { %v1798_v51 = vld [vmem:[#allocation3 + $0x2] sm:$0x3] (!%p2895_p10) }
 0xea5   : > { %v1613_v25 = vpop.f32.mrb[0].mxu0 (!%p2895_p10) }
 0xea6   : > { %v1680_v26 = vadd.f32 (!%p2895_p10), %v1613_v25, %v4153_v13  ;;  %v3137_v27 = vpop.f32.mrb[1].mxu0 (!%p2895_p10) }
 0xea7   : > { %v1616_v28 = vpop.f32.mrb[2].mxu0 (!%p2895_p10) }
 0xea8   : > { %3452 = vtanh.f32 (!%p2895_p10), %v1680_v26  ;;  %v3138_v29 = vpop.f32.mrb[3].mxu0 (!%p2895_p10)  ;;  %v2902_v32 = vmul.f32 (!%p2895_p10), -1.442695, %v1680_v26 }
 0xeaa   : > { %3454 = vpow2.f32 (!%p2895_p10), %v2902_v32 }
 0xeb2   : > { %v3453_v30 = vpop.eup (!%p2895_p10), %3452 }
 0xeb3   : > { %1557 = sbr.rel (%p2895_p10) target bundleno = 4947 (0x1353), region = 76  ;;  %1695 = vrot.lane.b32.xlu0 (!%p2895_p10), %v3453_v30, %s3828_s29 }
 0xeb4   : > { %v3455_v33 = vpop.eup (!%p2895_p10), %3454 }
 0xeb5   : > { %v1684_v34 = vadd.f32 (!%p2895_p10), 1.0, %v3455_v33 }
 0xeb7   : > { %1690 = vrot.lane.b32.xlu0 (!%p2895_p10), %v1688_v31, %s3829_s22  ;;  %3456 = vrcp.f32 (!%p2895_p10), %v1684_v34 }
 0xeb8   : > { %v1544_v11 = vpop.permute.xlu0 %1543 }
 0xeb9   : > { %1546 = vst.msk [vmem:[#allocation2 + $0x2] sm:$0x3] %vm600_vm4, %v1544_v11 }
 0xec0   : > { %v1619_v46 = vld [vmem:[#allocation2 + $0x2] sm:$0x3] }
 0xec1   : > { %v3457_v35 = vpop.eup %3456  ;;  %v1620_v47 = vpack.c.bf16 %v1619_v46, %v1619_v46 }
 0xec3   : > { %3144 = vmatmul.mubr.msk.bf16.vlgmr.msra.gmra.mrb[0].mxu1 %vm459_vm3, %v1620_v47 }
 0xf25   : > { %v1696_v36 = vpop.permute.xlu0 %1695 }
 0xf26   : > { %v1698_v37 = vmul.f32 %v3457_v35, %v1696_v36 }
 0xf28   : > { %1700 = vrot.lane.b32.xlu1 %v1698_v37, %s3829_s22 }
 0xf29   : > { %v1691_v38 = vpop.permute.xlu0 %1690 }
 0xf2a   : > { %v1693_v39 = vmul.f32 %v3457_v35, %v1691_v38 }
 0xf96   : > { %v1674_v52 = vpop.f32.mrb[0].mxu1 }
 0xf97   : > { %v3145_v53 = vpop.f32.mrb[1].mxu1 }
 0xf98   : > { %v1677_v55 = vpop.f32.mrb[2].mxu1 }
 0xf99   : > { %v3146_v56 = vpop.f32.mrb[3].mxu1 }
 0xf9a   : > { %v1701_v40 = vpop.permute.xlu1 %1700 }
 0xf9b   : > { %v1703_v41 = vadd.f32 %v1701_v40, %v1693_v39 }
 0xf9d   : > { %3458 = vtanh.f32 %v1703_v41 }
 0xfa7   : > { %v3459_v48 = vpop.eup %3458 }
 0xfa8   : > { %1706 = vrot.lane.b32.xlu1 %v3459_v48, %s3828_s29 }
0x101a   : > { %v1707_v49 = vpop.permute.xlu1 %1706 }
0x101b   : > { %v1709_v50 = vmul.f32 %v3457_v35, %v1707_v49 }
0x101d   : > { %v1720_v2 = vpack.c.bf16 %v1709_v50, %v1709_v50 }
0x101f   : > { %1726 = vrot.lane.b32.xlu0 %v1720_v2, %s3829_s22 }
0x1023   : > { %1800 = vrot.lane.b32.xlu0 %v1798_v51, %s3829_s22 }
0x1091   : > { %v1727_v57 = vpop.permute.xlu0 %1726 }
0x1092   : > { %3152 = vmatmul.mubr.msk.bf16.vlgmr.msra.gmra.mrb[4].mxu0 %vm459_vm3, %v1727_v57 }
0x1095   : > { %v1801_v9 = vpop.permute.xlu0 %1800 }
0x1165   : > { %v1777_v58 = vpop.f32.mrb[4].mxu0 }
0x1166   : > { %v1778_v60 = vadd.f32 %v1777_v58, %v1674_v52  ;;  %v3153_v61 = vpop.f32.mrb[5].mxu0 }
0x1167   : > { %v1780_v62 = vpop.f32.mrb[6].mxu0 }
0x1168   : > { %v1790_v63 = vadd.f32 %v2906_v59, %v1778_v60  ;;  %v3154_v0 = vpop.f32.mrb[7].mxu0 }
0x116a   : > { %3460 = vtanh.f32 %v1790_v63  ;;  %v2907_v3 = vmul.f32 -1.442695, %v1790_v63 }
0x116c   : > { %3462 = vpow2.f32 %v2907_v3 }
0x1174   : > { %v3461_v1 = vpop.eup %3460 }
0x1175   : > { %1805 = vrot.lane.b32.xlu1 %v3461_v1, %s3828_s29 }
0x1176   : > { %v3463_v4 = vpop.eup %3462 }
0x1177   : > { %v1794_v5 = vadd.f32 1.0, %v3463_v4 }
0x1179   : > { %3464 = vrcp.f32 %v1794_v5 }
0x1183   : > { %v3465_v6 = vpop.eup %3464 }
0x1184   : > { %v1803_v54 = vmul.f32 %v3465_v6, %v1801_v9 }
0x11e7   : > { %v1806_v7 = vpop.permute.xlu1 %1805 }
0x11e8   : > { %v1808_v8 = vmul.f32 %v3465_v6, %v1806_v7 }
0x11ea   : > { %1810 = vrot.lane.b32.xlu1 %v1808_v8, %s3829_s22 }
0x11ee   : > { %1711 = vrot.lane.b32.xlu1 %v1709_v50, %s3829_s22 }
0x125c   : > { %v1811_v10 = vpop.permute.xlu1 %1810 }
0x125d   : > { %v1813_v12 = vadd.f32 %v1811_v10, %v1803_v54 }
0x125f   : > { %3466 = vtanh.f32 %v1813_v12 }
0x1260   : > { %v1712_v14 = vpop.permute.xlu1 %1711 }
0x1261   : > { %1714 = vst.msk [vmem:[#allocation2] sm:$0x3] %vm600_vm4, %v1712_v14 }
0x1269   : > { %v3467_v15 = vpop.eup %3466 }
0x126a   : > { %1816 = vrot.lane.b32.xlu0 %v3467_v15, %s3828_s29 }
0x126e   : > { %1716 = vrot.lane.b32.xlu0 %v1703_v41, %s3830_s27 }
0x1272   : > { %1826 = vrot.lane.b32.xlu0 %v1813_v12, %s3830_s27 }
0x12dc   : > { %v1817_v16 = vpop.permute.xlu0 %1816 }
0x12dd   : > { %v1819_v17 = vmul.f32 %v3465_v6, %v1817_v16 }
0x12df   : > { %1821 = vrot.lane.b32.xlu1 %v1819_v17, %s3829_s22 }
0x12e0   : > { %v1717_v18 = vpop.permute.xlu0 %1716 }
0x12e1   : > { %1719 = vst.msk [vmem:[#allocation3] sm:$0x3] %vm600_vm4, %v1717_v18 }
0x12e4   : > { %v1827_v19 = vpop.permute.xlu0 %1826 }
0x12e5   : > { %1829 = vst.msk [vmem:[#allocation3 + $0x2] sm:$0x3] %vm600_vm4, %v1827_v19 }
0x1351   : > { %v1822_v11 = vpop.permute.xlu1 %1821 }
0x1352   : > { %1824 = vst.msk [vmem:[#allocation2 + $0x2] sm:$0x3] %vm600_vm4, %v1822_v11 }
0x1353 PF: > { %s1830_s9 = sadd.s32 5, %s4283_s13 }
0x1354   : > { %p2908_p0 = scmp.ge.s32.totalorder %s1830_s9, 20 }
0x1355   : > { %v3468_v20 = vld [vmem:[#allocation10] sm:$0xff] (!%p2908_p0)   ;;  %v3831_v21 = vmov (!%p2908_p0), 0.0   ;;  %v3469_v22 = vld [vmem:[#allocation10 + $0x8] sm:$0xff] (!%p2908_p0)   ;;  %vm3832_vm9 = vmmov (!%p2908_p0), 0   ;;  %v1835_v23 = vld [vmem:[#allocation2] sm:$0x3] (!%p2908_p0) }
0x1356   : > { %1834 = sbr.rel (%p2908_p0) target bundleno = 6371 (0x18e3), region = 80  ;;  %3155 = vmatprep.subr.bf16.mxu0 (!%p2908_p0), %v3831_v21  ;;  %3163 = vmatprep.subr.bf16.mxu1 (!%p2908_p0), %v3831_v21  ;;  %v1836_v24 = vpack.c.bf16 (!%p2908_p0), %v1835_v23, %v1835_v23  ;;  %v1968_v31 = vld [vmem:[#allocation3] sm:$0x3] (!%p2908_p0)  ;;  %s3833_s30 = smov (!%p2908_p0), 64   ;;  %v3470_v44 = vld [vmem:[#allocation10 + $0x10] sm:$0xff] (!%p2908_p0)   ;;  %v3472_v46 = vld [vmem:[#allocation10 + $0x18] sm:$0xff] (!%p2908_p0)  }
0x1357   : > { %3156 = vmatpush3.bf16.msra.mxu0 (!%p2908_p0), %v3468_v20  ;;  %3159 = vmatprep.mubr.msk.bf16.mxu0 (!%p2908_p0), %vm3832_vm9, %v3831_v21  ;;  %v1970_v33 = vrot.slane (!%p2908_p0), %v1968_v31, 6  ;;  %s3834_s18 = smov (!%p2908_p0), 32   ;;  %v3471_v45 = vld [vmem:[#allocation12] sm:$0xff] (!%p2908_p0)   ;;  %v3473_v47 = vld [vmem:[#allocation12 + $0x8] sm:$0xff] (!%p2908_p0)   ;;  %v2919_v62 = vld [vmem:[#allocation13] ss:$0 sm:$0xff] (!%p2908_p0) }
0x1358   : > { %3157 = vmatprep.subr.bf16.mxu0 (!%p2908_p0), %v3831_v21  ;;  %3167 = vmatprep.mubr.msk.bf16.mxu1 (!%p2908_p0), %vm3832_vm9, %v3831_v21  ;;  %v2080_v55 = vld [vmem:[#allocation3 + $0x2] sm:$0x3] (!%p2908_p0)  ;;  %s3835_s21 = smov (!%p2908_p0), 96  }
0x1359   : > { %3164 = vmatpush3.bf16.msra.mxu1 (!%p2908_p0), %v3470_v44  ;;  %v1896_v48 = vld [vmem:[#allocation2 + $0x2] sm:$0x3] (!%p2908_p0) }
0x135a   : > { %3165 = vmatprep.subr.bf16.mxu1 (!%p2908_p0), %v3831_v21  ;;  %v1897_v49 = vpack.c.bf16 (!%p2908_p0), %v1896_v48, %v1896_v48 }
0x135b   : > { %3158 = vmatpush3.bf16.msra.mxu0 (!%p2908_p0), %v3469_v22 }
0x135c   : > { %3171 = vmatprep.subr.bf16.mxu0 (!%p2908_p0), %v3831_v21 }
0x135d   : > { %3166 = vmatpush3.bf16.msra.mxu1 %v3472_v46 }
0x135e   : > { %3160 = vmatmul.mubr.msk.bf16.vlgmr.msra.gmra.mrb[0].mxu0 %vm459_vm3, %v1836_v24 }
0x135f   : > { %3175 = vmatprep.mubr.msk.bf16.mxu0 %vm3832_vm9, %v3831_v21  ;;  %3172 = vmatpush3.bf16.msra.mxu0 %v3471_v45 }
0x1360   : > { %3173 = vmatprep.subr.bf16.mxu0 %v3831_v21  ;;  %3168 = vmatmul.mubr.msk.bf16.vlgmr.msra.gmra.mrb[0].mxu1 %vm459_vm3, %v1897_v49 }
0x1363   : > { %3174 = vmatpush3.bf16.msra.mxu0 %v3473_v47 }
0x1431   : > { %v1890_v25 = vpop.f32.mrb[0].mxu0 }
0x1432   : > { %v1958_v26 = vrot.slane %v1890_v25, 6  ;;  %v3161_v27 = vpop.f32.mrb[1].mxu0 }
0x1433   : > { %v1893_v28 = vpop.f32.mrb[2].mxu0  ;;  %v1951_v56 = vpop.f32.mrb[0].mxu1 }
0x1434   : > { %v1960_v29 = vadd.f32 %v1958_v26, %v4153_v13  ;;  %v3162_v30 = vpop.f32.mrb[3].mxu0  ;;  %v3169_v57 = vpop.f32.mrb[1].mxu1 }
0x1435   : > { %v1954_v58 = vpop.f32.mrb[2].mxu1 }
0x1436   : > { %3474 = vtanh.f32 %v1960_v29  ;;  %v2915_v34 = vmul.f32 -1.442695, %v1960_v29  ;;  %v3170_v59 = vpop.f32.mrb[3].mxu1 }
0x1438   : > { %3476 = vpow2.f32 %v2915_v34 }
0x1440   : > { %v3475_v32 = vpop.eup %3474 }
0x1441   : > { %1976 = vrot.lane.b32.xlu0 %v3475_v32, %s3833_s30 }
0x1442   : > { %v3477_v35 = vpop.eup %3476 }
0x1443   : > { %v1964_v36 = vadd.f32 1.0, %v3477_v35 }
0x1445   : > { %1971 = vrot.lane.b32.xlu0 %v1970_v33, %s3834_s18  ;;  %3478 = vrcp.f32 %v1964_v36 }
0x144f   : > { %v3479_v37 = vpop.eup %3478 }
0x14b3   : > { %v1977_v38 = vpop.permute.xlu0 %1976 }
0x14b4   : > { %v1979_v39 = vmul.f32 %v3479_v37, %v1977_v38 }
0x14b6   : > { %1981 = vrot.lane.b32.xlu1 %v1979_v39, %s3834_s18 }
0x14b7   : > { %v1972_v40 = vpop.permute.xlu0 %1971 }
0x14b8   : > { %v1974_v41 = vmul.f32 %v3479_v37, %v1972_v40 }
0x1528   : > { %v1982_v42 = vpop.permute.xlu1 %1981 }
0x1529   : > { %v1984_v43 = vadd.f32 %v1982_v42, %v1974_v41 }
0x152b   : > { %3480 = vtanh.f32 %v1984_v43 }
0x1535   : > { %v3481_v50 = vpop.eup %3480 }
0x1536   : > { %1987 = vrot.lane.b32.xlu1 %v3481_v50, %s3833_s30 }
0x15a8   : > { %v1988_v2 = vpop.permute.xlu1 %1987 }
0x15a9   : > { %v1990_v51 = vmul.f32 %v3479_v37, %v1988_v2 }
0x15ab   : > { %v2001_v52 = vpack.c.bf16 %v1990_v51, %v1990_v51 }
0x15ad   : > { %v2007_v53 = vrot.slane %v2001_v52, 1 }
0x15af   : > { %2008 = vrot.lane.b32.xlu0 %v2007_v53, %s3834_s18 }
0x15b3   : > { %2082 = vrot.lane.b32.xlu0 %v2080_v55, %s3834_s18 }
0x1621   : > { %v2009_v60 = vpop.permute.xlu0 %2008 }
0x1622   : > { %3176 = vmatmul.mubr.msk.bf16.vlgmr.msra.gmra.mrb[4].mxu0 %vm459_vm3, %v2009_v60 }
0x1625   : > { %v2083_v12 = vpop.permute.xlu0 %2082 }
0x16f5   : > { %v2059_v61 = vpop.f32.mrb[4].mxu0 }
0x16f6   : > { %v2060_v63 = vadd.f32 %v2059_v61, %v1951_v56  ;;  %v3177_v0 = vpop.f32.mrb[5].mxu0 }
0x16f7   : > { %v2062_v1 = vpop.f32.mrb[6].mxu0 }
0x16f8   : > { %v2072_v3 = vadd.f32 %v2919_v62, %v2060_v63  ;;  %v3178_v4 = vpop.f32.mrb[7].mxu0 }
0x16fa   : > { %3482 = vtanh.f32 %v2072_v3  ;;  %v2920_v6 = vmul.f32 -1.442695, %v2072_v3 }
0x16fc   : > { %3484 = vpow2.f32 %v2920_v6 }
0x1704   : > { %v3483_v5 = vpop.eup %3482 }
0x1705   : > { %2087 = vrot.lane.b32.xlu1 %v3483_v5, %s3833_s30 }
0x1706   : > { %v3485_v7 = vpop.eup %3484 }
0x1707   : > { %v2076_v8 = vadd.f32 1.0, %v3485_v7 }
0x1709   : > { %3486 = vrcp.f32 %v2076_v8 }
0x1713   : > { %v3487_v9 = vpop.eup %3486 }
0x1714   : > { %v2085_v14 = vmul.f32 %v3487_v9, %v2083_v12 }
0x1777   : > { %v2088_v54 = vpop.permute.xlu1 %2087 }
0x1778   : > { %v2090_v10 = vmul.f32 %v3487_v9, %v2088_v54 }
0x177a   : > { %2092 = vrot.lane.b32.xlu1 %v2090_v10, %s3834_s18 }
0x177e   : > { %1992 = vrot.lane.b32.xlu1 %v1990_v51, %s3834_s18 }
0x17ec   : > { %v2093_v15 = vpop.permute.xlu1 %2092 }
0x17ed   : > { %v2095_v16 = vadd.f32 %v2093_v15, %v2085_v14 }
0x17ef   : > { %3488 = vtanh.f32 %v2095_v16 }
0x17f0   : > { %v1993_v17 = vpop.permute.xlu1 %1992 }
0x17f1   : > { %1995 = vst.msk [vmem:[#allocation2 - $0x2] sm:$0xc] %vm878_vm5, %v1993_v17 }
0x17f9   : > { %v3489_v18 = vpop.eup %3488 }
0x17fa   : > { %2098 = vrot.lane.b32.xlu0 %v3489_v18, %s3833_s30 }
0x17fe   : > { %1997 = vrot.lane.b32.xlu0 %v1984_v43, %s3835_s21 }
0x1802   : > { %2108 = vrot.lane.b32.xlu0 %v2095_v16, %s3835_s21 }
0x186c   : > { %v2099_v19 = vpop.permute.xlu0 %2098 }
0x186d   : > { %v2101_v11 = vmul.f32 %v3487_v9, %v2099_v19 }
0x186f   : > { %2103 = vrot.lane.b32.xlu1 %v2101_v11, %s3834_s18 }
0x1870   : > { %v1998_v20 = vpop.permute.xlu0 %1997 }
0x1871   : > { %2000 = vst.msk [vmem:[#allocation3 - $0x2] sm:$0xc] %vm878_vm5, %v1998_v20 }
0x1874   : > { %v2109_v21 = vpop.permute.xlu0 %2108 }
0x1875   : > { %2111 = vst.msk [vmem:[#allocation3 + $0x2] sm:$0x3] %vm600_vm4, %v2109_v21 }
0x18e1   : > { %v2104_v22 = vpop.permute.xlu1 %2103 }
0x18e2   : > { %2106 = vst.msk [vmem:[#allocation2 + $0x2] sm:$0x3] %vm600_vm4, %v2104_v22 }
0x18e3 PF: > { %s2112_s23 = sadd.s32 6, %s4283_s13 }
0x18e4   : > { %p2921_p9 = scmp.ge.s32.totalorder %s2112_s23, 20 }
0x18e5   : > { %v3490_v23 = vld [vmem:[#allocation10] sm:$0xff] (!%p2921_p9)   ;;  %v3836_v24 = vmov (!%p2921_p9), 0.0   ;;  %v3491_v25 = vld [vmem:[#allocation10 + $0x8] sm:$0xff] (!%p2921_p9)   ;;  %vm3837_vm10 = vmmov (!%p2921_p9), 0   ;;  %v2117_v26 = vld [vmem:[#allocation2] sm:$0x3] (!%p2921_p9) }
0x18e6   : > { %2116 = sbr.rel (%p2921_p9) target bundleno = 7795 (0x1e73), region = 84  ;;  %3179 = vmatprep.subr.bf16.mxu0 (!%p2921_p9), %v3836_v24  ;;  %3187 = vmatprep.subr.bf16.mxu1 (!%p2921_p9), %v3836_v24  ;;  %v2118_v27 = vpack.c.bf16 (!%p2921_p9), %v2117_v26, %v2117_v26  ;;  %v2250_v34 = vld [vmem:[#allocation3] sm:$0x3] (!%p2921_p9)  ;;  %s3838_s15 = smov (!%p2921_p9), 64   ;;  %v3492_v47 = vld [vmem:[#allocation10 + $0x10] sm:$0xff] (!%p2921_p9)   ;;  %v3494_v49 = vld [vmem:[#allocation10 + $0x18] sm:$0xff] (!%p2921_p9)  }
0x18e7   : > { %3180 = vmatpush3.bf16.msra.mxu0 (!%p2921_p9), %v3490_v23  ;;  %3183 = vmatprep.mubr.msk.bf16.mxu0 (!%p2921_p9), %vm3837_vm10, %v3836_v24  ;;  %v2252_v36 = vrot.slane (!%p2921_p9), %v2250_v34, 4  ;;  %s3839_s24 = smov (!%p2921_p9), 32   ;;  %v3493_v48 = vld [vmem:[#allocation12] sm:$0xff] (!%p2921_p9)   ;;  %v3495_v50 = vld [vmem:[#allocation12 + $0x8] sm:$0xff] (!%p2921_p9)   ;;  %v2932_v1 = vld [vmem:[#allocation13] ss:$0 sm:$0xff] (!%p2921_p9) }
0x18e8   : > { %3181 = vmatprep.subr.bf16.mxu0 (!%p2921_p9), %v3836_v24  ;;  %3191 = vmatprep.mubr.msk.bf16.mxu1 (!%p2921_p9), %vm3837_vm10, %v3836_v24  ;;  %v2362_v58 = vld [vmem:[#allocation3 + $0x2] sm:$0x3] (!%p2921_p9)  ;;  %s3840_s10 = smov (!%p2921_p9), 96  }
0x18e9   : > { %3188 = vmatpush3.bf16.msra.mxu1 (!%p2921_p9), %v3492_v47  ;;  %v2178_v2 = vld [vmem:[#allocation2 + $0x2] sm:$0x3] (!%p2921_p9) }
0x18ea   : > { %3189 = vmatprep.subr.bf16.mxu1 (!%p2921_p9), %v3836_v24  ;;  %v2179_v51 = vpack.c.bf16 (!%p2921_p9), %v2178_v2, %v2178_v2 }
0x18eb   : > { %3182 = vmatpush3.bf16.msra.mxu0 (!%p2921_p9), %v3491_v25 }
0x18ec   : > { %3195 = vmatprep.subr.bf16.mxu0 (!%p2921_p9), %v3836_v24 }
0x18ed   : > { %3190 = vmatpush3.bf16.msra.mxu1 %v3494_v49 }
0x18ee   : > { %3184 = vmatmul.mubr.msk.bf16.vlgmr.msra.gmra.mrb[0].mxu0 %vm459_vm3, %v2118_v27 }
0x18ef   : > { %3199 = vmatprep.mubr.msk.bf16.mxu0 %vm3837_vm10, %v3836_v24  ;;  %3196 = vmatpush3.bf16.msra.mxu0 %v3493_v48 }
0x18f0   : > { %3197 = vmatprep.subr.bf16.mxu0 %v3836_v24  ;;  %3192 = vmatmul.mubr.msk.bf16.vlgmr.msra.gmra.mrb[0].mxu1 %vm459_vm3, %v2179_v51 }
0x18f3   : > { %3198 = vmatpush3.bf16.msra.mxu0 %v3495_v50 }
0x19c1   : > { %v2172_v28 = vpop.f32.mrb[0].mxu0 }
0x19c2   : > { %v2240_v29 = vrot.slane %v2172_v28, 4  ;;  %v3185_v30 = vpop.f32.mrb[1].mxu0 }
0x19c3   : > { %v2175_v31 = vpop.f32.mrb[2].mxu0  ;;  %v2233_v59 = vpop.f32.mrb[0].mxu1 }
0x19c4   : > { %v2242_v32 = vadd.f32 %v2240_v29, %v4153_v13  ;;  %v3186_v33 = vpop.f32.mrb[3].mxu0  ;;  %v3193_v60 = vpop.f32.mrb[1].mxu1 }
0x19c5   : > { %v2236_v61 = vpop.f32.mrb[2].mxu1 }
0x19c6   : > { %3496 = vtanh.f32 %v2242_v32  ;;  %v2928_v37 = vmul.f32 -1.442695, %v2242_v32  ;;  %v3194_v62 = vpop.f32.mrb[3].mxu1 }
0x19c8   : > { %3498 = vpow2.f32 %v2928_v37 }
0x19d0   : > { %v3497_v35 = vpop.eup %3496 }
0x19d1   : > { %2258 = vrot.lane.b32.xlu0 %v3497_v35, %s3838_s15 }
0x19d2   : > { %v3499_v38 = vpop.eup %3498 }
0x19d3   : > { %v2246_v39 = vadd.f32 1.0, %v3499_v38 }
0x19d5   : > { %2253 = vrot.lane.b32.xlu0 %v2252_v36, %s3839_s24  ;;  %3500 = vrcp.f32 %v2246_v39 }
0x19df   : > { %v3501_v40 = vpop.eup %3500 }
0x1a43   : > { %v2259_v41 = vpop.permute.xlu0 %2258 }
0x1a44   : > { %v2261_v42 = vmul.f32 %v3501_v40, %v2259_v41 }
0x1a46   : > { %2263 = vrot.lane.b32.xlu1 %v2261_v42, %s3839_s24 }
0x1a47   : > { %v2254_v43 = vpop.permute.xlu0 %2253 }
0x1a48   : > { %v2256_v44 = vmul.f32 %v3501_v40, %v2254_v43 }
0x1ab8   : > { %v2264_v45 = vpop.permute.xlu1 %2263 }
0x1ab9   : > { %v2266_v46 = vadd.f32 %v2264_v45, %v2256_v44 }
0x1abb   : > { %3502 = vtanh.f32 %v2266_v46 }
0x1ac5   : > { %v3503_v52 = vpop.eup %3502 }
0x1ac6   : > { %2269 = vrot.lane.b32.xlu1 %v3503_v52, %s3838_s15 }
0x1b38   : > { %v2270_v53 = vpop.permute.xlu1 %2269 }
0x1b39   : > { %v2272_v55 = vmul.f32 %v3501_v40, %v2270_v53 }
0x1b3b   : > { %v2283_v56 = vpack.c.bf16 %v2272_v55, %v2272_v55 }
0x1b3d   : > { %v2289_v57 = vrot.slane %v2283_v56, 2 }
0x1b3f   : > { %2290 = vrot.lane.b32.xlu0 %v2289_v57, %s3839_s24 }
0x1b43   : > { %2364 = vrot.lane.b32.xlu0 %v2362_v58, %s3839_s24 }
0x1bb1   : > { %v2291_v63 = vpop.permute.xlu0 %2290 }
0x1bb2   : > { %3200 = vmatmul.mubr.msk.bf16.vlgmr.msra.gmra.mrb[4].mxu0 %vm459_vm3, %v2291_v63 }
0x1bb5   : > { %v2365_v16 = vpop.permute.xlu0 %2364 }
0x1c85   : > { %v2341_v0 = vpop.f32.mrb[4].mxu0 }
0x1c86   : > { %v2342_v3 = vadd.f32 %v2341_v0, %v2233_v59  ;;  %v3201_v4 = vpop.f32.mrb[5].mxu0 }
0x1c87   : > { %v2344_v5 = vpop.f32.mrb[6].mxu0 }
0x1c88   : > { %v2354_v6 = vadd.f32 %v2932_v1, %v2342_v3  ;;  %v3202_v7 = vpop.f32.mrb[7].mxu0 }
0x1c8a   : > { %3504 = vtanh.f32 %v2354_v6  ;;  %v2933_v9 = vmul.f32 -1.442695, %v2354_v6 }
0x1c8c   : > { %3506 = vpow2.f32 %v2933_v9 }
0x1c94   : > { %v3505_v8 = vpop.eup %3504 }
0x1c95   : > { %2369 = vrot.lane.b32.xlu1 %v3505_v8, %s3838_s15 }
0x1c96   : > { %v3507_v54 = vpop.eup %3506 }
0x1c97   : > { %v2358_v10 = vadd.f32 1.0, %v3507_v54 }
0x1c99   : > { %3508 = vrcp.f32 %v2358_v10 }
0x1ca3   : > { %v3509_v12 = vpop.eup %3508 }
0x1ca4   : > { %v2367_v17 = vmul.f32 %v3509_v12, %v2365_v16 }
0x1d07   : > { %v2370_v14 = vpop.permute.xlu1 %2369 }
0x1d08   : > { %v2372_v15 = vmul.f32 %v3509_v12, %v2370_v14 }
0x1d0a   : > { %2374 = vrot.lane.b32.xlu1 %v2372_v15, %s3839_s24 }
0x1d0e   : > { %2274 = vrot.lane.b32.xlu1 %v2272_v55, %s3839_s24 }
0x1d7c   : > { %v2375_v18 = vpop.permute.xlu1 %2374 }
0x1d7d   : > { %v2377_v19 = vadd.f32 %v2375_v18, %v2367_v17 }
0x1d7f   : > { %3510 = vtanh.f32 %v2377_v19 }
0x1d80   : > { %v2275_v11 = vpop.permute.xlu1 %2274 }
0x1d81   : > { %2277 = vst.msk [vmem:[#allocation2 - $0x4] sm:$0x30] %vm1156_vm6, %v2275_v11 }
0x1d89   : > { %v3511_v20 = vpop.eup %3510 }
0x1d8a   : > { %2380 = vrot.lane.b32.xlu0 %v3511_v20, %s3838_s15 }
0x1d8e   : > { %2279 = vrot.lane.b32.xlu0 %v2266_v46, %s3840_s10 }
0x1d92   : > { %2390 = vrot.lane.b32.xlu0 %v2377_v19, %s3840_s10 }
0x1dfc   : > { %v2381_v21 = vpop.permute.xlu0 %2380 }
0x1dfd   : > { %v2383_v22 = vmul.f32 %v3509_v12, %v2381_v21 }
0x1dff   : > { %2385 = vrot.lane.b32.xlu1 %v2383_v22, %s3839_s24 }
0x1e00   : > { %v2280_v23 = vpop.permute.xlu0 %2279 }
0x1e01   : > { %2282 = vst.msk [vmem:[#allocation3 - $0x4] sm:$0x30] %vm1156_vm6, %v2280_v23 }
0x1e04   : > { %v2391_v24 = vpop.permute.xlu0 %2390 }
0x1e05   : > { %2393 = vst.msk [vmem:[#allocation3 + $0x2] sm:$0x3] %vm600_vm4, %v2391_v24 }
0x1e71   : > { %v2386_v25 = vpop.permute.xlu1 %2385 }
0x1e72   : > { %2388 = vst.msk [vmem:[#allocation2 + $0x2] sm:$0x3] %vm600_vm4, %v2386_v25 }
0x1e73 PF: > { %s2394_s16 = sadd.s32 7, %s4283_s13 }
0x1e74   : > { %p2934_p2 = scmp.ge.s32.totalorder %s2394_s16, 20 }
0x1e75   : > { %v3512_v26 = vld [vmem:[#allocation10] sm:$0xff] (!%p2934_p2)   ;;  %v3841_v27 = vmov (!%p2934_p2), 0.0   ;;  %v3513_v28 = vld [vmem:[#allocation10 + $0x8] sm:$0xff] (!%p2934_p2)   ;;  %vm3842_vm11 = vmmov (!%p2934_p2), 0   ;;  %v2399_v29 = vld [vmem:[#allocation2] sm:$0x3] (!%p2934_p2) }
0x1e76   : > { %2398 = sbr.rel (%p2934_p2) target bundleno = 9219 (0x2403), region = 88  ;;  %3203 = vmatprep.subr.bf16.mxu0 (!%p2934_p2), %v3841_v27  ;;  %3211 = vmatprep.subr.bf16.mxu1 (!%p2934_p2), %v3841_v27  ;;  %v2400_v30 = vpack.c.bf16 (!%p2934_p2), %v2399_v29, %v2399_v29  ;;  %v2532_v37 = vld [vmem:[#allocation3] sm:$0x3] (!%p2934_p2)  ;;  %s3843_s14 = smov (!%p2934_p2), 64   ;;  %v3514_v49 = vld [vmem:[#allocation10 + $0x10] sm:$0xff] (!%p2934_p2)   ;;  %v3516_v2 = vld [vmem:[#allocation10 + $0x18] sm:$0xff] (!%p2934_p2)  }
0x1e77   : > { %3204 = vmatpush3.bf16.msra.mxu0 (!%p2934_p2), %v3512_v26  ;;  %3207 = vmatprep.mubr.msk.bf16.mxu0 (!%p2934_p2), %vm3842_vm11, %v3841_v27  ;;  %v2534_v39 = vrot.slane (!%p2934_p2), %v2532_v37, 2  ;;  %s3844_s19 = smov (!%p2934_p2), 32   ;;  %v3515_v50 = vld [vmem:[#allocation12] sm:$0xff] (!%p2934_p2)   ;;  %v3517_v51 = vld [vmem:[#allocation12 + $0x8] sm:$0xff] (!%p2934_p2)   ;;  %v2945_v4 = vld [vmem:[#allocation13] ss:$0 sm:$0xff] (!%p2934_p2) }
0x1e78   : > { %3205 = vmatprep.subr.bf16.mxu0 (!%p2934_p2), %v3841_v27  ;;  %3215 = vmatprep.mubr.msk.bf16.mxu1 (!%p2934_p2), %vm3842_vm11, %v3841_v27  ;;  %v2644_v60 = vld [vmem:[#allocation3 + $0x2] sm:$0x3] (!%p2934_p2)  ;;  %s3845_s20 = smov (!%p2934_p2), 96  }
0x1e79   : > { %3212 = vmatpush3.bf16.msra.mxu1 (!%p2934_p2), %v3514_v49  ;;  %v2460_v52 = vld [vmem:[#allocation2 + $0x2] sm:$0x3] (!%p2934_p2) }
0x1e7a   : > { %3213 = vmatprep.subr.bf16.mxu1 (!%p2934_p2), %v3841_v27  ;;  %v2461_v53 = vpack.c.bf16 (!%p2934_p2), %v2460_v52, %v2460_v52 }
0x1e7b   : > { %3206 = vmatpush3.bf16.msra.mxu0 (!%p2934_p2), %v3513_v28 }
0x1e7c   : > { %3219 = vmatprep.subr.bf16.mxu0 (!%p2934_p2), %v3841_v27 }
0x1e7d   : > { %3214 = vmatpush3.bf16.msra.mxu1 %v3516_v2 }
0x1e7e   : > { %3208 = vmatmul.mubr.msk.bf16.vlgmr.msra.gmra.mrb[0].mxu0 %vm459_vm3, %v2400_v30 }
0x1e7f   : > { %3223 = vmatprep.mubr.msk.bf16.mxu0 %vm3842_vm11, %v3841_v27  ;;  %3220 = vmatpush3.bf16.msra.mxu0 %v3515_v50 }
0x1e80   : > { %3221 = vmatprep.subr.bf16.mxu0 %v3841_v27  ;;  %3216 = vmatmul.mubr.msk.bf16.vlgmr.msra.gmra.mrb[0].mxu1 %vm459_vm3, %v2461_v53 }
0x1e83   : > { %3222 = vmatpush3.bf16.msra.mxu0 %v3517_v51 }
0x1f51   : > { %v2454_v31 = vpop.f32.mrb[0].mxu0 }
0x1f52   : > { %v2522_v32 = vrot.slane %v2454_v31, 2  ;;  %v3209_v33 = vpop.f32.mrb[1].mxu0 }
0x1f53   : > { %v2457_v34 = vpop.f32.mrb[2].mxu0  ;;  %v2515_v61 = vpop.f32.mrb[0].mxu1 }
0x1f54   : > { %v2524_v35 = vadd.f32 %v2522_v32, %v4153_v13  ;;  %v3210_v36 = vpop.f32.mrb[3].mxu0  ;;  %v3217_v62 = vpop.f32.mrb[1].mxu1 }
0x1f55   : > { %v2518_v63 = vpop.f32.mrb[2].mxu1 }
0x1f56   : > { %3518 = vtanh.f32 %v2524_v35  ;;  %v2941_v40 = vmul.f32 -1.442695, %v2524_v35  ;;  %v3218_v0 = vpop.f32.mrb[3].mxu1 }
0x1f58   : > { %3520 = vpow2.f32 %v2941_v40 }
0x1f60   : > { %v3519_v38 = vpop.eup %3518 }
0x1f61   : > { %2540 = vrot.lane.b32.xlu0 %v3519_v38, %s3843_s14 }
0x1f62   : > { %v3521_v41 = vpop.eup %3520 }
0x1f63   : > { %v2528_v42 = vadd.f32 1.0, %v3521_v41 }
0x1f65   : > { %2535 = vrot.lane.b32.xlu0 %v2534_v39, %s3844_s19  ;;  %3522 = vrcp.f32 %v2528_v42 }
0x1f6f   : > { %v3523_v43 = vpop.eup %3522 }
0x1fd3   : > { %v2541_v44 = vpop.permute.xlu0 %2540 }
0x1fd4   : > { %v2543_v45 = vmul.f32 %v3523_v43, %v2541_v44 }
0x1fd6   : > { %2545 = vrot.lane.b32.xlu1 %v2543_v45, %s3844_s19 }
0x1fd7   : > { %v2536_v13 = vpop.permute.xlu0 %2535 }
0x1fd8   : > { %v2538_v46 = vmul.f32 %v3523_v43, %v2536_v13 }
0x2048   : > { %v2546_v47 = vpop.permute.xlu1 %2545 }
0x2049   : > { %v2548_v48 = vadd.f32 %v2546_v47, %v2538_v46 }
0x204b   : > { %3524 = vtanh.f32 %v2548_v48 }
0x2055   : > { %v3525_v55 = vpop.eup %3524 }
0x2056   : > { %2551 = vrot.lane.b32.xlu1 %v3525_v55, %s3843_s14 }
0x20c8   : > { %v2552_v56 = vpop.permute.xlu1 %2551 }
0x20c9   : > { %v2554_v57 = vmul.f32 %v3523_v43, %v2552_v56 }
0x20cb   : > { %v2565_v58 = vpack.c.bf16 %v2554_v57, %v2554_v57 }
0x20cd   : > { %v2571_v59 = vrot.slane %v2565_v58, 3 }
0x20cf   : > { %2572 = vrot.lane.b32.xlu0 %v2571_v59, %s3844_s19 }
0x20d3   : > { %2646 = vrot.lane.b32.xlu0 %v2644_v60, %s3844_s19 }
0x2141   : > { %v2573_v1 = vpop.permute.xlu0 %2572 }
0x2142   : > { %3224 = vmatmul.mubr.msk.bf16.vlgmr.msra.gmra.mrb[4].mxu0 %vm459_vm3, %v2573_v1 }
0x2145   : > { %v2647_v18 = vpop.permute.xlu0 %2646 }
0x2215   : > { %v2623_v3 = vpop.f32.mrb[4].mxu0 }
0x2216   : > { %v2624_v5 = vadd.f32 %v2623_v3, %v2515_v61  ;;  %v3225_v6 = vpop.f32.mrb[5].mxu0 }
0x2217   : > { %v2626_v7 = vpop.f32.mrb[6].mxu0 }
0x2218   : > { %v2636_v8 = vadd.f32 %v2945_v4, %v2624_v5  ;;  %v3226_v9 = vpop.f32.mrb[7].mxu0 }
0x221a   : > { %3526 = vtanh.f32 %v2636_v8  ;;  %v2946_v10 = vmul.f32 -1.442695, %v2636_v8 }
0x221c   : > { %3528 = vpow2.f32 %v2946_v10 }
0x2224   : > { %v3527_v54 = vpop.eup %3526 }
0x2225   : > { %2651 = vrot.lane.b32.xlu1 %v3527_v54, %s3843_s14 }
0x2226   : > { %v3529_v12 = vpop.eup %3528 }
0x2227   : > { %v2640_v14 = vadd.f32 1.0, %v3529_v12 }
0x2229   : > { %3530 = vrcp.f32 %v2640_v14 }
0x2233   : > { %v3531_v15 = vpop.eup %3530 }
0x2234   : > { %v2649_v19 = vmul.f32 %v3531_v15, %v2647_v18 }
0x2297   : > { %v2652_v16 = vpop.permute.xlu1 %2651 }
0x2298   : > { %v2654_v17 = vmul.f32 %v3531_v15, %v2652_v16 }
0x229a   : > { %2656 = vrot.lane.b32.xlu1 %v2654_v17, %s3844_s19 }
0x229e   : > { %2556 = vrot.lane.b32.xlu1 %v2554_v57, %s3844_s19 }
0x230c   : > { %v2657_v11 = vpop.permute.xlu1 %2656 }
0x230d   : > { %v2659_v20 = vadd.f32 %v2657_v11, %v2649_v19 }
0x230f   : > { %3532 = vtanh.f32 %v2659_v20 }
0x2310   : > { %v2557_v21 = vpop.permute.xlu1 %2556 }
0x2311   : > { %2559 = vst.msk [vmem:[#allocation2 - $0x6] sm:$0xc0] %vm1434_vm7, %v2557_v21 }
0x2319   : > { %v3533_v22 = vpop.eup %3532 }
0x231a   : > { %2662 = vrot.lane.b32.xlu0 %v3533_v22, %s3843_s14 }
0x231e   : > { %2561 = vrot.lane.b32.xlu0 %v2548_v48, %s3845_s20 }
0x2322   : > { %2672 = vrot.lane.b32.xlu0 %v2659_v20, %s3845_s20 }
0x238c   : > { %v2663_v23 = vpop.permute.xlu0 %2662 }
0x238d   : > { %v2665_v24 = vmul.f32 %v3531_v15, %v2663_v23 }
0x238f   : > { %2667 = vrot.lane.b32.xlu1 %v2665_v24, %s3844_s19 }
0x2390   : > { %v2562_v25 = vpop.permute.xlu0 %2561 }
0x2391   : > { %2564 = vst.msk [vmem:[#allocation3 - $0x6] sm:$0xc0] %vm1434_vm7, %v2562_v25 }
0x2394   : > { %v2673_v26 = vpop.permute.xlu0 %2672 }
0x2395   : > { %2675 = vst.msk [vmem:[#allocation3 + $0x2] sm:$0x3] %vm600_vm4, %v2673_v26 }
0x2401   : > { %v2668_v27 = vpop.permute.xlu1 %2667 }
0x2402   : > { %2670 = vst.msk [vmem:[#allocation2 + $0x2] sm:$0x3] %vm600_vm4, %v2668_v27 }
0x2403 PF: > { %p2947_p6 = scmp.ne.s32.totalorder %s3908_s28, 2 }
0x2404   : > { %v2680_v28 = vld [vmem:[#allocation2] sm:$0x3] (!%p2947_p6)  ;;  %v2684_v30 = vld [vmem:[#allocation3] sm:$0x3] (!%p2947_p6)  ;;  %v2685_v31 = vld [vmem:[#allocation3 + $0x2] sm:$0x3] (!%p2947_p6) }
0x2405   : > { %2679 = sbr.rel (%p2947_p6) target bundleno = 9228 (0x240c), region = 92  ;;  %2682 = vst.msk [vmem:[#allocation15] sm:$0x3] (!%p2947_p6), %vm600_vm4, %v2680_v28  ;;  %2686 = vst.msk [vmem:[#allocation16] sm:$0x3] (!%p2947_p6), %vm600_vm4, %v2684_v30 }
0x2406   : > { %2687 = vst.msk [vmem:[#allocation16 + $0x2] sm:$0x3] (!%p2947_p6), %vm600_vm4, %v2685_v31 }
0x2409   : > { %v2681_v29 = vld [vmem:[#allocation2 + $0x2] sm:$0x3] (!%p2947_p6) }
0x240a   : > { %2683 = vst.msk [vmem:[#allocation15 + $0x2] sm:$0x3] (!%p2947_p6), %vm600_vm4, %v2681_v29 }
0x240c PF: > { %p3282_p3 = scmp.eq.s32.totalorder %s3908_s28, 2  ;;  %s3846_s11 = smov [#allocation15]  }
0x240d   : > { %s2694_s8 = sshll.u32 %s3846_s11, 4  ;;  %s2695_s8 = int_to_ptr.vmem [resolvable:$true] %s2694_s8 }
0x240e   : > { %s3702_s13 = scalar_lea.vmem %s2695_s8, 64  ;;  %p3709_p13 = scmp.lt.s32.totalorder %s2695_s8, %s2695_s8 }
0x240f   : > { %p3703_p7 = scmp.ne.s32.totalorder %s2695_s8, %s3702_s13  ;;  %p3710_p1 = scmp.lt.s32.totalorder %s3702_s13, %s3702_s13 }
0x2411   : > { %p3704_p11 = pnand %p3703_p7, %p3282_p3  ;;  %p3711_p5 = por %p3710_p1, %p3709_p13 }
0x2413   : > { %p3705_p12 = pneg %p3704_p11 }
0x2415   : > { %p3712_p8 = pnand %p3711_p5, %p3705_p12 }
0x2417   : > { %3715 = shalt.err (!%p3712_p8)
}
0x2418   : > { %s3716_s22 = scalar_lea.hbm %s4442_s6, 64 }
0x2419   : > { %p3717_p4 = scmp.ne.s32.totalorder %s4442_s6, %s3716_s22  ;;  %p3722_p9 = scmp.lt.u32.totalorder %s3716_s22, %s4442_s6 }
0x241b   : > { %p3718_p10 = pnand %p3717_p4, %p3282_p3 }
0x241d   : > { %p3719_p0 = pneg %p3718_p10 }
0x241f   : > { %p3724_p2 = pnand %p3722_p9, %p3719_p0 }
0x2421   : > { %3727 = shalt.err (!%p3724_p2)
}
0x2422   : > { %s3847_s21 = smov 2   ;;  %s3848_s24 = smov [#allocation16]  }
0x2423   : > { %3249 = dma.vmem_to_hbm [thread:$0]  (%p3282_p3), %s2695_s8, 64, %s4442_s6, [#allocation6], %s3824_s12, %s3824_s12, %s3847_s21  }
0x2424   : > { %s2707_s10 = sshll.u32 %s3848_s24, 4  ;;  %s2708_s10 = int_to_ptr.vmem [resolvable:$true] %s2707_s10 }
0x2425   : > { %s3728_s16 = scalar_lea.vmem %s2708_s10, 64  ;;  %p3735_p12 = scmp.lt.s32.totalorder %s2708_s10, %s2708_s10 }
0x2426   : > { %p3729_p6 = scmp.ne.s32.totalorder %s2708_s10, %s3728_s16  ;;  %p3736_p13 = scmp.lt.s32.totalorder %s3728_s16, %s3728_s16 }
0x2428   : > { %p3730_p7 = pnand %p3729_p6, %p3282_p3  ;;  %p3737_p1 = por %p3736_p13, %p3735_p12 }
0x242a   : > { %p3731_p11 = pneg %p3730_p7 }
0x242c   : > { %p3738_p5 = pnand %p3737_p1, %p3731_p11 }
0x242e   : > { %3741 = shalt.err (!%p3738_p5)
}
0x242f   : > { %s3742_s20 = scalar_lea.hbm %s4443_s7, 64 }
0x2430   : > { %p3743_p8 = scmp.ne.s32.totalorder %s4443_s7, %s3742_s20  ;;  %p3748_p0 = scmp.lt.u32.totalorder %s3742_s20, %s4443_s7 }
0x2432   : > { %p3744_p4 = pnand %p3743_p8, %p3282_p3 }
0x2434   : > { %p3745_p10 = pneg %p3744_p4 }
0x2436   : > { %p3750_p9 = pnand %p3748_p0, %p3745_p10 }
0x2438   : > { %3753 = shalt.err (!%p3750_p9)
}
0x2439   : > { %3251 = dma.vmem_to_hbm [thread:$0]  (%p3282_p3), %s2708_s10, 64, %s4443_s7, [#allocation17], %s3824_s12, %s3824_s12, %s3847_s21  }
0x243a   : > { %3787 = dma.done.wait (%p3282_p3), [#allocation6], 64  }
0x243b   : > { %3789 = vsyncadd (%p3282_p3), [#allocation6], 4294967232 }
0x243c   : > { %3791 = dma.done.wait (%p3282_p3), [#allocation17], 64  }
0x243d   : > { %3793 = vsyncadd (%p3282_p3), [#allocation17], 4294967232 }
0x243e PF: > { %s4468_s27 = sld [smem:[#allocation24_spill]]  ;;  %s4469_s9 = sld [smem:[#allocation25_spill]] }
0x243f   : > { %s4470_s24 = smov %s3800_s25  ;;  %s4471_s25 = smov %s3804_s26 }
0x2444   : > { %p23_p2 = scmp.ge.s32.totalorder %s4468_s27, 5   ;;  %s4472_s26 = smov %s4469_s9 }
0x2446   :  { %25 = sbr.rel (!%p23_p2) target bundleno = 8 (0x8), region = 136 }
0x244d   :  { %2727 = vsyncpa [#allocation5], 1 }
0x244e   :  { %2729 = vsyncpa [#allocation5 + $0x1], 1 }
0x244f   :  { %2730 = vsyncpa [#allocation8], 1 }
0x2450   :  { %2731 = vsyncpa [#allocation11], 1 }
0x2451   :  { %2732 = vsyncpa [#allocation14], 1 }
0x2452   :  { %2733 = vsyncpa [#allocation6], 1 }
0x2453   :  { %2735 = vsyncpa [#allocation6 + $0x1], 1 }
0x2454   :  { %2736 = vsyncpa [#allocation17], 1 }

</bundles_post_ra>
